<compile_context>
chip_gen: v7x
topology: tpu7x:2x2x1
jax: 0.10.0
libtpu: 0.0.40
codegen_flags: <defaults>
</compile_context>

<pallas_src>
import functools

import jax
import jax.numpy as jnp
import numpy as np
from jax.experimental import pallas as pl
from jax.experimental.pallas import tpu as pltpu


def _cbam_kernel(x_ref, w1t_ref, w2t_ref, wconv_ref, o_ref, pad_ref, *,
                 ks: int, H: int, W: int, Bt: int):
    """One batch block of CBAM.

    x_ref:     (Bt, C, H*W)        VMEM  (lane-dense activations)
    w1t_ref:   (C, Cr)             VMEM  (first Linear, pre-transposed)
    w2t_ref:   (Cr, C)             VMEM  (second Linear, pre-transposed)
    wconv_ref: (ks*ks, 2)          VMEM  (7x7x2 conv weights, tap-major)
    o_ref:     (Bt, C, H*W)        VMEM
    pad_ref:   (2, Bt, H+2p, W+2p) VMEM scratch for the zero-padded pooled maps
    """
    pad = ks // 2
    Hp, Wp = H + 2 * pad, W + 2 * pad
    HW = H * W

    x = x_ref[...]                                        # (Bt, C, HW) f32
    C = x.shape[1]

    # ---------------- channel attention ----------------
    maxv = jnp.max(x, axis=2)                             # (Bt, C)  lane reduce (XLU)
    avgv = jnp.sum(x, axis=2) * (1.0 / HW)                # (Bt, C)

    # Fused MLP over both pooled vectors: one pass with N = 2*Bt rows.
    pooled = jnp.concatenate([maxv, avgv], axis=0)        # (2*Bt, C)
    h = jnp.dot(pooled, w1t_ref[...],
                preferred_element_type=jnp.float32)       # (2*Bt, Cr)
    h = jnp.maximum(h, 0.0)                               # ReLU
    att = jnp.dot(h, w2t_ref[...],
                  preferred_element_type=jnp.float32)     # (2*Bt, C)
    channel_att = jax.nn.sigmoid(att[:Bt] + att[Bt:])     # (Bt, C)

    channel_out = channel_att[:, :, None] * x             # (Bt, C, HW) lane-dense

    # ---------------- spatial attention ----------------
    max_out = jnp.max(channel_out, axis=1)                # (Bt, HW) sublane reduce
    mean_out = jnp.sum(channel_out, axis=1) * (1.0 / C)   # (Bt, HW)

    # Zero-padded maps in a VMEM scratch.  Zeroed every step so each core's
    # scratch border is valid even when the grid is sharded across TensorCores.
    pad_ref[...] = jnp.zeros((2, Bt, Hp, Wp), jnp.float32)
    interior = jnp.concatenate(
        [max_out.reshape(1, Bt, H, W), mean_out.reshape(1, Bt, H, W)], axis=0)
    pad_ref[:, :, pad:pad + H, pad:pad + W] = interior    # single interior store

    # 7x7 conv, 2 input channels -> 1 output channel, stride 1, no bias.
    # 49 unrolled taps; each tap is one FMA on a (2, Bt, H, W) slab with a
    # per-channel weight vector, channels summed at the end.
    wc = wconv_ref[...]                                   # (ks*ks, 2)
    acc = jnp.zeros((2, Bt, H, W), jnp.float32)
    for kh in range(ks):
        for kw in range(ks):
            tap = pad_ref[:, :, kh:kh + H, kw:kw + W]     # (2, Bt, H, W)
            wvec = wc[kh * ks + kw].reshape(2, 1, 1, 1)   # (2,1,1,1)
            acc = acc + wvec * tap
    conv = acc[0] + acc[1]                                # (Bt, H, W)
    spatial_att = jax.nn.sigmoid(conv).reshape(Bt, HW)    # (Bt, HW)

    o_ref[...] = spatial_att[:, None, :] * channel_out    # lane-dense unmasked store


def _pick_batch_block(B, bytes_per_batch, vmem_budget=8 << 20):
    """Largest divisor of B that (a) keeps >=2 grid blocks when B >= 2 (so both
    v7x TensorCores see work) and (b) keeps the double-buffered block footprint
    well inside the scoped-VMEM default on v5e/v6e/v7x."""
    best = 1
    for bt in range(1, B + 1):
        if B % bt:
            continue
        if B >= 2 and B // bt < 2:
            continue
        # ~2x (double buffer) x 2 (in + out) x block bytes
        if 4 * bt * bytes_per_batch > vmem_budget:
            continue
        best = bt
    return best


def cbam_pallas(x, w1, w2, wconv, *, kernel_size=7, batch_block=None):
    """x: (B, C, H, W) f32; w1: (C//r, C); w2: (C, C//r); wconv: (1, 2, k, k)."""
    B, C, H, W = x.shape
    Cr = w1.shape[0]
    HW = H * W
    ks = kernel_size
    pad = ks // 2

    if batch_block is None:
        batch_block = _pick_batch_block(B, C * HW * 4)
    Bt = batch_block
    assert B % Bt == 0

    # Lane-dense activations: flatten spatial dims onto the lane axis.
    x2 = x.reshape(B, C, HW).astype(jnp.float32)
    # Pre-transpose the Linear weights so the kernel does plain row-major dots.
    w1t = w1.T.astype(jnp.float32)                             # (C, Cr)
    w2t = w2.T.astype(jnp.float32)                             # (Cr, C)
    # Conv weights tap-major: row t = (w[0,0,kh,kw], w[0,1,kh,kw]), t = kh*ks+kw.
    wconv_t = wconv.reshape(2, ks * ks).T.astype(jnp.float32)  # (ks*ks, 2)

    kernel = functools.partial(_cbam_kernel, ks=ks, H=H, W=W, Bt=Bt)

    # NOTE: per-step VMEM footprint here is tiny (tens of KiB); for real CBAM
    # feature-map sizes set vmem_limit_bytes and/or tile H as well.
    out = pl.pallas_call(
        kernel,
        out_shape=jax.ShapeDtypeStruct((B, C, HW), jnp.float32),
        grid=(B // Bt,),
        in_specs=[
            pl.BlockSpec((Bt, C, HW), lambda b: (b, 0, 0)),
            pl.BlockSpec((C, Cr), lambda b: (0, 0)),
            pl.BlockSpec((Cr, C), lambda b: (0, 0)),
            pl.BlockSpec((ks * ks, 2), lambda b: (0, 0)),
        ],
        out_specs=pl.BlockSpec((Bt, C, HW), lambda b: (b, 0, 0)),
        scratch_shapes=[
            pltpu.VMEM((2, Bt, H + 2 * pad, W + 2 * pad), jnp.float32),
        ],
        compiler_params=pltpu.CompilerParams(
            dimension_semantics=("parallel",)),
    )(x2, w1t, w2t, wconv_t)

    return out.reshape(B, C, H, W)


def cbam_reference(x, w1, w2, wconv):
    """Pure-JAX reference mirroring the PyTorch forward exactly."""
    maxv = jnp.max(x, axis=(2, 3))                                # (B, C)
    avgv = jnp.mean(x, axis=(2, 3))                               # (B, C)

    def mlp(v):
        return jnp.maximum(v @ w1.T, 0.0) @ w2.T

    ch = jax.nn.sigmoid(mlp(maxv) + mlp(avgv))[:, :, None, None]  # (B, C, 1, 1)
    channel_out = ch * x
    max_out = jnp.max(channel_out, axis=1, keepdims=True)
    mean_out = jnp.mean(channel_out, axis=1, keepdims=True)
    cat = jnp.concatenate([max_out, mean_out], axis=1)            # (B, 2, H, W)
    conv = jax.lax.conv_general_dilated(
        cat, wconv, window_strides=(1, 1),
        padding=[(3, 3), (3, 3)],
        dimension_numbers=("NCHW", "OIHW", "NCHW"))
    return jax.nn.sigmoid(conv) * channel_out


if __name__ == "__main__":
    B, C, H, W = 2, 32, 16, 16
    reduction, ksize = 16, 7
    Cr = C // reduction

    key = jax.random.PRNGKey(0)
    kx, k1, k2, kc = jax.random.split(key, 4)

    x = jax.random.normal(kx, (B, C, H, W), dtype=jnp.float32)
    # deterministic synthetic parameters (PyTorch layouts)
    w1 = 0.2 * jax.random.normal(k1, (Cr, C), dtype=jnp.float32)       # Linear(C -> C//r)
    w2 = 0.2 * jax.random.normal(k2, (C, Cr), dtype=jnp.float32)       # Linear(C//r -> C)
    wconv = 0.1 * jax.random.normal(kc, (1, 2, ksize, ksize), dtype=jnp.float32)

    out = cbam_pallas(x, w1, w2, wconv, kernel_size=ksize)
    out = jax.block_until_ready(out)

    ref = jax.block_until_ready(cbam_reference(x, w1, w2, wconv))
    np.testing.assert_allclose(np.asarray(out), np.asarray(ref), rtol=1e-4, atol=1e-5)

    print("KERNEL_OK")
</pallas_src>

<mosaic_0001>
module attributes {stable_mosaic.version = 11 : i64} {
  func.func @_cbam_kernel(%arg0: i32, %arg1: memref<1x32x256xf32, #tpu.memory_space<vmem>>, %arg2: memref<32x2xf32, #tpu.memory_space<vmem>>, %arg3: memref<2x32xf32, #tpu.memory_space<vmem>>, %arg4: memref<49x2xf32, #tpu.memory_space<vmem>>, %arg5: memref<1x32x256xf32, #tpu.memory_space<vmem>>, %arg6: memref<2x1x22x22xf32, #tpu.memory_space<vmem>>) attributes {dimension_semantics = [#tpu.dimension_semantics<parallel>], iteration_bounds = array<i64: 2>, scalar_prefetch = 0 : i64, scratch_operands = 1 : i64, tpu.core_type = #tpu.core_type<tc>, window_params = [{transform_indices = @transform_0, window_bounds = array<i64: 1, 32, 256>}, {pipeline_mode = #tpu.pipeline_mode<synchronous>, transform_indices = @transform_1, window_bounds = array<i64: 32, 2>}, {pipeline_mode = #tpu.pipeline_mode<synchronous>, transform_indices = @transform_2, window_bounds = array<i64: 2, 32>}, {pipeline_mode = #tpu.pipeline_mode<synchronous>, transform_indices = @transform_3, window_bounds = array<i64: 49, 2>}, {transform_indices = @transform_4, window_bounds = array<i64: 1, 32, 256>}]} {
    %c0 = arith.constant 0 : index
    %c0_0 = arith.constant 0 : index
    %c0_1 = arith.constant 0 : index
    %0 = vector.load %arg1[%c0, %c0_0, %c0_1] : memref<1x32x256xf32, #tpu.memory_space<vmem>>, vector<1x32x256xf32>
    %cst = arith.constant dense<0xFF800000> : vector<1x32xf32>
    %1 = vector.multi_reduction <maximumf>, %0, %cst [2] : vector<1x32x256xf32> to vector<1x32xf32>
    %cst_2 = arith.constant dense<0.000000e+00> : vector<1x32xf32>
    %2 = vector.multi_reduction <add>, %0, %cst_2 [2] : vector<1x32x256xf32> to vector<1x32xf32>
    %cst_3 = arith.constant 3.906250e-03 : f32
    %3 = vector.broadcast %cst_3 : f32 to vector<1x32xf32>
    %4 = arith.mulf %2, %3 : vector<1x32xf32>
    %5 = tpu.concatenate %1, %4 in 0 : vector<1x32xf32>, vector<1x32xf32> -> vector<2x32xf32>
    %c0_4 = arith.constant 0 : index
    %c0_5 = arith.constant 0 : index
    %6 = vector.load %arg2[%c0_4, %c0_5] : memref<32x2xf32, #tpu.memory_space<vmem>>, vector<32x2xf32>
    %cst_6 = arith.constant dense<0.000000e+00> : vector<2x2xf32>
    %7 = tpu.matmul %5, %6, %cst_6 {dimension_numbers = #tpu.dot_dimension_numbers<[1], [0], [0], [1], [0, 0, 1, 1], [], []>} : vector<2x32xf32>, vector<32x2xf32>, vector<2x2xf32> -> vector<2x2xf32>
    %cst_7 = arith.constant 0.000000e+00 : f32
    %8 = vector.broadcast %cst_7 : f32 to vector<2x2xf32>
    %9 = arith.maximumf %7, %8 : vector<2x2xf32>
    %c0_8 = arith.constant 0 : index
    %c0_9 = arith.constant 0 : index
    %10 = vector.load %arg3[%c0_8, %c0_9] : memref<2x32xf32, #tpu.memory_space<vmem>>, vector<2x32xf32>
    %cst_10 = arith.constant dense<0.000000e+00> : vector<2x32xf32>
    %11 = tpu.matmul %9, %10, %cst_10 {dimension_numbers = #tpu.dot_dimension_numbers<[1], [0], [0], [1], [0, 0, 1, 1], [], []>} : vector<2x2xf32>, vector<2x32xf32>, vector<2x32xf32> -> vector<2x32xf32>
    %12 = vector.extract_strided_slice %11 {offsets = [0, 0], sizes = [1, 32], strides = [1, 1]} : vector<2x32xf32> to vector<1x32xf32>
    %13 = vector.extract_strided_slice %11 {offsets = [1, 0], sizes = [1, 32], strides = [1, 1]} : vector<2x32xf32> to vector<1x32xf32>
    %14 = arith.addf %12, %13 : vector<1x32xf32>
    %15 = arith.negf %14 : vector<1x32xf32>
    %16 = math.exp %15 : vector<1x32xf32>
    %cst_11 = arith.constant 1.000000e+00 : f32
    %17 = vector.broadcast %cst_11 : f32 to vector<1x32xf32>
    %18 = arith.addf %17, %16 : vector<1x32xf32>
    %19 = arith.divf %17, %18 : vector<1x32xf32>
    %20 = vector.shape_cast %19 : vector<1x32xf32> to vector<1x32x1xf32>
    %21 = vector.broadcast %20 : vector<1x32x1xf32> to vector<1x32x256xf32>
    %22 = arith.mulf %21, %0 : vector<1x32x256xf32>
    %cst_12 = arith.constant dense<0xFF800000> : vector<1x256xf32>
    %23 = vector.multi_reduction <maximumf>, %22, %cst_12 [1] : vector<1x32x256xf32> to vector<1x256xf32>
    %cst_13 = arith.constant dense<0.000000e+00> : vector<1x256xf32>
    %24 = vector.multi_reduction <add>, %22, %cst_13 [1] : vector<1x32x256xf32> to vector<1x256xf32>
    %cst_14 = arith.constant 3.125000e-02 : f32
    %25 = vector.broadcast %cst_14 : f32 to vector<1x256xf32>
    %26 = arith.mulf %24, %25 : vector<1x256xf32>
    %cst_15 = arith.constant 0.000000e+00 : f32
    %27 = vector.broadcast %cst_15 : f32 to vector<2x1x22x22xf32>
    %c0_16 = arith.constant 0 : index
    %c0_17 = arith.constant 0 : index
    %c0_18 = arith.constant 0 : index
    %c0_19 = arith.constant 0 : index
    %28 = vector.load %arg6[%c0_16, %c0_17, %c0_18, %c0_19] : memref<2x1x22x22xf32, #tpu.memory_space<vmem>>, vector<2x1x22x22xf32>
    tpu.vector_store %arg6[%c0_16, %c0_17, %c0_18, %c0_19], %27 {strides = array<i32>} : memref<2x1x22x22xf32, #tpu.memory_space<vmem>>, vector<2x1x22x22xf32>,
    %29 = vector.shape_cast %23 : vector<1x256xf32> to vector<1x1x16x16xf32>
    %30 = vector.shape_cast %26 : vector<1x256xf32> to vector<1x1x16x16xf32>
    %31 = tpu.concatenate %29, %30 in 0 : vector<1x1x16x16xf32>, vector<1x1x16x16xf32> -> vector<2x1x16x16xf32>
    %c0_20 = arith.constant 0 : index
    %c0_21 = arith.constant 0 : index
    %c3 = arith.constant 3 : index
    %c3_22 = arith.constant 3 : index
    %32 = vector.load %arg6[%c0_20, %c0_21, %c3, %c3_22] : memref<2x1x22x22xf32, #tpu.memory_space<vmem>>, vector<2x1x16x16xf32>
    tpu.vector_store %arg6[%c0_20, %c0_21, %c3, %c3_22], %31 {strides = array<i32>} : memref<2x1x22x22xf32, #tpu.memory_space<vmem>>, vector<2x1x16x16xf32>,
    %c0_23 = arith.constant 0 : index
    %c0_24 = arith.constant 0 : index
    %33 = vector.load %arg4[%c0_23, %c0_24] : memref<49x2xf32, #tpu.memory_space<vmem>>, vector<49x2xf32>
    %cst_25 = arith.constant 0.000000e+00 : f32
    %34 = vector.broadcast %cst_25 : f32 to vector<2x1x16x16xf32>
    %c0_26 = arith.constant 0 : index
    %c0_27 = arith.constant 0 : index
    %c0_28 = arith.constant 0 : index
    %c0_29 = arith.constant 0 : index
    %35 = vector.load %arg6[%c0_26, %c0_27, %c0_28, %c0_29] : memref<2x1x22x22xf32, #tpu.memory_space<vmem>>, vector<2x1x16x16xf32>
    %36 = vector.extract_strided_slice %33 {offsets = [0, 0], sizes = [1, 2], strides = [1, 1]} : vector<49x2xf32> to vector<1x2xf32>
    %37 = vector.shape_cast %36 : vector<1x2xf32> to vector<2xf32>
    %38 = vector.shape_cast %37 : vector<2xf32> to vector<2x1x1x1xf32>
    %39 = vector.broadcast %38 : vector<2x1x1x1xf32> to vector<2x1x16x16xf32>
    %40 = arith.mulf %39, %35 : vector<2x1x16x16xf32>
    %41 = arith.addf %34, %40 : vector<2x1x16x16xf32>
    %c0_30 = arith.constant 0 : index
    %c0_31 = arith.constant 0 : index
    %c0_32 = arith.constant 0 : index
    %c1 = arith.constant 1 : index
    %42 = vector.load %arg6[%c0_30, %c0_31, %c0_32, %c1] : memref<2x1x22x22xf32, #tpu.memory_space<vmem>>, vector<2x1x16x16xf32>
    %43 = vector.extract_strided_slice %33 {offsets = [1, 0], sizes = [1, 2], strides = [1, 1]} : vector<49x2xf32> to vector<1x2xf32>
    %44 = vector.shape_cast %43 : vector<1x2xf32> to vector<2xf32>
    %45 = vector.shape_cast %44 : vector<2xf32> to vector<2x1x1x1xf32>
    %46 = vector.broadcast %45 : vector<2x1x1x1xf32> to vector<2x1x16x16xf32>
    %47 = arith.mulf %46, %42 : vector<2x1x16x16xf32>
    %48 = arith.addf %41, %47 : vector<2x1x16x16xf32>
    %c0_33 = arith.constant 0 : index
    %c0_34 = arith.constant 0 : index
    %c0_35 = arith.constant 0 : index
    %c2 = arith.constant 2 : index
    %49 = vector.load %arg6[%c0_33, %c0_34, %c0_35, %c2] : memref<2x1x22x22xf32, #tpu.memory_space<vmem>>, vector<2x1x16x16xf32>
    %50 = vector.extract_strided_slice %33 {offsets = [2, 0], sizes = [1, 2], strides = [1, 1]} : vector<49x2xf32> to vector<1x2xf32>
    %51 = vector.shape_cast %50 : vector<1x2xf32> to vector<2xf32>
    %52 = vector.shape_cast %51 : vector<2xf32> to vector<2x1x1x1xf32>
    %53 = vector.broadcast %52 : vector<2x1x1x1xf32> to vector<2x1x16x16xf32>
    %54 = arith.mulf %53, %49 : vector<2x1x16x16xf32>
    %55 = arith.addf %48, %54 : vector<2x1x16x16xf32>
    %c0_36 = arith.constant 0 : index
    %c0_37 = arith.constant 0 : index
    %c0_38 = arith.constant 0 : index
    %c3_39 = arith.constant 3 : index
    %56 = vector.load %arg6[%c0_36, %c0_37, %c0_38, %c3_39] : memref<2x1x22x22xf32, #tpu.memory_space<vmem>>, vector<2x1x16x16xf32>
    %57 = vector.extract_strided_slice %33 {offsets = [3, 0], sizes = [1, 2], strides = [1, 1]} : vector<49x2xf32> to vector<1x2xf32>
    %58 = vector.shape_cast %57 : vector<1x2xf32> to vector<2xf32>
    %59 = vector.shape_cast %58 : vector<2xf32> to vector<2x1x1x1xf32>
    %60 = vector.broadcast %59 : vector<2x1x1x1xf32> to vector<2x1x16x16xf32>
    %61 = arith.mulf %60, %56 : vector<2x1x16x16xf32>
    %62 = arith.addf %55, %61 : vector<2x1x16x16xf32>
    %c0_40 = arith.constant 0 : index
    %c0_41 = arith.constant 0 : index
    %c0_42 = arith.constant 0 : index
    %c4 = arith.constant 4 : index
    %63 = vector.load %arg6[%c0_40, %c0_41, %c0_42, %c4] : memref<2x1x22x22xf32, #tpu.memory_space<vmem>>, vector<2x1x16x16xf32>
    %64 = vector.extract_strided_slice %33 {offsets = [4, 0], sizes = [1, 2], strides = [1, 1]} : vector<49x2xf32> to vector<1x2xf32>
    %65 = vector.shape_cast %64 : vector<1x2xf32> to vector<2xf32>
    %66 = vector.shape_cast %65 : vector<2xf32> to vector<2x1x1x1xf32>
    %67 = vector.broadcast %66 : vector<2x1x1x1xf32> to vector<2x1x16x16xf32>
    %68 = arith.mulf %67, %63 : vector<2x1x16x16xf32>
    %69 = arith.addf %62, %68 : vector<2x1x16x16xf32>
    %c0_43 = arith.constant 0 : index
    %c0_44 = arith.constant 0 : index
    %c0_45 = arith.constant 0 : index
    %c5 = arith.constant 5 : index
    %70 = vector.load %arg6[%c0_43, %c0_44, %c0_45, %c5] : memref<2x1x22x22xf32, #tpu.memory_space<vmem>>, vector<2x1x16x16xf32>
    %71 = vector.extract_strided_slice %33 {offsets = [5, 0], sizes = [1, 2], strides = [1, 1]} : vector<49x2xf32> to vector<1x2xf32>
    %72 = vector.shape_cast %71 : vector<1x2xf32> to vector<2xf32>
    %73 = vector.shape_cast %72 : vector<2xf32> to vector<2x1x1x1xf32>
    %74 = vector.broadcast %73 : vector<2x1x1x1xf32> to vector<2x1x16x16xf32>
    %75 = arith.mulf %74, %70 : vector<2x1x16x16xf32>
    %76 = arith.addf %69, %75 : vector<2x1x16x16xf32>
    %c0_46 = arith.constant 0 : index
    %c0_47 = arith.constant 0 : index
    %c0_48 = arith.constant 0 : index
    %c6 = arith.constant 6 : index
    %77 = vector.load %arg6[%c0_46, %c0_47, %c0_48, %c6] : memref<2x1x22x22xf32, #tpu.memory_space<vmem>>, vector<2x1x16x16xf32>
    %78 = vector.extract_strided_slice %33 {offsets = [6, 0], sizes = [1, 2], strides = [1, 1]} : vector<49x2xf32> to vector<1x2xf32>
    %79 = vector.shape_cast %78 : vector<1x2xf32> to vector<2xf32>
    %80 = vector.shape_cast %79 : vector<2xf32> to vector<2x1x1x1xf32>
    %81 = vector.broadcast %80 : vector<2x1x1x1xf32> to vector<2x1x16x16xf32>
    %82 = arith.mulf %81, %77 : vector<2x1x16x16xf32>
    %83 = arith.addf %76, %82 : vector<2x1x16x16xf32>
    %c0_49 = arith.constant 0 : index
    %c0_50 = arith.constant 0 : index
    %c1_51 = arith.constant 1 : index
    %c0_52 = arith.constant 0 : index
    %84 = vector.load %arg6[%c0_49, %c0_50, %c1_51, %c0_52] : memref<2x1x22x22xf32, #tpu.memory_space<vmem>>, vector<2x1x16x16xf32>
    %85 = vector.extract_strided_slice %33 {offsets = [7, 0], sizes = [1, 2], strides = [1, 1]} : vector<49x2xf32> to vector<1x2xf32>
    %86 = vector.shape_cast %85 : vector<1x2xf32> to vector<2xf32>
    %87 = vector.shape_cast %86 : vector<2xf32> to vector<2x1x1x1xf32>
    %88 = vector.broadcast %87 : vector<2x1x1x1xf32> to vector<2x1x16x16xf32>
    %89 = arith.mulf %88, %84 : vector<2x1x16x16xf32>
    %90 = arith.addf %83, %89 : vector<2x1x16x16xf32>
    %c0_53 = arith.constant 0 : index
    %c0_54 = arith.constant 0 : index
    %c1_55 = arith.constant 1 : index
    %c1_56 = arith.constant 1 : index
    %91 = vector.load %arg6[%c0_53, %c0_54, %c1_55, %c1_56] : memref<2x1x22x22xf32, #tpu.memory_space<vmem>>, vector<2x1x16x16xf32>
    %92 = vector.extract_strided_slice %33 {offsets = [8, 0], sizes = [1, 2], strides = [1, 1]} : vector<49x2xf32> to vector<1x2xf32>
    %93 = vector.shape_cast %92 : vector<1x2xf32> to vector<2xf32>
    %94 = vector.shape_cast %93 : vector<2xf32> to vector<2x1x1x1xf32>
    %95 = vector.broadcast %94 : vector<2x1x1x1xf32> to vector<2x1x16x16xf32>
    %96 = arith.mulf %95, %91 : vector<2x1x16x16xf32>
    %97 = arith.addf %90, %96 : vector<2x1x16x16xf32>
    %c0_57 = arith.constant 0 : index
    %c0_58 = arith.constant 0 : index
    %c1_59 = arith.constant 1 : index
    %c2_60 = arith.constant 2 : index
    %98 = vector.load %arg6[%c0_57, %c0_58, %c1_59, %c2_60] : memref<2x1x22x22xf32, #tpu.memory_space<vmem>>, vector<2x1x16x16xf32>
    %99 = vector.extract_strided_slice %33 {offsets = [9, 0], sizes = [1, 2], strides = [1, 1]} : vector<49x2xf32> to vector<1x2xf32>
    %100 = vector.shape_cast %99 : vector<1x2xf32> to vector<2xf32>
    %101 = vector.shape_cast %100 : vector<2xf32> to vector<2x1x1x1xf32>
    %102 = vector.broadcast %101 : vector<2x1x1x1xf32> to vector<2x1x16x16xf32>
    %103 = arith.mulf %102, %98 : vector<2x1x16x16xf32>
    %104 = arith.addf %97, %103 : vector<2x1x16x16xf32>
    %c0_61 = arith.constant 0 : index
    %c0_62 = arith.constant 0 : index
    %c1_63 = arith.constant 1 : index
    %c3_64 = arith.constant 3 : index
    %105 = vector.load %arg6[%c0_61, %c0_62, %c1_63, %c3_64] : memref<2x1x22x22xf32, #tpu.memory_space<vmem>>, vector<2x1x16x16xf32>
    %106 = vector.extract_strided_slice %33 {offsets = [10, 0], sizes = [1, 2], strides = [1, 1]} : vector<49x2xf32> to vector<1x2xf32>
    %107 = vector.shape_cast %106 : vector<1x2xf32> to vector<2xf32>
    %108 = vector.shape_cast %107 : vector<2xf32> to vector<2x1x1x1xf32>
    %109 = vector.broadcast %108 : vector<2x1x1x1xf32> to vector<2x1x16x16xf32>
    %110 = arith.mulf %109, %105 : vector<2x1x16x16xf32>
    %111 = arith.addf %104, %110 : vector<2x1x16x16xf32>
    %c0_65 = arith.constant 0 : index
    %c0_66 = arith.constant 0 : index
    %c1_67 = arith.constant 1 : index
    %c4_68 = arith.constant 4 : index
    %112 = vector.load %arg6[%c0_65, %c0_66, %c1_67, %c4_68] : memref<2x1x22x22xf32, #tpu.memory_space<vmem>>, vector<2x1x16x16xf32>
    %113 = vector.extract_strided_slice %33 {offsets = [11, 0], sizes = [1, 2], strides = [1, 1]} : vector<49x2xf32> to vector<1x2xf32>
    %114 = vector.shape_cast %113 : vector<1x2xf32> to vector<2xf32>
    %115 = vector.shape_cast %114 : vector<2xf32> to vector<2x1x1x1xf32>
    %116 = vector.broadcast %115 : vector<2x1x1x1xf32> to vector<2x1x16x16xf32>
    %117 = arith.mulf %116, %112 : vector<2x1x16x16xf32>
    %118 = arith.addf %111, %117 : vector<2x1x16x16xf32>
    %c0_69 = arith.constant 0 : index
    %c0_70 = arith.constant 0 : index
    %c1_71 = arith.constant 1 : index
    %c5_72 = arith.constant 5 : index
    %119 = vector.load %arg6[%c0_69, %c0_70, %c1_71, %c5_72] : memref<2x1x22x22xf32, #tpu.memory_space<vmem>>, vector<2x1x16x16xf32>
    %120 = vector.extract_strided_slice %33 {offsets = [12, 0], sizes = [1, 2], strides = [1, 1]} : vector<49x2xf32> to vector<1x2xf32>
    %121 = vector.shape_cast %120 : vector<1x2xf32> to vector<2xf32>
    %122 = vector.shape_cast %121 : vector<2xf32> to vector<2x1x1x1xf32>
    %123 = vector.broadcast %122 : vector<2x1x1x1xf32> to vector<2x1x16x16xf32>
    %124 = arith.mulf %123, %119 : vector<2x1x16x16xf32>
    %125 = arith.addf %118, %124 : vector<2x1x16x16xf32>
    %c0_73 = arith.constant 0 : index
    %c0_74 = arith.constant 0 : index
    %c1_75 = arith.constant 1 : index
    %c6_76 = arith.constant 6 : index
    %126 = vector.load %arg6[%c0_73, %c0_74, %c1_75, %c6_76] : memref<2x1x22x22xf32, #tpu.memory_space<vmem>>, vector<2x1x16x16xf32>
    %127 = vector.extract_strided_slice %33 {offsets = [13, 0], sizes = [1, 2], strides = [1, 1]} : vector<49x2xf32> to vector<1x2xf32>
    %128 = vector.shape_cast %127 : vector<1x2xf32> to vector<2xf32>
    %129 = vector.shape_cast %128 : vector<2xf32> to vector<2x1x1x1xf32>
    %130 = vector.broadcast %129 : vector<2x1x1x1xf32> to vector<2x1x16x16xf32>
    %131 = arith.mulf %130, %126 : vector<2x1x16x16xf32>
    %132 = arith.addf %125, %131 : vector<2x1x16x16xf32>
    %c0_77 = arith.constant 0 : index
    %c0_78 = arith.constant 0 : index
    %c2_79 = arith.constant 2 : index
    %c0_80 = arith.constant 0 : index
    %133 = vector.load %arg6[%c0_77, %c0_78, %c2_79, %c0_80] : memref<2x1x22x22xf32, #tpu.memory_space<vmem>>, vector<2x1x16x16xf32>
    %134 = vector.extract_strided_slice %33 {offsets = [14, 0], sizes = [1, 2], strides = [1, 1]} : vector<49x2xf32> to vector<1x2xf32>
    %135 = vector.shape_cast %134 : vector<1x2xf32> to vector<2xf32>
    %136 = vector.shape_cast %135 : vector<2xf32> to vector<2x1x1x1xf32>
    %137 = vector.broadcast %136 : vector<2x1x1x1xf32> to vector<2x1x16x16xf32>
    %138 = arith.mulf %137, %133 : vector<2x1x16x16xf32>
    %139 = arith.addf %132, %138 : vector<2x1x16x16xf32>
    %c0_81 = arith.constant 0 : index
    %c0_82 = arith.constant 0 : index
    %c2_83 = arith.constant 2 : index
    %c1_84 = arith.constant 1 : index
    %140 = vector.load %arg6[%c0_81, %c0_82, %c2_83, %c1_84] : memref<2x1x22x22xf32, #tpu.memory_space<vmem>>, vector<2x1x16x16xf32>
    %141 = vector.extract_strided_slice %33 {offsets = [15, 0], sizes = [1, 2], strides = [1, 1]} : vector<49x2xf32> to vector<1x2xf32>
    %142 = vector.shape_cast %141 : vector<1x2xf32> to vector<2xf32>
    %143 = vector.shape_cast %142 : vector<2xf32> to vector<2x1x1x1xf32>
    %144 = vector.broadcast %143 : vector<2x1x1x1xf32> to vector<2x1x16x16xf32>
    %145 = arith.mulf %144, %140 : vector<2x1x16x16xf32>
    %146 = arith.addf %139, %145 : vector<2x1x16x16xf32>
    %c0_85 = arith.constant 0 : index
    %c0_86 = arith.constant 0 : index
    %c2_87 = arith.constant 2 : index
    %c2_88 = arith.constant 2 : index
    %147 = vector.load %arg6[%c0_85, %c0_86, %c2_87, %c2_88] : memref<2x1x22x22xf32, #tpu.memory_space<vmem>>, vector<2x1x16x16xf32>
    %148 = vector.extract_strided_slice %33 {offsets = [16, 0], sizes = [1, 2], strides = [1, 1]} : vector<49x2xf32> to vector<1x2xf32>
    %149 = vector.shape_cast %148 : vector<1x2xf32> to vector<2xf32>
    %150 = vector.shape_cast %149 : vector<2xf32> to vector<2x1x1x1xf32>
    %151 = vector.broadcast %150 : vector<2x1x1x1xf32> to vector<2x1x16x16xf32>
    %152 = arith.mulf %151, %147 : vector<2x1x16x16xf32>
    %153 = arith.addf %146, %152 : vector<2x1x16x16xf32>
    %c0_89 = arith.constant 0 : index
    %c0_90 = arith.constant 0 : index
    %c2_91 = arith.constant 2 : index
    %c3_92 = arith.constant 3 : index
    %154 = vector.load %arg6[%c0_89, %c0_90, %c2_91, %c3_92] : memref<2x1x22x22xf32, #tpu.memory_space<vmem>>, vector<2x1x16x16xf32>
    %155 = vector.extract_strided_slice %33 {offsets = [17, 0], sizes = [1, 2], strides = [1, 1]} : vector<49x2xf32> to vector<1x2xf32>
    %156 = vector.shape_cast %155 : vector<1x2xf32> to vector<2xf32>
    %157 = vector.shape_cast %156 : vector<2xf32> to vector<2x1x1x1xf32>
    %158 = vector.broadcast %157 : vector<2x1x1x1xf32> to vector<2x1x16x16xf32>
    %159 = arith.mulf %158, %154 : vector<2x1x16x16xf32>
    %160 = arith.addf %153, %159 : vector<2x1x16x16xf32>
    %c0_93 = arith.constant 0 : index
    %c0_94 = arith.constant 0 : index
    %c2_95 = arith.constant 2 : index
    %c4_96 = arith.constant 4 : index
    %161 = vector.load %arg6[%c0_93, %c0_94, %c2_95, %c4_96] : memref<2x1x22x22xf32, #tpu.memory_space<vmem>>, vector<2x1x16x16xf32>
    %162 = vector.extract_strided_slice %33 {offsets = [18, 0], sizes = [1, 2], strides = [1, 1]} : vector<49x2xf32> to vector<1x2xf32>
    %163 = vector.shape_cast %162 : vector<1x2xf32> to vector<2xf32>
    %164 = vector.shape_cast %163 : vector<2xf32> to vector<2x1x1x1xf32>
    %165 = vector.broadcast %164 : vector<2x1x1x1xf32> to vector<2x1x16x16xf32>
    %166 = arith.mulf %165, %161 : vector<2x1x16x16xf32>
    %167 = arith.addf %160, %166 : vector<2x1x16x16xf32>
    %c0_97 = arith.constant 0 : index
    %c0_98 = arith.constant 0 : index
    %c2_99 = arith.constant 2 : index
    %c5_100 = arith.constant 5 : index
    %168 = vector.load %arg6[%c0_97, %c0_98, %c2_99, %c5_100] : memref<2x1x22x22xf32, #tpu.memory_space<vmem>>, vector<2x1x16x16xf32>
    %169 = vector.extract_strided_slice %33 {offsets = [19, 0], sizes = [1, 2], strides = [1, 1]} : vector<49x2xf32> to vector<1x2xf32>
    %170 = vector.shape_cast %169 : vector<1x2xf32> to vector<2xf32>
    %171 = vector.shape_cast %170 : vector<2xf32> to vector<2x1x1x1xf32>
    %172 = vector.broadcast %171 : vector<2x1x1x1xf32> to vector<2x1x16x16xf32>
    %173 = arith.mulf %172, %168 : vector<2x1x16x16xf32>
    %174 = arith.addf %167, %173 : vector<2x1x16x16xf32>
    %c0_101 = arith.constant 0 : index
    %c0_102 = arith.constant 0 : index
    %c2_103 = arith.constant 2 : index
    %c6_104 = arith.constant 6 : index
    %175 = vector.load %arg6[%c0_101, %c0_102, %c2_103, %c6_104] : memref<2x1x22x22xf32, #tpu.memory_space<vmem>>, vector<2x1x16x16xf32>
    %176 = vector.extract_strided_slice %33 {offsets = [20, 0], sizes = [1, 2], strides = [1, 1]} : vector<49x2xf32> to vector<1x2xf32>
    %177 = vector.shape_cast %176 : vector<1x2xf32> to vector<2xf32>
    %178 = vector.shape_cast %177 : vector<2xf32> to vector<2x1x1x1xf32>
    %179 = vector.broadcast %178 : vector<2x1x1x1xf32> to vector<2x1x16x16xf32>
    %180 = arith.mulf %179, %175 : vector<2x1x16x16xf32>
    %181 = arith.addf %174, %180 : vector<2x1x16x16xf32>
    %c0_105 = arith.constant 0 : index
    %c0_106 = arith.constant 0 : index
    %c3_107 = arith.constant 3 : index
    %c0_108 = arith.constant 0 : index
    %182 = vector.load %arg6[%c0_105, %c0_106, %c3_107, %c0_108] : memref<2x1x22x22xf32, #tpu.memory_space<vmem>>, vector<2x1x16x16xf32>
    %183 = vector.extract_strided_slice %33 {offsets = [21, 0], sizes = [1, 2], strides = [1, 1]} : vector<49x2xf32> to vector<1x2xf32>
    %184 = vector.shape_cast %183 : vector<1x2xf32> to vector<2xf32>
    %185 = vector.shape_cast %184 : vector<2xf32> to vector<2x1x1x1xf32>
    %186 = vector.broadcast %185 : vector<2x1x1x1xf32> to vector<2x1x16x16xf32>
    %187 = arith.mulf %186, %182 : vector<2x1x16x16xf32>
    %188 = arith.addf %181, %187 : vector<2x1x16x16xf32>
    %c0_109 = arith.constant 0 : index
    %c0_110 = arith.constant 0 : index
    %c3_111 = arith.constant 3 : index
    %c1_112 = arith.constant 1 : index
    %189 = vector.load %arg6[%c0_109, %c0_110, %c3_111, %c1_112] : memref<2x1x22x22xf32, #tpu.memory_space<vmem>>, vector<2x1x16x16xf32>
    %190 = vector.extract_strided_slice %33 {offsets = [22, 0], sizes = [1, 2], strides = [1, 1]} : vector<49x2xf32> to vector<1x2xf32>
    %191 = vector.shape_cast %190 : vector<1x2xf32> to vector<2xf32>
    %192 = vector.shape_cast %191 : vector<2xf32> to vector<2x1x1x1xf32>
    %193 = vector.broadcast %192 : vector<2x1x1x1xf32> to vector<2x1x16x16xf32>
    %194 = arith.mulf %193, %189 : vector<2x1x16x16xf32>
    %195 = arith.addf %188, %194 : vector<2x1x16x16xf32>
    %c0_113 = arith.constant 0 : index
    %c0_114 = arith.constant 0 : index
    %c3_115 = arith.constant 3 : index
    %c2_116 = arith.constant 2 : index
    %196 = vector.load %arg6[%c0_113, %c0_114, %c3_115, %c2_116] : memref<2x1x22x22xf32, #tpu.memory_space<vmem>>, vector<2x1x16x16xf32>
    %197 = vector.extract_strided_slice %33 {offsets = [23, 0], sizes = [1, 2], strides = [1, 1]} : vector<49x2xf32> to vector<1x2xf32>
    %198 = vector.shape_cast %197 : vector<1x2xf32> to vector<2xf32>
    %199 = vector.shape_cast %198 : vector<2xf32> to vector<2x1x1x1xf32>
    %200 = vector.broadcast %199 : vector<2x1x1x1xf32> to vector<2x1x16x16xf32>
    %201 = arith.mulf %200, %196 : vector<2x1x16x16xf32>
    %202 = arith.addf %195, %201 : vector<2x1x16x16xf32>
    %c0_117 = arith.constant 0 : index
    %c0_118 = arith.constant 0 : index
    %c3_119 = arith.constant 3 : index
    %c3_120 = arith.constant 3 : index
    %203 = vector.load %arg6[%c0_117, %c0_118, %c3_119, %c3_120] : memref<2x1x22x22xf32, #tpu.memory_space<vmem>>, vector<2x1x16x16xf32>
    %204 = vector.extract_strided_slice %33 {offsets = [24, 0], sizes = [1, 2], strides = [1, 1]} : vector<49x2xf32> to vector<1x2xf32>
    %205 = vector.shape_cast %204 : vector<1x2xf32> to vector<2xf32>
    %206 = vector.shape_cast %205 : vector<2xf32> to vector<2x1x1x1xf32>
    %207 = vector.broadcast %206 : vector<2x1x1x1xf32> to vector<2x1x16x16xf32>
    %208 = arith.mulf %207, %203 : vector<2x1x16x16xf32>
    %209 = arith.addf %202, %208 : vector<2x1x16x16xf32>
    %c0_121 = arith.constant 0 : index
    %c0_122 = arith.constant 0 : index
    %c3_123 = arith.constant 3 : index
    %c4_124 = arith.constant 4 : index
    %210 = vector.load %arg6[%c0_121, %c0_122, %c3_123, %c4_124] : memref<2x1x22x22xf32, #tpu.memory_space<vmem>>, vector<2x1x16x16xf32>
    %211 = vector.extract_strided_slice %33 {offsets = [25, 0], sizes = [1, 2], strides = [1, 1]} : vector<49x2xf32> to vector<1x2xf32>
    %212 = vector.shape_cast %211 : vector<1x2xf32> to vector<2xf32>
    %213 = vector.shape_cast %212 : vector<2xf32> to vector<2x1x1x1xf32>
    %214 = vector.broadcast %213 : vector<2x1x1x1xf32> to vector<2x1x16x16xf32>
    %215 = arith.mulf %214, %210 : vector<2x1x16x16xf32>
    %216 = arith.addf %209, %215 : vector<2x1x16x16xf32>
    %c0_125 = arith.constant 0 : index
    %c0_126 = arith.constant 0 : index
    %c3_127 = arith.constant 3 : index
    %c5_128 = arith.constant 5 : index
    %217 = vector.load %arg6[%c0_125, %c0_126, %c3_127, %c5_128] : memref<2x1x22x22xf32, #tpu.memory_space<vmem>>, vector<2x1x16x16xf32>
    %218 = vector.extract_strided_slice %33 {offsets = [26, 0], sizes = [1, 2], strides = [1, 1]} : vector<49x2xf32> to vector<1x2xf32>
    %219 = vector.shape_cast %218 : vector<1x2xf32> to vector<2xf32>
    %220 = vector.shape_cast %219 : vector<2xf32> to vector<2x1x1x1xf32>
    %221 = vector.broadcast %220 : vector<2x1x1x1xf32> to vector<2x1x16x16xf32>
    %222 = arith.mulf %221, %217 : vector<2x1x16x16xf32>
    %223 = arith.addf %216, %222 : vector<2x1x16x16xf32>
    %c0_129 = arith.constant 0 : index
    %c0_130 = arith.constant 0 : index
    %c3_131 = arith.constant 3 : index
    %c6_132 = arith.constant 6 : index
    %224 = vector.load %arg6[%c0_129, %c0_130, %c3_131, %c6_132] : memref<2x1x22x22xf32, #tpu.memory_space<vmem>>, vector<2x1x16x16xf32>
    %225 = vector.extract_strided_slice %33 {offsets = [27, 0], sizes = [1, 2], strides = [1, 1]} : vector<49x2xf32> to vector<1x2xf32>
    %226 = vector.shape_cast %225 : vector<1x2xf32> to vector<2xf32>
    %227 = vector.shape_cast %226 : vector<2xf32> to vector<2x1x1x1xf32>
    %228 = vector.broadcast %227 : vector<2x1x1x1xf32> to vector<2x1x16x16xf32>
    %229 = arith.mulf %228, %224 : vector<2x1x16x16xf32>
    %230 = arith.addf %223, %229 : vector<2x1x16x16xf32>
    %c0_133 = arith.constant 0 : index
    %c0_134 = arith.constant 0 : index
    %c4_135 = arith.constant 4 : index
    %c0_136 = arith.constant 0 : index
    %231 = vector.load %arg6[%c0_133, %c0_134, %c4_135, %c0_136] : memref<2x1x22x22xf32, #tpu.memory_space<vmem>>, vector<2x1x16x16xf32>
    %232 = vector.extract_strided_slice %33 {offsets = [28, 0], sizes = [1, 2], strides = [1, 1]} : vector<49x2xf32> to vector<1x2xf32>
    %233 = vector.shape_cast %232 : vector<1x2xf32> to vector<2xf32>
    %234 = vector.shape_cast %233 : vector<2xf32> to vector<2x1x1x1xf32>
    %235 = vector.broadcast %234 : vector<2x1x1x1xf32> to vector<2x1x16x16xf32>
    %236 = arith.mulf %235, %231 : vector<2x1x16x16xf32>
    %237 = arith.addf %230, %236 : vector<2x1x16x16xf32>
    %c0_137 = arith.constant 0 : index
    %c0_138 = arith.constant 0 : index
    %c4_139 = arith.constant 4 : index
    %c1_140 = arith.constant 1 : index
    %238 = vector.load %arg6[%c0_137, %c0_138, %c4_139, %c1_140] : memref<2x1x22x22xf32, #tpu.memory_space<vmem>>, vector<2x1x16x16xf32>
    %239 = vector.extract_strided_slice %33 {offsets = [29, 0], sizes = [1, 2], strides = [1, 1]} : vector<49x2xf32> to vector<1x2xf32>
    %240 = vector.shape_cast %239 : vector<1x2xf32> to vector<2xf32>
    %241 = vector.shape_cast %240 : vector<2xf32> to vector<2x1x1x1xf32>
    %242 = vector.broadcast %241 : vector<2x1x1x1xf32> to vector<2x1x16x16xf32>
    %243 = arith.mulf %242, %238 : vector<2x1x16x16xf32>
    %244 = arith.addf %237, %243 : vector<2x1x16x16xf32>
    %c0_141 = arith.constant 0 : index
    %c0_142 = arith.constant 0 : index
    %c4_143 = arith.constant 4 : index
    %c2_144 = arith.constant 2 : index
    %245 = vector.load %arg6[%c0_141, %c0_142, %c4_143, %c2_144] : memref<2x1x22x22xf32, #tpu.memory_space<vmem>>, vector<2x1x16x16xf32>
    %246 = vector.extract_strided_slice %33 {offsets = [30, 0], sizes = [1, 2], strides = [1, 1]} : vector<49x2xf32> to vector<1x2xf32>
    %247 = vector.shape_cast %246 : vector<1x2xf32> to vector<2xf32>
    %248 = vector.shape_cast %247 : vector<2xf32> to vector<2x1x1x1xf32>
    %249 = vector.broadcast %248 : vector<2x1x1x1xf32> to vector<2x1x16x16xf32>
    %250 = arith.mulf %249, %245 : vector<2x1x16x16xf32>
    %251 = arith.addf %244, %250 : vector<2x1x16x16xf32>
    %c0_145 = arith.constant 0 : index
    %c0_146 = arith.constant 0 : index
    %c4_147 = arith.constant 4 : index
    %c3_148 = arith.constant 3 : index
    %252 = vector.load %arg6[%c0_145, %c0_146, %c4_147, %c3_148] : memref<2x1x22x22xf32, #tpu.memory_space<vmem>>, vector<2x1x16x16xf32>
    %253 = vector.extract_strided_slice %33 {offsets = [31, 0], sizes = [1, 2], strides = [1, 1]} : vector<49x2xf32> to vector<1x2xf32>
    %254 = vector.shape_cast %253 : vector<1x2xf32> to vector<2xf32>
    %255 = vector.shape_cast %254 : vector<2xf32> to vector<2x1x1x1xf32>
    %256 = vector.broadcast %255 : vector<2x1x1x1xf32> to vector<2x1x16x16xf32>
    %257 = arith.mulf %256, %252 : vector<2x1x16x16xf32>
    %258 = arith.addf %251, %257 : vector<2x1x16x16xf32>
    %c0_149 = arith.constant 0 : index
    %c0_150 = arith.constant 0 : index
    %c4_151 = arith.constant 4 : index
    %c4_152 = arith.constant 4 : index
    %259 = vector.load %arg6[%c0_149, %c0_150, %c4_151, %c4_152] : memref<2x1x22x22xf32, #tpu.memory_space<vmem>>, vector<2x1x16x16xf32>
    %260 = vector.extract_strided_slice %33 {offsets = [32, 0], sizes = [1, 2], strides = [1, 1]} : vector<49x2xf32> to vector<1x2xf32>
    %261 = vector.shape_cast %260 : vector<1x2xf32> to vector<2xf32>
    %262 = vector.shape_cast %261 : vector<2xf32> to vector<2x1x1x1xf32>
    %263 = vector.broadcast %262 : vector<2x1x1x1xf32> to vector<2x1x16x16xf32>
    %264 = arith.mulf %263, %259 : vector<2x1x16x16xf32>
    %265 = arith.addf %258, %264 : vector<2x1x16x16xf32>
    %c0_153 = arith.constant 0 : index
    %c0_154 = arith.constant 0 : index
    %c4_155 = arith.constant 4 : index
    %c5_156 = arith.constant 5 : index
    %266 = vector.load %arg6[%c0_153, %c0_154, %c4_155, %c5_156] : memref<2x1x22x22xf32, #tpu.memory_space<vmem>>, vector<2x1x16x16xf32>
    %267 = vector.extract_strided_slice %33 {offsets = [33, 0], sizes = [1, 2], strides = [1, 1]} : vector<49x2xf32> to vector<1x2xf32>
    %268 = vector.shape_cast %267 : vector<1x2xf32> to vector<2xf32>
    %269 = vector.shape_cast %268 : vector<2xf32> to vector<2x1x1x1xf32>
    %270 = vector.broadcast %269 : vector<2x1x1x1xf32> to vector<2x1x16x16xf32>
    %271 = arith.mulf %270, %266 : vector<2x1x16x16xf32>
    %272 = arith.addf %265, %271 : vector<2x1x16x16xf32>
    %c0_157 = arith.constant 0 : index
    %c0_158 = arith.constant 0 : index
    %c4_159 = arith.constant 4 : index
    %c6_160 = arith.constant 6 : index
    %273 = vector.load %arg6[%c0_157, %c0_158, %c4_159, %c6_160] : memref<2x1x22x22xf32, #tpu.memory_space<vmem>>, vector<2x1x16x16xf32>
    %274 = vector.extract_strided_slice %33 {offsets = [34, 0], sizes = [1, 2], strides = [1, 1]} : vector<49x2xf32> to vector<1x2xf32>
    %275 = vector.shape_cast %274 : vector<1x2xf32> to vector<2xf32>
    %276 = vector.shape_cast %275 : vector<2xf32> to vector<2x1x1x1xf32>
    %277 = vector.broadcast %276 : vector<2x1x1x1xf32> to vector<2x1x16x16xf32>
    %278 = arith.mulf %277, %273 : vector<2x1x16x16xf32>
    %279 = arith.addf %272, %278 : vector<2x1x16x16xf32>
    %c0_161 = arith.constant 0 : index
    %c0_162 = arith.constant 0 : index
    %c5_163 = arith.constant 5 : index
    %c0_164 = arith.constant 0 : index
    %280 = vector.load %arg6[%c0_161, %c0_162, %c5_163, %c0_164] : memref<2x1x22x22xf32, #tpu.memory_space<vmem>>, vector<2x1x16x16xf32>
    %281 = vector.extract_strided_slice %33 {offsets = [35, 0], sizes = [1, 2], strides = [1, 1]} : vector<49x2xf32> to vector<1x2xf32>
    %282 = vector.shape_cast %281 : vector<1x2xf32> to vector<2xf32>
    %283 = vector.shape_cast %282 : vector<2xf32> to vector<2x1x1x1xf32>
    %284 = vector.broadcast %283 : vector<2x1x1x1xf32> to vector<2x1x16x16xf32>
    %285 = arith.mulf %284, %280 : vector<2x1x16x16xf32>
    %286 = arith.addf %279, %285 : vector<2x1x16x16xf32>
    %c0_165 = arith.constant 0 : index
    %c0_166 = arith.constant 0 : index
    %c5_167 = arith.constant 5 : index
    %c1_168 = arith.constant 1 : index
    %287 = vector.load %arg6[%c0_165, %c0_166, %c5_167, %c1_168] : memref<2x1x22x22xf32, #tpu.memory_space<vmem>>, vector<2x1x16x16xf32>
    %288 = vector.extract_strided_slice %33 {offsets = [36, 0], sizes = [1, 2], strides = [1, 1]} : vector<49x2xf32> to vector<1x2xf32>
    %289 = vector.shape_cast %288 : vector<1x2xf32> to vector<2xf32>
    %290 = vector.shape_cast %289 : vector<2xf32> to vector<2x1x1x1xf32>
    %291 = vector.broadcast %290 : vector<2x1x1x1xf32> to vector<2x1x16x16xf32>
    %292 = arith.mulf %291, %287 : vector<2x1x16x16xf32>
    %293 = arith.addf %286, %292 : vector<2x1x16x16xf32>
    %c0_169 = arith.constant 0 : index
    %c0_170 = arith.constant 0 : index
    %c5_171 = arith.constant 5 : index
    %c2_172 = arith.constant 2 : index
    %294 = vector.load %arg6[%c0_169, %c0_170, %c5_171, %c2_172] : memref<2x1x22x22xf32, #tpu.memory_space<vmem>>, vector<2x1x16x16xf32>
    %295 = vector.extract_strided_slice %33 {offsets = [37, 0], sizes = [1, 2], strides = [1, 1]} : vector<49x2xf32> to vector<1x2xf32>
    %296 = vector.shape_cast %295 : vector<1x2xf32> to vector<2xf32>
    %297 = vector.shape_cast %296 : vector<2xf32> to vector<2x1x1x1xf32>
    %298 = vector.broadcast %297 : vector<2x1x1x1xf32> to vector<2x1x16x16xf32>
    %299 = arith.mulf %298, %294 : vector<2x1x16x16xf32>
    %300 = arith.addf %293, %299 : vector<2x1x16x16xf32>
    %c0_173 = arith.constant 0 : index
    %c0_174 = arith.constant 0 : index
    %c5_175 = arith.constant 5 : index
    %c3_176 = arith.constant 3 : index
    %301 = vector.load %arg6[%c0_173, %c0_174, %c5_175, %c3_176] : memref<2x1x22x22xf32, #tpu.memory_space<vmem>>, vector<2x1x16x16xf32>
    %302 = vector.extract_strided_slice %33 {offsets = [38, 0], sizes = [1, 2], strides = [1, 1]} : vector<49x2xf32> to vector<1x2xf32>
    %303 = vector.shape_cast %302 : vector<1x2xf32> to vector<2xf32>
    %304 = vector.shape_cast %303 : vector<2xf32> to vector<2x1x1x1xf32>
    %305 = vector.broadcast %304 : vector<2x1x1x1xf32> to vector<2x1x16x16xf32>
    %306 = arith.mulf %305, %301 : vector<2x1x16x16xf32>
    %307 = arith.addf %300, %306 : vector<2x1x16x16xf32>
    %c0_177 = arith.constant 0 : index
    %c0_178 = arith.constant 0 : index
    %c5_179 = arith.constant 5 : index
    %c4_180 = arith.constant 4 : index
    %308 = vector.load %arg6[%c0_177, %c0_178, %c5_179, %c4_180] : memref<2x1x22x22xf32, #tpu.memory_space<vmem>>, vector<2x1x16x16xf32>
    %309 = vector.extract_strided_slice %33 {offsets = [39, 0], sizes = [1, 2], strides = [1, 1]} : vector<49x2xf32> to vector<1x2xf32>
    %310 = vector.shape_cast %309 : vector<1x2xf32> to vector<2xf32>
    %311 = vector.shape_cast %310 : vector<2xf32> to vector<2x1x1x1xf32>
    %312 = vector.broadcast %311 : vector<2x1x1x1xf32> to vector<2x1x16x16xf32>
    %313 = arith.mulf %312, %308 : vector<2x1x16x16xf32>
    %314 = arith.addf %307, %313 : vector<2x1x16x16xf32>
    %c0_181 = arith.constant 0 : index
    %c0_182 = arith.constant 0 : index
    %c5_183 = arith.constant 5 : index
    %c5_184 = arith.constant 5 : index
    %315 = vector.load %arg6[%c0_181, %c0_182, %c5_183, %c5_184] : memref<2x1x22x22xf32, #tpu.memory_space<vmem>>, vector<2x1x16x16xf32>
    %316 = vector.extract_strided_slice %33 {offsets = [40, 0], sizes = [1, 2], strides = [1, 1]} : vector<49x2xf32> to vector<1x2xf32>
    %317 = vector.shape_cast %316 : vector<1x2xf32> to vector<2xf32>
    %318 = vector.shape_cast %317 : vector<2xf32> to vector<2x1x1x1xf32>
    %319 = vector.broadcast %318 : vector<2x1x1x1xf32> to vector<2x1x16x16xf32>
    %320 = arith.mulf %319, %315 : vector<2x1x16x16xf32>
    %321 = arith.addf %314, %320 : vector<2x1x16x16xf32>
    %c0_185 = arith.constant 0 : index
    %c0_186 = arith.constant 0 : index
    %c5_187 = arith.constant 5 : index
    %c6_188 = arith.constant 6 : index
    %322 = vector.load %arg6[%c0_185, %c0_186, %c5_187, %c6_188] : memref<2x1x22x22xf32, #tpu.memory_space<vmem>>, vector<2x1x16x16xf32>
    %323 = vector.extract_strided_slice %33 {offsets = [41, 0], sizes = [1, 2], strides = [1, 1]} : vector<49x2xf32> to vector<1x2xf32>
    %324 = vector.shape_cast %323 : vector<1x2xf32> to vector<2xf32>
    %325 = vector.shape_cast %324 : vector<2xf32> to vector<2x1x1x1xf32>
    %326 = vector.broadcast %325 : vector<2x1x1x1xf32> to vector<2x1x16x16xf32>
    %327 = arith.mulf %326, %322 : vector<2x1x16x16xf32>
    %328 = arith.addf %321, %327 : vector<2x1x16x16xf32>
    %c0_189 = arith.constant 0 : index
    %c0_190 = arith.constant 0 : index
    %c6_191 = arith.constant 6 : index
    %c0_192 = arith.constant 0 : index
    %329 = vector.load %arg6[%c0_189, %c0_190, %c6_191, %c0_192] : memref<2x1x22x22xf32, #tpu.memory_space<vmem>>, vector<2x1x16x16xf32>
    %330 = vector.extract_strided_slice %33 {offsets = [42, 0], sizes = [1, 2], strides = [1, 1]} : vector<49x2xf32> to vector<1x2xf32>
    %331 = vector.shape_cast %330 : vector<1x2xf32> to vector<2xf32>
    %332 = vector.shape_cast %331 : vector<2xf32> to vector<2x1x1x1xf32>
    %333 = vector.broadcast %332 : vector<2x1x1x1xf32> to vector<2x1x16x16xf32>
    %334 = arith.mulf %333, %329 : vector<2x1x16x16xf32>
    %335 = arith.addf %328, %334 : vector<2x1x16x16xf32>
    %c0_193 = arith.constant 0 : index
    %c0_194 = arith.constant 0 : index
    %c6_195 = arith.constant 6 : index
    %c1_196 = arith.constant 1 : index
    %336 = vector.load %arg6[%c0_193, %c0_194, %c6_195, %c1_196] : memref<2x1x22x22xf32, #tpu.memory_space<vmem>>, vector<2x1x16x16xf32>
    %337 = vector.extract_strided_slice %33 {offsets = [43, 0], sizes = [1, 2], strides = [1, 1]} : vector<49x2xf32> to vector<1x2xf32>
    %338 = vector.shape_cast %337 : vector<1x2xf32> to vector<2xf32>
    %339 = vector.shape_cast %338 : vector<2xf32> to vector<2x1x1x1xf32>
    %340 = vector.broadcast %339 : vector<2x1x1x1xf32> to vector<2x1x16x16xf32>
    %341 = arith.mulf %340, %336 : vector<2x1x16x16xf32>
    %342 = arith.addf %335, %341 : vector<2x1x16x16xf32>
    %c0_197 = arith.constant 0 : index
    %c0_198 = arith.constant 0 : index
    %c6_199 = arith.constant 6 : index
    %c2_200 = arith.constant 2 : index
    %343 = vector.load %arg6[%c0_197, %c0_198, %c6_199, %c2_200] : memref<2x1x22x22xf32, #tpu.memory_space<vmem>>, vector<2x1x16x16xf32>
    %344 = vector.extract_strided_slice %33 {offsets = [44, 0], sizes = [1, 2], strides = [1, 1]} : vector<49x2xf32> to vector<1x2xf32>
    %345 = vector.shape_cast %344 : vector<1x2xf32> to vector<2xf32>
    %346 = vector.shape_cast %345 : vector<2xf32> to vector<2x1x1x1xf32>
    %347 = vector.broadcast %346 : vector<2x1x1x1xf32> to vector<2x1x16x16xf32>
    %348 = arith.mulf %347, %343 : vector<2x1x16x16xf32>
    %349 = arith.addf %342, %348 : vector<2x1x16x16xf32>
    %c0_201 = arith.constant 0 : index
    %c0_202 = arith.constant 0 : index
    %c6_203 = arith.constant 6 : index
    %c3_204 = arith.constant 3 : index
    %350 = vector.load %arg6[%c0_201, %c0_202, %c6_203, %c3_204] : memref<2x1x22x22xf32, #tpu.memory_space<vmem>>, vector<2x1x16x16xf32>
    %351 = vector.extract_strided_slice %33 {offsets = [45, 0], sizes = [1, 2], strides = [1, 1]} : vector<49x2xf32> to vector<1x2xf32>
    %352 = vector.shape_cast %351 : vector<1x2xf32> to vector<2xf32>
    %353 = vector.shape_cast %352 : vector<2xf32> to vector<2x1x1x1xf32>
    %354 = vector.broadcast %353 : vector<2x1x1x1xf32> to vector<2x1x16x16xf32>
    %355 = arith.mulf %354, %350 : vector<2x1x16x16xf32>
    %356 = arith.addf %349, %355 : vector<2x1x16x16xf32>
    %c0_205 = arith.constant 0 : index
    %c0_206 = arith.constant 0 : index
    %c6_207 = arith.constant 6 : index
    %c4_208 = arith.constant 4 : index
    %357 = vector.load %arg6[%c0_205, %c0_206, %c6_207, %c4_208] : memref<2x1x22x22xf32, #tpu.memory_space<vmem>>, vector<2x1x16x16xf32>
    %358 = vector.extract_strided_slice %33 {offsets = [46, 0], sizes = [1, 2], strides = [1, 1]} : vector<49x2xf32> to vector<1x2xf32>
    %359 = vector.shape_cast %358 : vector<1x2xf32> to vector<2xf32>
    %360 = vector.shape_cast %359 : vector<2xf32> to vector<2x1x1x1xf32>
    %361 = vector.broadcast %360 : vector<2x1x1x1xf32> to vector<2x1x16x16xf32>
    %362 = arith.mulf %361, %357 : vector<2x1x16x16xf32>
    %363 = arith.addf %356, %362 : vector<2x1x16x16xf32>
    %c0_209 = arith.constant 0 : index
    %c0_210 = arith.constant 0 : index
    %c6_211 = arith.constant 6 : index
    %c5_212 = arith.constant 5 : index
    %364 = vector.load %arg6[%c0_209, %c0_210, %c6_211, %c5_212] : memref<2x1x22x22xf32, #tpu.memory_space<vmem>>, vector<2x1x16x16xf32>
    %365 = vector.extract_strided_slice %33 {offsets = [47, 0], sizes = [1, 2], strides = [1, 1]} : vector<49x2xf32> to vector<1x2xf32>
    %366 = vector.shape_cast %365 : vector<1x2xf32> to vector<2xf32>
    %367 = vector.shape_cast %366 : vector<2xf32> to vector<2x1x1x1xf32>
    %368 = vector.broadcast %367 : vector<2x1x1x1xf32> to vector<2x1x16x16xf32>
    %369 = arith.mulf %368, %364 : vector<2x1x16x16xf32>
    %370 = arith.addf %363, %369 : vector<2x1x16x16xf32>
    %c0_213 = arith.constant 0 : index
    %c0_214 = arith.constant 0 : index
    %c6_215 = arith.constant 6 : index
    %c6_216 = arith.constant 6 : index
    %371 = vector.load %arg6[%c0_213, %c0_214, %c6_215, %c6_216] : memref<2x1x22x22xf32, #tpu.memory_space<vmem>>, vector<2x1x16x16xf32>
    %372 = vector.extract_strided_slice %33 {offsets = [48, 0], sizes = [1, 2], strides = [1, 1]} : vector<49x2xf32> to vector<1x2xf32>
    %373 = vector.shape_cast %372 : vector<1x2xf32> to vector<2xf32>
    %374 = vector.shape_cast %373 : vector<2xf32> to vector<2x1x1x1xf32>
    %375 = vector.broadcast %374 : vector<2x1x1x1xf32> to vector<2x1x16x16xf32>
    %376 = arith.mulf %375, %371 : vector<2x1x16x16xf32>
    %377 = arith.addf %370, %376 : vector<2x1x16x16xf32>
    %378 = vector.extract_strided_slice %377 {offsets = [0, 0, 0, 0], sizes = [1, 1, 16, 16], strides = [1, 1, 1, 1]} : vector<2x1x16x16xf32> to vector<1x1x16x16xf32>
    %379 = vector.shape_cast %378 : vector<1x1x16x16xf32> to vector<1x16x16xf32>
    %380 = vector.extract_strided_slice %377 {offsets = [1, 0, 0, 0], sizes = [1, 1, 16, 16], strides = [1, 1, 1, 1]} : vector<2x1x16x16xf32> to vector<1x1x16x16xf32>
    %381 = vector.shape_cast %380 : vector<1x1x16x16xf32> to vector<1x16x16xf32>
    %382 = arith.addf %379, %381 : vector<1x16x16xf32>
    %383 = arith.negf %382 : vector<1x16x16xf32>
    %384 = math.exp %383 : vector<1x16x16xf32>
    %cst_217 = arith.constant 1.000000e+00 : f32
    %385 = vector.broadcast %cst_217 : f32 to vector<1x16x16xf32>
    %386 = arith.addf %385, %384 : vector<1x16x16xf32>
    %387 = arith.divf %385, %386 : vector<1x16x16xf32>
    %388 = vector.shape_cast %387 : vector<1x16x16xf32> to vector<1x256xf32>
    %389 = vector.shape_cast %388 : vector<1x256xf32> to vector<1x1x256xf32>
    %390 = vector.broadcast %389 : vector<1x1x256xf32> to vector<1x32x256xf32>
    %391 = arith.mulf %390, %22 : vector<1x32x256xf32>
    %c0_218 = arith.constant 0 : index
    %c0_219 = arith.constant 0 : index
    %c0_220 = arith.constant 0 : index
    %392 = vector.load %arg5[%c0_218, %c0_219, %c0_220] : memref<1x32x256xf32, #tpu.memory_space<vmem>>, vector<1x32x256xf32>
    tpu.vector_store %arg5[%c0_218, %c0_219, %c0_220], %391 {strides = array<i32>} : memref<1x32x256xf32, #tpu.memory_space<vmem>>, vector<1x32x256xf32>,
    return
  }
  func.func @transform_0(%arg0: i32) -> (i32, i32, i32) {
    %c0_i32 = arith.constant 0 : i32
    %c0_i32_0 = arith.constant 0 : i32
    %c0_i32_1 = arith.constant 0 : i32
    return %arg0, %c0_i32, %c0_i32_0 : i32, i32, i32
  }
  func.func @transform_1(%arg0: i32) -> (i32, i32) {
    %c0_i32 = arith.constant 0 : i32
    %c0_i32_0 = arith.constant 0 : i32
    %c0_i32_1 = arith.constant 0 : i32
    return %c0_i32, %c0_i32_0 : i32, i32
  }
  func.func @transform_2(%arg0: i32) -> (i32, i32) {
    %c0_i32 = arith.constant 0 : i32
    %c0_i32_0 = arith.constant 0 : i32
    %c0_i32_1 = arith.constant 0 : i32
    return %c0_i32, %c0_i32_0 : i32, i32
  }
  func.func @transform_3(%arg0: i32) -> (i32, i32) {
    %c0_i32 = arith.constant 0 : i32
    %c0_i32_0 = arith.constant 0 : i32
    %c0_i32_1 = arith.constant 0 : i32
    return %c0_i32, %c0_i32_0 : i32, i32
  }
  func.func @transform_4(%arg0: i32) -> (i32, i32, i32) {
    %c0_i32 = arith.constant 0 : i32
    %c0_i32_0 = arith.constant 0 : i32
    %c0_i32_1 = arith.constant 0 : i32
    return %arg0, %c0_i32, %c0_i32_0 : i32, i32, i32
  }
}

</mosaic_0001>

<bundles_post_ra>
// kernel: tpu_custom_call.1
= control target key start
LH: loop header
LB: loop body
LE: loop exit
PB: predicated region body
PF: predicated region fallthrough
CT: control target
= control target key end

     0   :  { %9 = vsyncpa [#allocation4], 0  ;;  %s4548_s0 = inlined_call_operand.hbm [shape: f32[2,32,256], index: 0, kind: input, shape index: {}]   ;;  %s4549_s1 = inlined_call_operand.vmem [shape: f32[32,2], index: 1, kind: input, shape index: {}]   ;;  %s4550_s2 = inlined_call_operand.vmem [shape: f32[2,32], index: 2, kind: input, shape index: {}]   ;;  %s4551_s3 = inlined_call_operand.vmem [shape: f32[49,2], index: 3, kind: input, shape index: {}]   ;;  %s4552_s4 = inlined_call_operand.hbm [shape: f32[2,32,256], index: 4, kind: output, shape index: {}]  }
   0x1   :  { %11 = vsyncpa [#allocation4 + $0x1], 0 }
   0x2   :  { %12 = vsyncpa [#allocation5], 0 }
   0x3   :  { %14 = vsyncpa [#allocation5 + $0x1], 0  ;;  %s3268_s15 = smov 0   ;;  %s3270_s16 = smov 0  }
   0x4   :  { %s3272_s17 = smov 0   ;;  %s3274_s18 = smov 0  }
   0x5 LB: > { %s3289_s19 = sadd.s32 4294967295, %s3217_s18   ;;  %s2989_s20 = sadd.s32 4294967294, %s3217_s18   ;;  %s3217_s18 = sphi %s3274_s18, %s4668_s18   ;;  %s3213_s17 = sphi %s3272_s17, %s4667_s17   ;;  %s3209_s16 = sphi %s3270_s16, %s4666_s16   ;;  %s3205_s15 = sphi %s3268_s15, %s4665_s15  }
   0x6   : > { %s3293_s21 = sadd.s32 1, %s3217_s18   ;;  %s27_s22 = sadd.s32 1, %s3213_s17 }
   0x7   : > { %s24_s23 = ssub.s32 %s3217_s18, %s3293_s21  ;;  %p34_p0 = scmp.ne.s32.totalorder %s3213_s17, %s3209_s16 }
   0x8   : > { %p25_p1 = scmp.eq.s32.totalorder %s24_s23, 0  ;;  %p35_p2 = scmp.eq.s32.totalorder %s3217_s18, 0 }
   0x9   : > { %p40_p3 = scmp.ne.s32.totalorder %s3209_s16, %s3205_s15  ;;  %p41_p4 = scmp.eq.s32.totalorder %s3289_s19, 0 }
   0xa   : > { %s3305_s24 = scalar_select %p25_p1, %s3213_s17, %s27_s22  }
   0xb   : > { %p3307_p5 = por %p35_p2, %p34_p0  ;;  %p3311_p6 = por %p41_p4, %p40_p3 }
   0xc   : > { %p127_p7 = scmp.eq.s32.totalorder %s3289_s19, 1  ;;  %p133_p8 = scmp.eq.s32.totalorder %s2989_s20, 1 }
   0xd   : > { %p3053_p10 = scmp.lt.s32.totalorder %s3217_s18, 2  ;;  %s162_s29 = sand.u32 1, %s3213_s17  }
   0xe   : > { %p3318_p11 = por %p127_p7, %p34_p0  ;;  %p3322_p12 = por %p133_p8, %p40_p3 }
   0xf   : > { %s3010_s30 = sshll.u32 %s3217_s18, 10  ;;  %s2992_s5 = sshll.u32 %s162_s29, 6 }
  0x10   : > { %s4591_s27 = scalar_select %p3318_p11, 1, 0 }
  0x11   : > { %s4592_s28 = scalar_select %p3322_p12, 1, 0 }
  0x12   : > { %s3331_s8 = scalar_lea.hbm %s4548_s0, %s3010_s30  ;;  %s166_s9 = scalar_lea.vmem [#allocation3], %s2992_s5 }
  0x13   : > { %s173_s10 = sshll.u32 %s166_s9, 4  ;;  %p3335_p13 = pnand %p3053_p10, %p3307_p5  ;;  %s3339_s10 = int_to_ptr.vmem [resolvable:$true] %s173_s10 }
  0x14   : > { %s3341_s12 = scalar_lea.sflag [#allocation4], %s162_s29  ;;  %s3121_s13 = scalar_lea.hbm %s3331_s8, 1024 }
  0x15   : > { %p3122_p0 = scmp.ne.s32.totalorder %s3331_s8, %s3121_s13  ;;  %p3123_p1 = pneg %p3335_p13 }
  0x16   : > { %s3126_s22 = scalar_lea.hbm %s4548_s0, 2048  ;;  %p3127_p4 = scmp.lt.u32.totalorder %s3331_s8, %s4548_s0 }
  0x17   : > { %p3124_p2 = pnand %p3123_p1, %p3122_p0  ;;  %p3128_p5 = scmp.lt.u32.totalorder %s3126_s22, %s3121_s13 }
  0x18   : > { %p3130_p8 = scmp.lt.u32.totalorder %s3121_s13, %s3331_s8 }
  0x19   : > { %p3125_p3 = pneg %p3124_p2  ;;  %p3129_p7 = por %p3128_p5, %p3127_p4 }
  0x1b   : > { %p3131_p10 = por %p3130_p8, %p3129_p7 }
  0x1d   : > { %p3132_p9 = pnand %p3131_p10, %p3125_p3 }
  0x1f   : > { %3135 = shalt.err (!%p3132_p9)
}
  0x20   : > { %s3136_s29 = scalar_lea.vmem %s3339_s10, 1024  ;;  %s3219_s30 = smov [#allocation3]  }
  0x21   : > { %p3137_p0 = scmp.ne.s32.totalorder %s3339_s10, %s3136_s29  ;;  %s3141_s5 = sshll.u32 %s3219_s30, 4  ;;  %s3142_s5 = int_to_ptr.vmem [resolvable:$false] %s3141_s5 }
  0x22   : > { %s3143_s6 = scalar_lea.vmem %s3142_s5, 2048  ;;  %p3144_p11 = scmp.lt.s32.totalorder %s3339_s10, %s3142_s5 }
  0x23   : > { %p3139_p2 = pnand %p3137_p0, %p3123_p1  ;;  %p3145_p4 = scmp.lt.s32.totalorder %s3143_s6, %s3136_s29 }
  0x25   : > { %p3140_p12 = pneg %p3139_p2  ;;  %p3146_p5 = por %p3145_p4, %p3144_p11 }
  0x27   : > { %p3147_p7 = pnand %p3146_p5, %p3140_p12 }
  0x29   : > { %3150 = shalt.err (!%p3147_p7)
}
  0x2a   : > { %s3220_s7 = smov 256   ;;  %s3221_s9 = smov 16  }
  0x2b   : > { %3048 = dma.hbm_to_vmem [thread:$0]  (!%p3335_p13), %s3331_s8, 1024, %s3339_s10, %s3341_s12, %s3220_s7, %s3220_s7, %s3221_s9  }
  0x2c   : > { %p2995_p9 = scmp.ge.s32.totalorder %s3217_s18, 1  ;;  %p181_p1 = scmp.lt.s32.totalorder %s3217_s18, 3 }
  0x2e   : > { %p182_p3 = pnand %p2995_p9, %p181_p1 }
  0x30   : > { %185 = sbr.rel (%p182_p3) target bundleno = 1738 (0x6ca), region = 36 }
  0x37   : > { %s3372_s13 = sand.u32 1, %s3209_s16  }
  0x38   : > { %s2996_s14 = sshll.u32 %s3372_s13, 6  ;;  %s188_s20 = scalar_lea.sflag [#allocation4], %s3372_s13 }
  0x39   : > { %s191_s22 = scalar_lea.vmem [#allocation3], %s2996_s14 }
  0x3a   : > { %3196 = dma.done.wait (%p3311_p6), %s188_s20, 1024  }
  0x3b   : > { %3198 = vsyncadd (%p3311_p6), %s188_s20, 4294966272  ;;  %v3382_v0 = vld [vmem:[%s191_s22 + $0x20] sm:$0xff]  ;;  %v3384_v1 = vld [vmem:[%s191_s22 + $0x28] sm:$0xff]  ;;  %v3222_v19 = vmov 0.0|0.0   ;;  %vm3223_vm0 = vmmov 0   ;;  %v4554_v23 = vmov 0.0   ;;  %v256_v24 = vlaneseq }
  0x3c   : > { %v3386_v2 = vld [vmem:[%s191_s22] sm:$0xff]  ;;  %v242_v3 = vadd.f32 %v3384_v1, %v3382_v0  ;;  %v3390_v4 = vld [vmem:[%s191_s22 + $0x8] sm:$0xff]  ;;  %v3392_v5 = vld [vmem:[%s191_s22 + $0x10] sm:$0xff]  ;;  %v230_v15 = vmax.f32 %v3382_v0, %v3384_v1  ;;  %3035 = vmatprep.subr.bf16.mxu0 %v3222_v19  ;;  %3027 = vmatprep.mubr.msk.f32.mxu0 %vm3223_vm0, %v4554_v23  ;;  %vm267_vm1 = vcmask 130112   ;;  %vm274_vm2 = vcmask 195712   ;;  %s3225_s5 = smov 96  }
  0x3d   : > { %v3394_v6 = vld [vmem:[%s191_s22 + $0x18] sm:$0xff]  ;;  %v236_v7 = vadd.f32 %v3390_v4, %v3386_v2  ;;  %v224_v8 = vmax.f32 %v3386_v2, %v3390_v4  ;;  %v3402_v10 = vld [vmem:[%s191_s22 + $0x30] sm:$0xff]  ;;  %v312_v20 = vld [vmem:[%s4549_s1 + $0x10] sm:$0xff]  ;;  %3030 = vmatprep.subr.mxu1 %v4554_v23  ;;  %3032 = vmatprep.mubr.msk.f32.mxu1 %vm3223_vm0, %v4554_v23  ;;  %v257_v25 = vand.u32 127, %v256_v24  ;;  %v3429_v29 = vshrl.u32 %v256_v24, 7  ;;  %s3226_s6 = smov 112  }
  0x3e   : > { %243 = vadd.xlane.f32.xlu1 %v242_v3  ;;  %v239_v9 = vadd.f32 %v3394_v6, %v3392_v5  ;;  %v3404_v11 = vld [vmem:[%s191_s22 + $0x38] sm:$0xff]  ;;  %v227_v13 = vmax.f32 %v3392_v5, %v3394_v6  ;;  %v310_v16 = vld [vmem:[%s4549_s1] sm:$0xff]  ;;  %v313_v21 = vld [vmem:[%s4549_s1 + $0x18] sm:$0xff]  ;;  %vm281_vm3 = vcmask 261312   ;;  %vm308_vm4 = vcmask 1040384   ;;  %s3227_s7 = smov 64  }
  0x3f   : > { %237 = vadd.xlane.f32.xlu0 %v236_v7  ;;  %v245_v12 = vadd.f32 %v3404_v11, %v3402_v10  ;;  %v233_v14 = vmax.f32 %v3402_v10, %v3404_v11  ;;  %v311_v17 = vld [vmem:[%s4549_s1 + $0x8] sm:$0xff]  ;;  %v3039_v22 = vpack.c.bf16 %v313_v21, %v312_v20  ;;  %v262_v28 = vadd.s32 4294967288, %v257_v25  ;;  %v389_v63 = vld [vmem:[%s4550_s2] sm:$0x3]  ;;  %s3228_s9 = smov 80   ;;  %s3229_s20 = smov 32  }
  0x40   : > { %v3036_v18 = vpack.c.bf16 %v311_v17, %v310_v16  ;;  %v276_v33 = vadd.s32 4294967272, %v257_v25  ;;  %v269_v34 = vadd.s32 4294967280, %v257_v25  ;;  %v260_v36 = vsub.s32 %v257_v25, %v3429_v29  ;;  %v856_v3 = vld [vmem:[%s4551_s3] sm:$0xff]  ;;  %v857_v24 = vld [vmem:[%s4551_s3 + $0x8] sm:$0xff]  ;;  %s3230_s22 = smov 48   ;;  %s3231_s26 = smov 16  }
  0x41   : > { %v265_v31 = vsub.s32 %v262_v28, %v3429_v29  ;;  %vm314_vm5 = vcmask 261120   ;;  %v3437_v61 = vsub.s32 0, %v3429_v29  ;;  %v3440_v62 = vsub.s32 1, %v3429_v29  ;;  %s3234_s8 = smov 3   ;;  %s3235_s10 = smov 127  }
  0x42   : > { %225 = vmax.xlane.f32.xlu1 %v224_v8  ;;  %3037 = vmatpush3.bf16.msra.mxu0 %v3036_v18  ;;  %v279_v41 = vsub.s32 %v276_v33, %v3429_v29  ;;  %v272_v43 = vsub.s32 %v269_v34, %v3429_v29  ;;  %vm394_vm6 = vcmask 1041408   ;;  %v3449_v7 = vsub.s32 2, %v3429_v29  ;;  %v858_v34 = vld [vmem:[%s4551_s3 + $0x10] sm:$0xff]  ;;  %s3236_s11 = smov 126   ;;  %s3237_s12 = smov 125  }
  0x43   : > { %240 = vadd.xlane.f32.xlu0 %v239_v9  ;;  %3038 = vmatprep.subr.bf16.mxu0 %v3222_v19  ;;  %4594 = vst [vmem:[#allocation9_spill] sm:$0xff] %v3440_v62  ;;  %v3452_v8 = vsub.s32 3, %v3429_v29  ;;  %v870_v9 = vrot.slane %v856_v3, %v3437_v61  ;;  %v3462_v16 = vsub.s32 5, %v3429_v29  ;;  %v3466_v18 = vsub.s32 6, %v3429_v29  ;;  %s3238_s23 = smov 124   ;;  %s3239_s25 = smov 123  }
  0x44   : > { %3031 = vmatpush3.msk.msra.mxu1 %vm394_vm6, %v389_v63  ;;  %v3470_v20 = vsub.s32 7, %v3429_v29  ;;  %v1154_v25 = vrot.slane %v857_v24, %v3437_v61  ;;  %vm390_vm7 = vcmask 15360   ;;  %v861_v63 = vld [vmem:[%s4551_s3 + $0x28] sm:$0xff]  ;;  %vm543_vm8 = vcmask 179200   ;;  %s3240_s29 = smov 122   ;;  %s3011_s30 = sshll.u32 %s3289_s19, 10 }
  0x45   : > { %v1049_v19 = vrot.slane %v856_v3, %v3462_v16  ;;  %v1088_v21 = vrot.slane %v856_v3, %v3466_v18  ;;  %v1271_v28 = vrot.slane %v857_v24, %v3452_v8  ;;  %vm546_vm9 = vcmask 177152   ;;  %s2903_s19 = scalar_lea.sflag [#allocation5], %s3372_s13  ;;  %p4662_p11 = scmp.ne.s32.totalorder %s4591_s27, 0 }
  0x46   : > { %246 = vadd.xlane.f32.xlu1 %v245_v12  ;;  %3040 = vmatpush3.bf16.msra.mxu0 %v3039_v22  ;;  %v893_v12 = vrot.slane %v856_v3, %v3440_v62  ;;  %v1131_v22 = vrot.slane %v856_v3, %v3470_v20  ;;  %v1415_v33 = vrot.slane %v857_v24, %v3470_v20  ;;  %vm851_vm10 = vcmask 154648  }
  0x47   : > { %228 = vmax.xlane.f32.xlu0 %v227_v13  ;;  %v932_v13 = vrot.slane %v856_v3, %v3449_v7  ;;  %vm2858_vm11 = vcmask 130048   ;;  %vm2861_vm12 = vcmask 392192   ;;  %vm2863_vm13 = vcmask 523264  }
  0x48   : > { %vm2865_vm14 = vcmask 654336   ;;  %vm2867_vm15 = vcmask 785408   ;;  %vm2869_vm0 = vcmask 916480  }
  0x4a   : > { %234 = vmax.xlane.f32.xlu1 %v233_v14  ;;  %v3458_v14 = vsub.s32 4, %v3429_v29 }
  0x4b   : > { %231 = vmax.xlane.f32.xlu0 %v230_v15  ;;  %v971_v15 = vrot.slane %v856_v3, %v3452_v8 }
  0x4c   : > { %v1010_v17 = vrot.slane %v856_v3, %v3458_v14  ;;  %v2354_v3 = vrot.slane %v861_v63, %v3437_v61 }
  0x5b   : > { %895 = vbcast.lane.b32.xlu1 %v893_v12, 256  ;;  %v2498_v12 = vrot.slane %v861_v63, %v3458_v14 }
  0x5f   : > { %973 = vbcast.lane.b32.xlu1 %v971_v15, 256  ;;  %v2576_v15 = vrot.slane %v861_v63, %v3466_v18 }
  0x61   : > { %872 = vbcast.lane.b32.xlu0 %v870_v9, 256 }
  0x63   : > { %1051 = vbcast.lane.b32.xlu1 %v1049_v19, 256  ;;  %v2537_v19 = vrot.slane %v861_v63, %v3462_v16 }
  0x65   : > { %934 = vbcast.lane.b32.xlu0 %v932_v13, 256  ;;  %v2393_v13 = vrot.slane %v861_v63, %v3440_v62 }
  0x67   : > { %1133 = vbcast.lane.b32.xlu1 %v1131_v22, 256 }
  0x69   : > { %1012 = vbcast.lane.b32.xlu0 %v1010_v17, 256  ;;  %v2459_v17 = vrot.slane %v861_v63, %v3452_v8 }
  0x6d   : > { %1090 = vbcast.lane.b32.xlu0 %v1088_v21, 256  ;;  %v3002_v21 = vld [vmem:[%s4551_s3 + $0x30] ss:$0 sm:$0xff] }
  0x71   : > { %1156 = vbcast.lane.b32.xlu0 %v1154_v25, 256 }
  0xcb   : > { %v244_v26 = vpop.xlane.xlu1 %243 }
  0xcc   : > { %v238_v27 = vpop.xlane.xlu0 %237  ;;  %v250_v44 = vmul.f32 0.00390625, %v244_v26  ;;  %v1193_v26 = vrot.slane %v857_v24, %v3440_v62 }
  0xcd   : > { %v248_v37 = vmul.f32 0.00390625, %v238_v27  ;;  %v1232_v27 = vrot.slane %v857_v24, %v3449_v7 }
  0xce   : > { %v300_v53 = vrot.slane %v250_v44, %v272_v43  ;;  %1195 = vbcast.lane.b32.xlu1 %v1193_v26, 256 }
  0xcf   : > { %v226_v30 = vpop.xlane.xlu1 %225  ;;  %v291_v45 = vrot.slane %v248_v37, %v260_v36  ;;  %1234 = vbcast.lane.b32.xlu0 %v1232_v27, 256  ;;  %v1532_v37 = vrot.slane %v858_v34, %v3449_v7 }
  0xd0   : > { %v241_v32 = vpop.xlane.xlu0 %240  ;;  %v261_v49 = vrot.slane %v226_v30, %v260_v36  ;;  %v1310_v30 = vrot.slane %v857_v24, %v3458_v14  ;;  %v1493_v36 = vrot.slane %v858_v34, %v3440_v62 }
  0xd1   : > { %v249_v35 = vmul.f32 0.00390625, %v241_v32  ;;  %v1392_v32 = vrot.slane %v857_v24, %v3466_v18 }
  0xd2   : > { %1273 = vbcast.lane.b32.xlu1 %v1271_v28, 256 }
  0xd3   : > { %v247_v38 = vpop.xlane.xlu1 %246  ;;  %v295_v39 = vrot.slane %v249_v35, %v265_v31  ;;  %1312 = vbcast.lane.b32.xlu0 %v1310_v30, 256  ;;  %v1454_v35 = vrot.slane %v858_v34, %v3437_v61 }
  0xd4   : > { %v229_v40 = vpop.xlane.xlu0 %228  ;;  %v251_v42 = vmul.f32 0.00390625, %v247_v38  ;;  %v1571_v38 = vrot.slane %v858_v34, %v3452_v8 }
  0xd5   : > { %v266_v46 = vrot.slane %v229_v40, %v265_v31  ;;  %v296_v48 = vsel %vm267_vm1, %v295_v39, %v291_v45  ;;  %v1349_v31 = vrot.slane %v857_v24, %v3462_v16  ;;  %v1610_v39 = vrot.slane %v858_v34, %v3458_v14 }
  0xd6   : > { %v305_v50 = vrot.slane %v251_v42, %v279_v41  ;;  %v301_v57 = vsel %vm274_vm2, %v300_v53, %v296_v48  ;;  %v1715_v40 = vrot.slane %v858_v34, %v3470_v20  ;;  %v1676_v42 = vrot.slane %v858_v34, %v3466_v18 }
  0xd7   : > { %v235_v47 = vpop.xlane.xlu1 %234  ;;  %v268_v55 = vsel %vm267_vm1, %v266_v46, %v261_v49  ;;  %1351 = vbcast.lane.b32.xlu1 %v1349_v31, 256  ;;  %1394 = vbcast.lane.b32.xlu0 %v1392_v32, 256  ;;  %v2615_v24 = vrot.slane %v861_v63, %v3470_v20 }
  0xd8   : > { %v232_v51 = vpop.xlane.xlu0 %231  ;;  %v280_v52 = vrot.slane %v235_v47, %v279_v41  ;;  %v306_v59 = vsel %vm281_vm3, %v305_v50, %v301_v57  ;;  %v859_v41 = vld [vmem:[%s4551_s3 + $0x18] sm:$0xff]  ;;  %v860_v50 = vld [vmem:[%s4551_s3 + $0x20] sm:$0xff] }
  0xd9   : > { %v273_v54 = vrot.slane %v232_v51, %v272_v43  ;;  %v1793_v43 = vrot.slane %v859_v41, %v3440_v62  ;;  %v1754_v44 = vrot.slane %v859_v41, %v3437_v61  ;;  %v1871_v45 = vrot.slane %v859_v41, %v3452_v8 }
  0xda   : > { %v1832_v46 = vrot.slane %v859_v41, %v3449_v7  ;;  %v1937_v47 = vrot.slane %v859_v41, %v3462_v16  ;;  %v1976_v48 = vrot.slane %v859_v41, %v3466_v18  ;;  %v2015_v49 = vrot.slane %v859_v41, %v3470_v20 }
  0xdb   : > { %v275_v56 = vsel %vm274_vm2, %v273_v54, %v268_v55  ;;  %1417 = vbcast.lane.b32.xlu1 %v1415_v33, 256  ;;  %1456 = vbcast.lane.b32.xlu0 %v1454_v35, 256  ;;  %v2054_v51 = vrot.slane %v860_v50, %v3437_v61  ;;  %v2132_v53 = vrot.slane %v860_v50, %v3449_v7  ;;  %v3534_v31 = vpop.permute.xlu1 %895 }
  0xdc   : > { %v282_v58 = vsel %vm281_vm3, %v280_v52, %v275_v56  ;;  %v2093_v52 = vrot.slane %v860_v50, %v3440_v62  ;;  %v2198_v57 = vrot.slane %v860_v50, %v3458_v14  ;;  %v2315_v9 = vrot.slane %v860_v50, %v3470_v20  ;;  %v3532_v28 = vpop.permute.xlu0 %872 }
  0xdd   : > { %v309_v60 = vsel %vm308_vm4, %v282_v58, %v306_v59  ;;  %v1653_v58 = vrot.slane %v858_v34, %v3462_v16  ;;  %v2276_v59 = vrot.slane %v860_v50, %v3466_v18  ;;  %v1914_v22 = vrot.slane %v859_v41, %v3458_v14  ;;  %4595 = vst [vmem:[#allocation10_spill] sm:$0xff] %v3532_v28 }
  0xde   : > { %3028 = vmatmul.mubr.msk.f32.vlgmr.msra.gmra.mrb[0].mxu0 %vm314_vm5, %v309_v60  ;;  %v2237_v60 = vrot.slane %v860_v50, %v3462_v16  ;;  %v2436_v18 = vrot.slane %v861_v63, %v3449_v7  ;;  %v2175_v25 = vrot.slane %v860_v50, %v3452_v8 }
  0xdf   : > { %1495 = vbcast.lane.b32.xlu1 %v1493_v36, 256  ;;  %1534 = vbcast.lane.b32.xlu0 %v1532_v37, 256  ;;  %v3538_v20 = vpop.permute.xlu1 %973 }
  0xe0   : > { %v3536_v14 = vpop.permute.xlu0 %934 }
  0xe3   : > { %1573 = vbcast.lane.b32.xlu1 %v1571_v38, 256  ;;  %1612 = vbcast.lane.b32.xlu0 %v1610_v39, 256  ;;  %v3542_v7 = vpop.permute.xlu1 %1051 }
  0xe4   : > { %v3540_v33 = vpop.permute.xlu0 %1012 }
  0xe7   : > { %1717 = vbcast.lane.b32.xlu1 %v1715_v40, 256  ;;  %1678 = vbcast.lane.b32.xlu0 %v1676_v42, 256  ;;  %v3546_v36 = vpop.permute.xlu1 %1133 }
  0xe8   : > { %v3544_v35 = vpop.permute.xlu0 %1090  ;;  %4596 = vst [vmem:[#allocation11_spill] sm:$0xff] %v3546_v36 }
  0xeb   : > { %1795 = vbcast.lane.b32.xlu1 %v1793_v43, 256  ;;  %1756 = vbcast.lane.b32.xlu0 %v1754_v44, 256 }
  0xec   : > { %v3548_v37 = vpop.permute.xlu0 %1156 }
  0xef   : > { %1873 = vbcast.lane.b32.xlu1 %v1871_v45, 256  ;;  %1834 = vbcast.lane.b32.xlu0 %v1832_v46, 256 }
  0xf3   : > { %1939 = vbcast.lane.b32.xlu1 %v1937_v47, 256  ;;  %1978 = vbcast.lane.b32.xlu0 %v1976_v48, 256 }
  0xf7   : > { %2017 = vbcast.lane.b32.xlu1 %v2015_v49, 256  ;;  %2056 = vbcast.lane.b32.xlu0 %v2054_v51, 256 }
  0xfb   : > { %2095 = vbcast.lane.b32.xlu1 %v2093_v52, 256  ;;  %2134 = vbcast.lane.b32.xlu0 %v2132_v53, 256 }
  0xff   : > { %2200 = vbcast.lane.b32.xlu0 %v2198_v57, 256  ;;  %1655 = vbcast.lane.b32.xlu1 %v1653_v58, 256 }
 0x103   : > { %2278 = vbcast.lane.b32.xlu0 %v2276_v59, 256  ;;  %2239 = vbcast.lane.b32.xlu1 %v2237_v60, 256 }
 0x107   : > { %2356 = vbcast.lane.b32.xlu0 %v2354_v3, 256  ;;  %2317 = vbcast.lane.b32.xlu1 %v2315_v9, 256 }
 0x10b   : > { %2500 = vbcast.lane.b32.xlu0 %v2498_v12, 256  ;;  %2395 = vbcast.lane.b32.xlu1 %v2393_v13, 256 }
 0x10f   : > { %2578 = vbcast.lane.b32.xlu0 %v2576_v15, 256  ;;  %2461 = vbcast.lane.b32.xlu1 %v2459_v17, 256 }
 0x113   : > { %2656 = vbcast.lane.b32.xlu0 %v3002_v21, 256  ;;  %2539 = vbcast.lane.b32.xlu1 %v2537_v19, 256 }
 0x117   : > { %1916 = vbcast.lane.b32.xlu0 %v1914_v22, 256  ;;  %2617 = vbcast.lane.b32.xlu1 %v2615_v24, 256 }
 0x11b   : > { %2438 = vbcast.lane.b32.xlu0 %v2436_v18, 256  ;;  %2177 = vbcast.lane.b32.xlu1 %v2175_v25, 256 }
 0x140   : > { %v3550_v38 = vpop.permute.xlu1 %1195 }
 0x141   : > { %v3553_v41 = vpop.permute.xlu0 %1234 }
 0x144   : > { %v3555_v42 = vpop.permute.xlu1 %1273 }
 0x145   : > { %v3557_v43 = vpop.permute.xlu0 %1312 }
 0x149   : > { %v3559_v44 = vpop.permute.xlu1 %1351  ;;  %v3561_v45 = vpop.permute.xlu0 %1394 }
 0x14a   : > { %4597 = vst [vmem:[#allocation12_spill] sm:$0xff] %v3561_v45 }
 0x14d   : > { %v3563_v46 = vpop.permute.xlu1 %1417  ;;  %v3565_v47 = vpop.permute.xlu0 %1456 }
 0x151   : > { %v3567_v48 = vpop.permute.xlu1 %1495  ;;  %v3569_v49 = vpop.permute.xlu0 %1534 }
 0x155   : > { %v3571_v50 = vpop.permute.xlu1 %1573  ;;  %v3573_v51 = vpop.permute.xlu0 %1612 }
 0x159   : > { %v3575_v52 = vpop.permute.xlu1 %1717  ;;  %v3577_v53 = vpop.permute.xlu0 %1678 }
 0x1b1   : > { %v384_v54 = vpop.f32.mrb[0].mxu0 }
 0x1b2   : > { %v388_v55 = vmax.f32 %v384_v54, 0.0  ;;  %v3029_v56 = vpop.f32.mrb[1].mxu0  ;;  %v3579_v54 = vpop.permute.xlu1 %1795 }
 0x1b4   : > { %3033 = vmatmul.mubr.msk.f32.vlgmr.msra.gmra.mrb[0].mxu1 %vm390_vm7, %v388_v55  ;;  %v3581_v55 = vpop.permute.xlu0 %1756 }
 0x1b6   : > { %v3583_v56 = vpop.permute.xlu1 %1873 }
 0x1b8   : > { %v3585_v57 = vpop.permute.xlu0 %1834 }
 0x1ba   : > { %v3587_v58 = vpop.permute.xlu1 %1939 }
 0x1bc   : > { %v3589_v59 = vpop.permute.xlu0 %1978 }
 0x1be   : > { %v3591_v60 = vpop.permute.xlu1 %2017 }
 0x1c0   : > { %v3593_v63 = vpop.permute.xlu0 %2056 }
 0x1c2   : > { %v3595_v3 = vpop.permute.xlu1 %2095 }
 0x1c4   : > { %v3597_v9 = vpop.permute.xlu0 %2134 }
 0x1c5   : > { %4598 = vst [vmem:[#allocation13_spill] sm:$0xff] %v3597_v9 }
 0x1c6   : > { %v3599_v12 = vpop.permute.xlu1 %1655 }
 0x1c7   : > { %4599 = vst [vmem:[#allocation14_spill] sm:$0xff] %v3599_v12 }
 0x1c8   : > { %v3601_v13 = vpop.permute.xlu0 %2200 }
 0x1c9   : > { %4600 = vst [vmem:[#allocation15_spill] sm:$0xff] %v3601_v13 }
 0x1ca   : > { %v3603_v15 = vpop.permute.xlu1 %2239 }
 0x1cb   : > { %4601 = vst [vmem:[#allocation16_spill] sm:$0xff] %v3603_v15 }
 0x1cc   : > { %v3605_v17 = vpop.permute.xlu0 %2278 }
 0x1ce   : > { %v3607_v19 = vpop.permute.xlu1 %2317 }
 0x1d0   : > { %v3609_v21 = vpop.permute.xlu0 %2356 }
 0x1d1   : > { %4602 = vst [vmem:[#allocation17_spill] sm:$0xff] %v3609_v21 }
 0x1d2   : > { %v3611_v22 = vpop.permute.xlu1 %2395 }
 0x1d3   : > { %4603 = vst [vmem:[#allocation18_spill] sm:$0xff] %v3611_v22 }
 0x1d4   : > { %v3613_v24 = vpop.permute.xlu0 %2500 }
 0x1d5   : > { %4604 = vst [vmem:[#allocation19_spill] sm:$0xff] %v3613_v24 }
 0x1d6   : > { %v3615_v18 = vpop.permute.xlu1 %2461 }
 0x1d7   : > { %4605 = vst [vmem:[#allocation20_spill] sm:$0xff] %v3615_v18 }
 0x1d8   : > { %v3617_v25 = vpop.permute.xlu0 %2578 }
 0x1d9   : > { %4606 = vst [vmem:[#allocation21_spill] sm:$0xff] %v3617_v25 }
 0x287   : > { %v464_v26 = vpop.f32.mrb[0].mxu1 }
 0x288   : > { %v469_v16 = vrot.slane %v464_v26, 1  ;;  %v3034_v27 = vpop.f32.mrb[1].mxu1 }
 0x28a   : > { %v471_v30 = vadd.f32 %v469_v16, %v464_v26  ;;  %v3619_v26 = vpop.permute.xlu1 %2539  ;;  %v3621_v16 = vpop.permute.xlu0 %2656 }
 0x28b   : > { %4607 = vst [vmem:[#allocation22_spill] sm:$0xff] %v3619_v26  ;;  %4608 = vst [vmem:[#allocation23_spill] sm:$0xff] %v3621_v16 }
 0x28c   : > { %v3001_v32 = vmul.f32 -1.442695, %v471_v30 }
 0x28e   : > { %3109 = vpow2.f32 %v3001_v32  ;;  %v3623_v27 = vpop.permute.xlu1 %2617  ;;  %v3625_v30 = vpop.permute.xlu0 %1916 }
 0x28f   : > { %4609 = vst [vmem:[#allocation24_spill] sm:$0xff] %v3623_v27  ;;  %4610 = vst [vmem:[#allocation25_spill] sm:$0xff] %v3625_v30 }
 0x292   : > { %v3627_v32 = vpop.permute.xlu1 %2177 }
 0x293   : > { %4611 = vst [vmem:[#allocation26_spill] sm:$0xff] %v3627_v32 }
 0x298   : > { %v3110_v8 = vpop.eup %3109 }
 0x299   : > { %v475_v34 = vadd.f32 1.0, %v3110_v8  ;;  %v3629_v8 = vpop.permute.xlu0 %2438 }
 0x29a   : > { %4612 = vst [vmem:[#allocation27_spill] sm:$0xff] %v3629_v8 }
 0x29b   : > { %3111 = vrcp.f32 %v475_v34 }
 0x2a5   : > { %v3112_v39 = vpop.eup %3111 }
 0x2a6   : > { %v481_v40 = vrot.slane %v3112_v39, %v3437_v61 }
 0x2a8   : > { %487 = vbcast.lane.b32.xlu1 %v481_v40, 264  ;;  %483 = vbcast.lane.b32.xlu0 %v481_v40, 256 }
 0x2ac   : > { %491 = vbcast.lane.b32.xlu1 %v481_v40, 272 }
 0x2b0   : > { %495 = vbcast.lane.b32.xlu1 %v481_v40, 280 }
 0x31a   : > { %v488_v34 = vpop.permute.xlu1 %487  ;;  %v484_v40 = vpop.permute.xlu0 %483 }
 0x31b   : > { %v3638_v62 = vmul.f32 %v484_v40, %v3386_v2  ;;  %v3641_v16 = vmul.f32 %v484_v40, %v3390_v4  ;;  %v3644_v32 = vmul.f32 %v488_v34, %v3392_v5  ;;  %v3647_v8 = vmul.f32 %v488_v34, %v3394_v6 }
 0x31d   : > { %4615 = vst [vmem:[#allocation30_spill] sm:$0xff] %v3638_v62  ;;  %4616 = vst [vmem:[#allocation31_spill] sm:$0xff] %v3641_v16 }
 0x31e   : > { %v492_v39 = vpop.permute.xlu1 %491  ;;  %4617 = vst [vmem:[#allocation32_spill] sm:$0xff] %v3644_v32  ;;  %4618 = vst [vmem:[#allocation33_spill] sm:$0xff] %v3647_v8 }
 0x31f   : > { %v3632_v23 = vmul.f32 %v492_v39, %v3382_v0  ;;  %v3635_v12 = vmul.f32 %v492_v39, %v3384_v1 }
 0x321   : > { %4613 = vst [vmem:[#allocation28_spill] sm:$0xff] %v3632_v23  ;;  %4614 = vst [vmem:[#allocation29_spill] sm:$0xff] %v3635_v12  ;;  %v505_v1 = vmax.f32 %v3638_v62, %v3632_v23  ;;  %v514_v2 = vmax.f32 %v3641_v16, %v3635_v12 }
 0x322   : > { %v496_v30 = vpop.permute.xlu1 %495 }
 0x323   : > { %v3650_v45 = vmul.f32 %v496_v30, %v3402_v10  ;;  %v3653_v0 = vmul.f32 %v496_v30, %v3404_v11  ;;  %v523_v11 = vadd.f32 %v3644_v32, %v3638_v62 }
 0x325   : > { %4619 = vst [vmem:[#allocation34_spill] sm:$0xff] %v3650_v45  ;;  %4620 = vst [vmem:[#allocation35_spill] sm:$0xff] %v3653_v0  ;;  %v506_v4 = vmax.f32 %v3644_v32, %v3650_v45  ;;  %v515_v5 = vmax.f32 %v3647_v8, %v3653_v0  ;;  %v524_v26 = vadd.f32 %v523_v11, %v3632_v23 }
 0x327   : > { %v507_v6 = vmax.f32 %v505_v1, %v506_v4  ;;  %v516_v34 = vmax.f32 %v514_v2, %v515_v5  ;;  %v525_v36 = vadd.f32 %v524_v26, %v3650_v45 }
 0x329   : > { %v508_v39 = vrot.slane %v507_v6, 4  ;;  %v517_v40 = vrot.slane %v516_v34, 4  ;;  %v526_v2 = vrot.slane %v525_v36, 4 }
 0x32b   : > { %v509_v10 = vmax.f32 %v507_v6, %v508_v39  ;;  %v518_v25 = vmax.f32 %v516_v34, %v517_v40 }
 0x32d   : > { %v510_v27 = vrot.slane %v509_v10, 2  ;;  %v519_v22 = vrot.slane %v518_v25, 2 }
 0x32f   : > { %v511_v30 = vmax.f32 %v509_v10, %v510_v27  ;;  %v520_v1 = vmax.f32 %v518_v25, %v519_v22  ;;  %v527_v27 = vadd.f32 %v526_v2, %v525_v36 }
 0x331   : > { %v512_v24 = vrot.slane %v511_v30, 1  ;;  %v521_v26 = vrot.slane %v520_v1, 1  ;;  %v528_v25 = vrot.slane %v527_v27, 2 }
 0x333   : > { %v3666_v18 = vmax.f32 %v511_v30, %v512_v24  ;;  %v532_v24 = vadd.f32 %v3647_v8, %v3641_v16  ;;  %v3684_v22 = vmax.f32 %v520_v1, %v521_v26  ;;  %v529_v36 = vadd.f32 %v528_v25, %v527_v27 }
 0x334   : > { %v4621_v26 = vmov 0.0   ;;  %v3232_v25 = vmov 1983009808  }
 0x335   : > { %555 = vrot.lane.b32.xlu1 %v3666_v18, %s3225_s5  ;;  %552 = vrot.lane.b32.xlu0 %v3666_v18, %s3226_s6  ;;  %v533_v4 = vadd.f32 %v532_v24, %v3635_v12  ;;  %v530_v34 = vrot.slane %v529_v36, 1  ;;  %544 = vst.msk [vmem:[#allocation2] sm:$0xff] %vm543_vm8, %v4621_v26  ;;  %545 = vst.msk [vmem:[#allocation2 + $0x8] sm:$0xff] %vm543_vm8, %v4621_v26 }
 0x336   : > { %548 = vst.msk [vmem:[#allocation2 + $0x18] sm:$0xff] %vm543_vm8, %v4621_v26  ;;  %549 = vst.msk [vmem:[#allocation2 + $0x20] sm:$0xff] %vm543_vm8, %v4621_v26 }
 0x337   : > { %v534_v5 = vadd.f32 %v533_v4, %v3653_v0  ;;  %v531_v10 = vadd.f32 %v530_v34, %v529_v36  ;;  %547 = vst.msk [vmem:[#allocation2 + $0x10] sm:$0x3f] %vm546_vm9, %v4621_v26  ;;  %550 = vst.msk [vmem:[#allocation2 + $0x28] sm:$0x3f] %vm546_vm9, %v4621_v26 }
 0x339   : > { %561 = vrot.lane.b32.xlu1 %v3666_v18, %s3227_s7  ;;  %558 = vrot.lane.b32.xlu0 %v3666_v18, %s3228_s9  ;;  %v535_v6 = vrot.slane %v534_v5, 4  ;;  %v3703_v30 = vmul.f32 0.03125, %v531_v10 }
 0x33b   : > { %v536_v39 = vadd.f32 %v535_v6, %v534_v5  ;;  %v597_v5 = vunpack.c.l.s4 %v3232_v25 }
 0x33d   : > { %567 = vrot.lane.b32.xlu1 %v3666_v18, %s3229_s20  ;;  %564 = vrot.lane.b32.xlu0 %v3666_v18, %s3230_s22  ;;  %v537_v40 = vrot.slane %v536_v39, 2  ;;  %v598_v34 = vunpack.c.0.s8 %v597_v5 }
 0x33f   : > { %v538_v11 = vadd.f32 %v537_v40, %v536_v39  ;;  %v3233_v39 = vmov 1934713408  }
 0x340   : > { %v629_v10 = vunpack.c.l.s4 %v3233_v39 }
 0x341   : > { %574 = vrot.lane.b32.xlu1 %v3684_v22, %s3226_s6  ;;  %570 = vrot.lane.b32.xlu0 %v3666_v18, %s3231_s26  ;;  %v539_v1 = vrot.slane %v538_v11, 1 }
 0x342   : > { %v630_v23 = vunpack.c.0.s8 %v629_v10 }
 0x343   : > { %v540_v2 = vadd.f32 %v539_v1, %v538_v11 }
 0x344   : > { %v3746_v5 = vsub.s32 %v630_v23, %v3429_v29 }
 0x345   : > { %580 = vrot.lane.b32.xlu1 %v3684_v22, %s3228_s9  ;;  %577 = vrot.lane.b32.xlu0 %v3684_v22, %s3225_s5  ;;  %v3717_v24 = vmul.f32 0.03125, %v540_v2  ;;  %v3740_v2 = vsub.s32 %v598_v34, %v3429_v29 }
 0x346   : > { %4623 = vst [vmem:[#allocation37_spill] sm:$0xff] %v3746_v5 }
 0x347   : > { %4622 = vst [vmem:[#allocation36_spill] sm:$0xff] %v3740_v2 }
 0x349   : > { %586 = vrot.lane.b32.xlu1 %v3684_v22, %s3230_s22  ;;  %583 = vrot.lane.b32.xlu0 %v3684_v22, %s3227_s7 }
 0x34d   : > { %592 = vrot.lane.b32.xlu1 %v3684_v22, %s3231_s26  ;;  %589 = vrot.lane.b32.xlu0 %v3684_v22, %s3229_s20 }
 0x351   : > { %697 = vrot.lane.b32.xlu1 %v3703_v30, %s3225_s5  ;;  %694 = vrot.lane.b32.xlu0 %v3703_v30, %s3226_s6 }
 0x355   : > { %703 = vrot.lane.b32.xlu1 %v3703_v30, %s3227_s7  ;;  %700 = vrot.lane.b32.xlu0 %v3703_v30, %s3228_s9 }
 0x359   : > { %709 = vrot.lane.b32.xlu1 %v3703_v30, %s3229_s20  ;;  %706 = vrot.lane.b32.xlu0 %v3703_v30, %s3230_s22 }
 0x35d   : > { %716 = vrot.lane.b32.xlu1 %v3717_v24, %s3226_s6  ;;  %712 = vrot.lane.b32.xlu0 %v3703_v30, %s3231_s26 }
 0x361   : > { %722 = vrot.lane.b32.xlu1 %v3717_v24, %s3228_s9  ;;  %719 = vrot.lane.b32.xlu0 %v3717_v24, %s3225_s5 }
 0x365   : > { %728 = vrot.lane.b32.xlu1 %v3717_v24, %s3230_s22  ;;  %725 = vrot.lane.b32.xlu0 %v3717_v24, %s3227_s7 }
 0x369   : > { %734 = vrot.lane.b32.xlu1 %v3717_v24, %s3231_s26  ;;  %731 = vrot.lane.b32.xlu0 %v3717_v24, %s3229_s20 }
 0x3a7   : > { %v556_v27 = vpop.permute.xlu1 %555  ;;  %v553_v4 = vpop.permute.xlu0 %552 }
 0x3a8   : > { %v595_v45 = vcombine.low %v3666_v18, %v556_v27 }
 0x3aa   : > { %v602_v25 = vrot.slane %v595_v45, %v3740_v2 }
 0x3ab   : > { %v562_v36 = vpop.permute.xlu1 %561  ;;  %v559_v6 = vpop.permute.xlu0 %558 }
 0x3ac   : > { %v603_v40 = vcombine.low %v553_v4, %v559_v6 }
 0x3ae   : > { %v610_v32 = vrot.slane %v603_v40, %v3740_v2 }
 0x3af   : > { %v568_v11 = vpop.permute.xlu1 %567  ;;  %v565_v1 = vpop.permute.xlu0 %564 }
 0x3b0   : > { %v611_v62 = vcombine.low %v562_v36, %v568_v11  ;;  %v627_v4 = vcombine.low %v602_v25, %v610_v32 }
 0x3b2   : > { %v618_v6 = vrot.slane %v611_v62, %v3740_v2  ;;  %v634_v36 = vrot.slane %v627_v4, %v3746_v5 }
 0x3b3   : > { %v575_v0 = vpop.permute.xlu1 %574  ;;  %v571_v12 = vpop.permute.xlu0 %570 }
 0x3b4   : > { %v619_v8 = vcombine.low %v565_v1, %v571_v12 }
 0x3b6   : > { %v626_v34 = vrot.slane %v619_v8, %v3740_v2 }
 0x3b7   : > { %v581_v39 = vpop.permute.xlu1 %580  ;;  %v578_v16 = vpop.permute.xlu0 %577 }
 0x3b8   : > { %v635_v18 = vcombine.low %v618_v6, %v626_v34  ;;  %v652_v27 = vcombine.low %v575_v0, %v581_v39  ;;  %v644_v10 = vcombine.low %v3684_v22, %v578_v16 }
 0x3ba   : > { %v642_v40 = vrot.slane %v635_v18, %v3746_v5  ;;  %v659_v29 = vrot.slane %v652_v27, %v3740_v2  ;;  %v651_v62 = vrot.slane %v644_v10, %v3740_v2 }
 0x3bb   : > { %v587_v45 = vpop.permute.xlu1 %586  ;;  %v584_v12 = vpop.permute.xlu0 %583 }
 0x3bc   : > { %v643_v23 = vcombine.low %v634_v36, %v642_v40  ;;  %v676_v22 = vcombine.low %v651_v62, %v659_v29 }
 0x3be   : > { %839 = vrot.lane.b32.xlu0 %v643_v23, %s3234_s8  ;;  %v683_v34 = vrot.slane %v676_v22, %v3746_v5 }
 0x3bf   : > { %v593_v16 = vpop.permute.xlu1 %592  ;;  %v590_v32 = vpop.permute.xlu0 %589 }
 0x3c0   : > { %v668_v8 = vcombine.low %v587_v45, %v593_v16  ;;  %v660_v0 = vcombine.low %v584_v12, %v590_v32 }
 0x3c2   : > { %v675_v11 = vrot.slane %v668_v8, %v3740_v2  ;;  %v667_v1 = vrot.slane %v660_v0, %v3740_v2 }
 0x3c3   : > { %v698_v25 = vpop.permute.xlu1 %697  ;;  %v695_v4 = vpop.permute.xlu0 %694 }
 0x3c4   : > { %v684_v6 = vcombine.low %v667_v1, %v675_v11  ;;  %v737_v12 = vcombine.low %v3703_v30, %v698_v25 }
 0x3c6   : > { %v691_v39 = vrot.slane %v684_v6, %v3746_v5  ;;  %v744_v32 = vrot.slane %v737_v12, %v3740_v2 }
 0x3c7   : > { %v704_v18 = vpop.permute.xlu1 %703  ;;  %v701_v27 = vpop.permute.xlu0 %700 }
 0x3c8   : > { %v692_v10 = vcombine.low %v683_v34, %v691_v39  ;;  %v745_v36 = vcombine.low %v695_v4, %v701_v27 }
 0x3ca   : > { %841 = vrot.lane.b32.xlu1 %v692_v10, %s3234_s8  ;;  %v752_v23 = vrot.slane %v745_v36, %v3740_v2 }
 0x3cb   : > { %v710_v40 = vpop.permute.xlu1 %709  ;;  %v707_v45 = vpop.permute.xlu0 %706 }
 0x3cc   : > { %v753_v29 = vcombine.low %v704_v18, %v710_v40  ;;  %v769_v0 = vcombine.low %v744_v32, %v752_v23 }
 0x3ce   : > { %v760_v22 = vrot.slane %v753_v29, %v3740_v2  ;;  %v776_v30 = vrot.slane %v769_v0, %v3746_v5 }
 0x3cf   : > { %v717_v62 = vpop.permute.xlu1 %716  ;;  %v713_v16 = vpop.permute.xlu0 %712 }
 0x3d0   : > { %v761_v8 = vcombine.low %v707_v45, %v713_v16 }
 0x3d2   : > { %v768_v11 = vrot.slane %v761_v8, %v3740_v2 }
 0x3d3   : > { %v723_v1 = vpop.permute.xlu1 %722  ;;  %v720_v4 = vpop.permute.xlu0 %719 }
 0x3d4   : > { %v777_v6 = vcombine.low %v760_v22, %v768_v11  ;;  %v794_v34 = vcombine.low %v717_v62, %v723_v1  ;;  %v786_v39 = vcombine.low %v3717_v24, %v720_v4  ;;  %v900_v1 = vrot.slane %v3534_v31, %v3437_v61 }
 0x3d6   : > { %v784_v25 = vrot.slane %v777_v6, %v3746_v5  ;;  %v801_v36 = vrot.slane %v794_v34, %v3740_v2  ;;  %v793_v40 = vrot.slane %v786_v39, %v3740_v2  ;;  %v939_v39 = vrot.slane %v3536_v14, %v3437_v61 }
 0x3d7   : > { %v729_v18 = vpop.permute.xlu1 %728  ;;  %v726_v27 = vpop.permute.xlu0 %725 }
 0x3d8   : > { %v785_v10 = vcombine.low %v776_v30, %v784_v25  ;;  %v818_v62 = vcombine.low %v793_v40, %v801_v36  ;;  %v1017_v40 = vrot.slane %v3540_v33, %v3437_v61 }
 0x3da   : > { %843 = vrot.lane.b32.xlu0 %v785_v10, %s3234_s8  ;;  %v825_v8 = vrot.slane %v818_v62, %v3746_v5 }
 0x3db   : > { %v735_v45 = vpop.permute.xlu1 %734  ;;  %v732_v12 = vpop.permute.xlu0 %731 }
 0x3dc   : > { %v810_v23 = vcombine.low %v729_v18, %v735_v45  ;;  %v802_v29 = vcombine.low %v726_v27, %v732_v12  ;;  %v978_v27 = vrot.slane %v3538_v20, %v3437_v61 }
 0x3de   : > { %v817_v24 = vrot.slane %v810_v23, %v3740_v2  ;;  %v809_v16 = vrot.slane %v802_v29, %v3740_v2  ;;  %v1056_v29 = vrot.slane %v3542_v7, %v3437_v61 }
 0x3e0   : > { %v826_v32 = vcombine.low %v809_v16, %v817_v24  ;;  %v1095_v16 = vrot.slane %v3544_v35, %v3437_v61 }
 0x3e2   : > { %v833_v0 = vrot.slane %v826_v32, %v3746_v5 }
 0x3e4   : > { %v834_v22 = vcombine.low %v825_v8, %v833_v0 }
 0x3e6   : > { %845 = vrot.lane.b32.xlu1 %v834_v22, %s3234_s8  ;;  %v1161_v22 = vrot.slane %v3548_v37, %v3437_v61 }
 0x430   : > { %v840_v11 = vpop.permute.xlu0 %839 }
 0x431   : > { %852 = vst.msk [vmem:[#allocation2 + $0x3] sm:$0xff] %vm851_vm10, %v840_v11 }
 0x438   : > { %v3782_v4 = vld [vmem:[#allocation2] sm:$0xff] }
 0x439   : > { %v905_v6 = vmul.f32 %v900_v1, %v3782_v4  ;;  %v944_v10 = vmul.f32 %v939_v39, %v3782_v4  ;;  %v983_v36 = vmul.f32 %v978_v27, %v3782_v4  ;;  %v1022_v62 = vmul.f32 %v1017_v40, %v3782_v4 }
 0x43a   : > { %v1061_v24 = vmul.f32 %v1056_v29, %v3782_v4 }
 0x43b   : > { %913 = vrot.lane.b32.xlu0 %v905_v6, %s3235_s10 }
 0x43c   : > { %v842_v34 = vpop.permute.xlu1 %841 }
 0x43d   : > { %853 = vst.msk [vmem:[#allocation2 + $0xb] sm:$0xff] %vm851_vm10, %v842_v34  ;;  %v3827_v34 = vld [vmem:[#allocation2 + $0x1] sm:$0xff] }
 0x444   : > { %v3789_v30 = vld [vmem:[#allocation2 + $0x8] sm:$0xff] }
 0x445   : > { %v906_v25 = vmul.f32 %v900_v1, %v3789_v30  ;;  %v945_v18 = vmul.f32 %v939_v39, %v3789_v30  ;;  %v984_v12 = vmul.f32 %v978_v27, %v3789_v30  ;;  %v1023_v23 = vmul.f32 %v1017_v40, %v3789_v30  ;;  %v3818_v0 = vld [vmem:[#allocation2 + $0x9] sm:$0xff] }
 0x446   : > { %v1062_v32 = vmul.f32 %v1056_v29, %v3789_v30  ;;  %v1101_v8 = vmul.f32 %v1095_v16, %v3789_v30  ;;  %v1100_v1 = vmul.f32 %v1095_v16, %v3782_v4  ;;  %v1167_v6 = vmul.f32 %v1161_v22, %v3818_v0 }
 0x447   : > { %915 = vrot.lane.b32.xlu1 %v906_v25, %s3235_s10  ;;  %954 = vrot.lane.b32.xlu0 %v945_v18, %s3236_s11  ;;  %v1200_v39 = vrot.slane %v3550_v38, %v3437_v61  ;;  %v1166_v25 = vmul.f32 %v1161_v22, %v3827_v34  ;;  %v1239_v27 = vrot.slane %v3553_v41, %v3437_v61 }
 0x448   : > { %v1278_v40 = vrot.slane %v3555_v42, %v3437_v61  ;;  %v1422_v22 = vrot.slane %v3563_v46, %v3437_v61 }
 0x449   : > { %v1205_v18 = vmul.f32 %v1200_v39, %v3827_v34 }
 0x44a   : > { %v1284_v29 = vmul.f32 %v1278_v40, %v3818_v0 }
 0x44b   : > { %952 = vrot.lane.b32.xlu1 %v944_v10, %s3236_s11  ;;  %991 = vrot.lane.b32.xlu0 %v983_v36, %s3237_s12  ;;  %v1206_v10 = vmul.f32 %v1200_v39, %v3818_v0  ;;  %v1245_v36 = vmul.f32 %v1239_v27, %v3818_v0  ;;  %v1461_v39 = vrot.slane %v3565_v47, %v3437_v61 }
 0x44c   : > { %v844_v45 = vpop.permute.xlu0 %843 }
 0x44d   : > { %854 = vst.msk [vmem:[#allocation2 + $0x1b] sm:$0xff] %vm851_vm10, %v844_v45  ;;  %v1244_v45 = vmul.f32 %v1239_v27, %v3827_v34  ;;  %v1500_v27 = vrot.slane %v3567_v48, %v3437_v61 }
 0x44f   : > { %993 = vrot.lane.b32.xlu1 %v984_v12, %s3237_s12  ;;  %1032 = vrot.lane.b32.xlu0 %v1023_v23, %s3238_s23  ;;  %v1283_v12 = vmul.f32 %v1278_v40, %v3827_v34  ;;  %v1317_v23 = vrot.slane %v3557_v43, %v3437_v61  ;;  %v1539_v40 = vrot.slane %v3569_v49, %v3437_v61 }
 0x451   : > { %v1322_v16 = vmul.f32 %v1317_v23, %v3827_v34 }
 0x453   : > { %1030 = vrot.lane.b32.xlu1 %v1022_v62, %s3238_s23  ;;  %1069 = vrot.lane.b32.xlu0 %v1061_v24, %s3239_s25  ;;  %v1323_v62 = vmul.f32 %v1317_v23, %v3818_v0  ;;  %v1356_v24 = vrot.slane %v3559_v44, %v3437_v61  ;;  %v1578_v23 = vrot.slane %v3571_v50, %v3437_v61 }
 0x457   : > { %1071 = vrot.lane.b32.xlu1 %v1062_v32, %s3239_s25  ;;  %1110 = vrot.lane.b32.xlu0 %v1101_v8, %s3240_s29  ;;  %v1361_v32 = vmul.f32 %v1356_v24, %v3827_v34  ;;  %v3859_v8 = vld [vmem:[#allocation2 + $0x2] sm:$0xff] }
 0x458   : > { %v846_v11 = vpop.permute.xlu1 %845 }
 0x459   : > { %855 = vst.msk [vmem:[#allocation2 + $0x23] sm:$0xff] %vm851_vm10, %v846_v11  ;;  %v1362_v11 = vmul.f32 %v1356_v24, %v3818_v0  ;;  %v1617_v24 = vrot.slane %v3573_v51, %v3437_v61 }
 0x45b   : > { %1108 = vrot.lane.b32.xlu1 %v1100_v1, %s3240_s29  ;;  %1176 = vrot.lane.b32.xlu0 %v1167_v6, %s3235_s10  ;;  %v1427_v1 = vmul.f32 %v1422_v22, %v3859_v8  ;;  %v3867_v6 = vld [vmem:[#allocation2 + $0xa] sm:$0xff] }
 0x45f   : > { %1174 = vrot.lane.b32.xlu1 %v1166_v25, %s3235_s10  ;;  %1213 = vrot.lane.b32.xlu0 %v1205_v18, %s3236_s11  ;;  %v1428_v25 = vmul.f32 %v1422_v22, %v3867_v6  ;;  %v1467_v18 = vmul.f32 %v1461_v39, %v3867_v6  ;;  %v3899_v22 = vld [vmem:[#allocation2 + $0x3] sm:$0xff] }
 0x463   : > { %1215 = vrot.lane.b32.xlu1 %v1206_v10, %s3236_s11  ;;  %1254 = vrot.lane.b32.xlu0 %v1245_v36, %s3237_s12  ;;  %v1466_v10 = vmul.f32 %v1461_v39, %v3859_v8  ;;  %v1505_v36 = vmul.f32 %v1500_v27, %v3859_v8 }
 0x467   : > { %1252 = vrot.lane.b32.xlu1 %v1244_v45, %s3237_s12  ;;  %1291 = vrot.lane.b32.xlu0 %v1283_v12, %s3238_s23  ;;  %v1506_v45 = vmul.f32 %v1500_v27, %v3867_v6  ;;  %v1545_v12 = vmul.f32 %v1539_v40, %v3867_v6 }
 0x46b   : > { %1293 = vrot.lane.b32.xlu1 %v1284_v29, %s3238_s23  ;;  %1332 = vrot.lane.b32.xlu0 %v1323_v62, %s3239_s25  ;;  %v1544_v29 = vmul.f32 %v1539_v40, %v3859_v8  ;;  %v1583_v62 = vmul.f32 %v1578_v23, %v3859_v8 }
 0x46f   : > { %1330 = vrot.lane.b32.xlu1 %v1322_v16, %s3239_s25  ;;  %1369 = vrot.lane.b32.xlu0 %v1361_v32, %s3240_s29  ;;  %v1584_v16 = vmul.f32 %v1578_v23, %v3867_v6  ;;  %v1623_v32 = vmul.f32 %v1617_v24, %v3867_v6 }
 0x473   : > { %1371 = vrot.lane.b32.xlu1 %v1362_v11, %s3240_s29  ;;  %1435 = vrot.lane.b32.xlu0 %v1427_v1, %s3235_s10  ;;  %v1683_v11 = vrot.slane %v3577_v53, %v3437_v61  ;;  %v1622_v1 = vmul.f32 %v1617_v24, %v3859_v8 }
 0x475   : > { %v1688_v39 = vmul.f32 %v1683_v11, %v3899_v22 }
 0x477   : > { %1437 = vrot.lane.b32.xlu1 %v1428_v25, %s3235_s10  ;;  %1476 = vrot.lane.b32.xlu0 %v1467_v18, %s3236_s11  ;;  %v3907_v25 = vld [vmem:[#allocation2 + $0xb] sm:$0xff]  ;;  %v1722_v18 = vrot.slane %v3575_v52, %v3437_v61 }
 0x478   : > { %v1689_v27 = vmul.f32 %v1683_v11, %v3907_v25 }
 0x479   : > { %v1728_v40 = vmul.f32 %v1722_v18, %v3907_v25 }
 0x47b   : > { %1474 = vrot.lane.b32.xlu1 %v1466_v10, %s3236_s11  ;;  %1513 = vrot.lane.b32.xlu0 %v1505_v36, %s3237_s12  ;;  %v1727_v10 = vmul.f32 %v1722_v18, %v3899_v22  ;;  %v1761_v36 = vrot.slane %v3581_v55, %v3437_v61  ;;  %v1944_v18 = vrot.slane %v3587_v58, %v3437_v61 }
 0x47d   : > { %v1767_v23 = vmul.f32 %v1761_v36, %v3907_v25 }
 0x47f   : > { %1515 = vrot.lane.b32.xlu1 %v1506_v45, %s3237_s12  ;;  %1554 = vrot.lane.b32.xlu0 %v1545_v12, %s3238_s23  ;;  %v1766_v45 = vmul.f32 %v1761_v36, %v3899_v22  ;;  %v1800_v12 = vrot.slane %v3579_v54, %v3437_v61  ;;  %v3947_v36 = vld [vmem:[#allocation2 + $0x4] sm:$0xff] }
 0x481   : > { %v1806_v24 = vmul.f32 %v1800_v12, %v3907_v25 }
 0x483   : > { %1552 = vrot.lane.b32.xlu1 %v1544_v29, %s3238_s23  ;;  %1591 = vrot.lane.b32.xlu0 %v1583_v62, %s3239_s25  ;;  %v1805_v29 = vmul.f32 %v1800_v12, %v3899_v22  ;;  %v1839_v62 = vrot.slane %v3585_v57, %v3437_v61 }
 0x485   : > { %v1845_v11 = vmul.f32 %v1839_v62, %v3907_v25 }
 0x487   : > { %1593 = vrot.lane.b32.xlu1 %v1584_v16, %s3239_s25  ;;  %1632 = vrot.lane.b32.xlu0 %v1623_v32, %s3240_s29  ;;  %v1844_v16 = vmul.f32 %v1839_v62, %v3899_v22  ;;  %v1878_v32 = vrot.slane %v3583_v56, %v3437_v61 }
 0x48b   : > { %1630 = vrot.lane.b32.xlu1 %v1622_v1, %s3240_s29  ;;  %1696 = vrot.lane.b32.xlu0 %v1688_v39, %s3235_s10  ;;  %v1884_v1 = vmul.f32 %v1878_v32, %v3907_v25  ;;  %v3939_v39 = vld [vmem:[#allocation2 + $0xc] sm:$0xff] }
 0x48f   : > { %1698 = vrot.lane.b32.xlu1 %v1689_v27, %s3235_s10  ;;  %1735 = vrot.lane.b32.xlu0 %v1727_v10, %s3236_s11  ;;  %v1883_v27 = vmul.f32 %v1878_v32, %v3899_v22  ;;  %v1950_v10 = vmul.f32 %v1944_v18, %v3939_v39 }
 0x493   : > { %1737 = vrot.lane.b32.xlu1 %v1728_v40, %s3236_s11  ;;  %1774 = vrot.lane.b32.xlu0 %v1766_v45, %s3237_s12  ;;  %v1983_v40 = vrot.slane %v3589_v59, %v3437_v61  ;;  %v1949_v45 = vmul.f32 %v1944_v18, %v3947_v36 }
 0x495   : > { %v1989_v12 = vmul.f32 %v1983_v40, %v3939_v39 }
 0x497   : > { %1776 = vrot.lane.b32.xlu1 %v1767_v23, %s3237_s12  ;;  %1813 = vrot.lane.b32.xlu0 %v1805_v29, %s3238_s23  ;;  %v2022_v23 = vrot.slane %v3591_v60, %v3437_v61  ;;  %v1988_v29 = vmul.f32 %v1983_v40, %v3947_v36 }
 0x499   : > { %v2028_v62 = vmul.f32 %v2022_v23, %v3939_v39 }
 0x49b   : > { %1815 = vrot.lane.b32.xlu1 %v1806_v24, %s3238_s23  ;;  %1852 = vrot.lane.b32.xlu0 %v1844_v16, %s3239_s25  ;;  %v2061_v24 = vrot.slane %v3593_v63, %v3437_v61  ;;  %v2027_v16 = vmul.f32 %v2022_v23, %v3947_v36  ;;  %v2205_v23 = vrot.slane %v3601_v13, %v3437_v61 }
 0x49c   : > { %v2283_v13 = vrot.slane %v3605_v17, %v3437_v61 }
 0x49d   : > { %v2067_v32 = vmul.f32 %v2061_v24, %v3939_v39 }
 0x49f   : > { %1854 = vrot.lane.b32.xlu1 %v1845_v11, %s3239_s25  ;;  %1893 = vrot.lane.b32.xlu0 %v1884_v1, %s3240_s29  ;;  %v2100_v11 = vrot.slane %v3595_v3, %v3437_v61  ;;  %v2066_v1 = vmul.f32 %v2061_v24, %v3947_v36 }
 0x4a1   : > { %v2106_v18 = vmul.f32 %v2100_v11, %v3939_v39  ;;  %v2105_v40 = vmul.f32 %v2100_v11, %v3947_v36  ;;  %v3989_v11 = vld [vmem:[#allocation2 + $0xd] sm:$0xff] }
 0x4a3   : > { %1891 = vrot.lane.b32.xlu1 %v1883_v27, %s3240_s29  ;;  %1959 = vrot.lane.b32.xlu0 %v1950_v10, %s3235_s10  ;;  %v2139_v27 = vrot.slane %v3597_v9, %v3437_v61 }
 0x4a5   : > { %v2145_v24 = vmul.f32 %v2139_v27, %v3939_v39 }
 0x4a7   : > { %1957 = vrot.lane.b32.xlu1 %v1949_v45, %s3235_s10  ;;  %1998 = vrot.lane.b32.xlu0 %v1989_v12, %s3236_s11  ;;  %v2144_v45 = vmul.f32 %v2139_v27, %v3947_v36  ;;  %v3979_v12 = vld [vmem:[#allocation2 + $0x5] sm:$0xff]  ;;  %v2211_v27 = vmul.f32 %v2205_v23, %v3989_v11 }
 0x4a8   : > { %v2288_v9 = vmul.f32 %v2283_v13, %v3979_v12 }
 0x4ab   : > { %1996 = vrot.lane.b32.xlu1 %v1988_v29, %s3236_s11  ;;  %2037 = vrot.lane.b32.xlu0 %v2028_v62, %s3237_s12 }
 0x4ad   : > { %v914_v10 = vpop.permute.xlu0 %913 }
 0x4af   : > { %2035 = vrot.lane.b32.xlu1 %v2027_v16, %s3237_s12  ;;  %2076 = vrot.lane.b32.xlu0 %v2067_v32, %s3238_s23  ;;  %v2210_v16 = vmul.f32 %v2205_v23, %v3979_v12  ;;  %v877_v32 = vrot.slane %v3532_v28, %v3437_v61 }
 0x4b1   : > { %v882_v5 = vmul.f32 %v877_v32, %v3782_v4  ;;  %v2322_v4 = vrot.slane %v3607_v19, %v3437_v61 }
 0x4b3   : > { %2074 = vrot.lane.b32.xlu1 %v2066_v1, %s3238_s23  ;;  %2115 = vrot.lane.b32.xlu0 %v2106_v18, %s3239_s25  ;;  %v2244_v1 = vrot.slane %v3603_v15, %v3437_v61  ;;  %v883_v18 = vmul.f32 %v877_v32, %v3789_v30 }
 0x4b5   : > { %v2249_v26 = vmul.f32 %v2244_v1, %v3979_v12  ;;  %v2250_v30 = vmul.f32 %v2244_v1, %v3989_v11  ;;  %v2361_v1 = vrot.slane %v3609_v21, %v3437_v61 }
 0x4b7   : > { %2113 = vrot.lane.b32.xlu1 %v2105_v40, %s3239_s25  ;;  %2152 = vrot.lane.b32.xlu0 %v2144_v45, %s3240_s29 }
 0x4b9   : > { %v916_v29 = vpop.permute.xlu1 %915  ;;  %v955_v62 = vpop.permute.xlu0 %954 }
 0x4ba   : > { %v926_v2 = vadd.f32 %v916_v29, %v883_v18 }
 0x4bb   : > { %2154 = vrot.lane.b32.xlu1 %v2145_v24, %s3240_s29  ;;  %2218 = vrot.lane.b32.xlu0 %v2210_v16, %s3235_s10  ;;  %v925_v24 = vadd.f32 %v914_v10, %v882_v5  ;;  %v2327_v5 = vmul.f32 %v2322_v4, %v3979_v12 }
 0x4bc   : > { %v965_v23 = vadd.f32 %v955_v62, %v926_v2 }
 0x4bd   : > { %v953_v40 = vpop.permute.xlu1 %952  ;;  %v992_v45 = vpop.permute.xlu0 %991 }
 0x4be   : > { %v964_v28 = vadd.f32 %v953_v40, %v925_v24  ;;  %v2366_v24 = vmul.f32 %v2361_v1, %v3979_v12 }
 0x4bf   : > { %2220 = vrot.lane.b32.xlu1 %v2211_v27, %s3235_s10  ;;  %2257 = vrot.lane.b32.xlu0 %v2249_v26, %s3236_s11  ;;  %v2289_v26 = vmul.f32 %v2283_v13, %v3989_v11  ;;  %v4624_v13 = vld [vmem:[#allocation11_spill] sm:$0xff] }
 0x4c0   : > { %v1003_v10 = vadd.f32 %v992_v45, %v964_v28  ;;  %v4625_v28 = vld [vmem:[#allocation18_spill] sm:$0xff] }
 0x4c1   : > { %v994_v16 = vpop.permute.xlu1 %993  ;;  %v1033_v15 = vpop.permute.xlu0 %1032  ;;  %v2400_v45 = vrot.slane %v4625_v28, %v3437_v61 }
 0x4c2   : > { %v1004_v29 = vadd.f32 %v994_v16, %v965_v23  ;;  %v1138_v16 = vrot.slane %v4624_v13, %v3437_v61  ;;  %v4027_v13 = vld [vmem:[#allocation2 + $0xe] sm:$0xff] }
 0x4c3   : > { %2259 = vrot.lane.b32.xlu1 %v2250_v30, %s3236_s11  ;;  %2296 = vrot.lane.b32.xlu0 %v2288_v9, %s3237_s12  ;;  %v2328_v9 = vmul.f32 %v2322_v4, %v3989_v11  ;;  %v2367_v4 = vmul.f32 %v2361_v1, %v3989_v11  ;;  %v2405_v1 = vmul.f32 %v2400_v45, %v3979_v12 }
 0x4c4   : > { %v1043_v2 = vadd.f32 %v1033_v15, %v1004_v29  ;;  %v1144_v15 = vmul.f32 %v1138_v16, %v3818_v0 }
 0x4c5   : > { %v1031_v32 = vpop.permute.xlu1 %1030  ;;  %v1070_v18 = vpop.permute.xlu0 %1069 }
 0x4c6   : > { %v1042_v62 = vadd.f32 %v1031_v32, %v1003_v10 }
 0x4c7   : > { %2298 = vrot.lane.b32.xlu1 %v2289_v26, %s3237_s12  ;;  %2335 = vrot.lane.b32.xlu0 %v2327_v5, %s3238_s23  ;;  %v2406_v5 = vmul.f32 %v2400_v45, %v3989_v11  ;;  %v4628_v45 = vld [vmem:[#allocation22_spill] sm:$0xff] }
 0x4c8   : > { %v1081_v23 = vadd.f32 %v1070_v18, %v1042_v62 }
 0x4c9   : > { %v1072_v40 = vpop.permute.xlu1 %1071  ;;  %v1111_v27 = vpop.permute.xlu0 %1110 }
 0x4ca   : > { %v1082_v30 = vadd.f32 %v1072_v40, %v1043_v2  ;;  %v1143_v2 = vmul.f32 %v1138_v16, %v3827_v34  ;;  %v4627_v34 = vld [vmem:[#allocation19_spill] sm:$0xff] }
 0x4cb   : > { %2337 = vrot.lane.b32.xlu1 %v2328_v9, %s3238_s23  ;;  %2374 = vrot.lane.b32.xlu0 %v2366_v24, %s3239_s25  ;;  %v4626_v9 = vld [vmem:[#allocation20_spill] sm:$0xff]  ;;  %v2505_v16 = vrot.slane %v4627_v34, %v3437_v61 }
 0x4cc   : > { %v1121_v29 = vadd.f32 %v1111_v27, %v1082_v30  ;;  %v2466_v28 = vrot.slane %v4626_v9, %v3437_v61  ;;  %v4035_v24 = vld [vmem:[#allocation2 + $0x6] sm:$0xff] }
 0x4cd   : > { %v1109_v32 = vpop.permute.xlu1 %1108  ;;  %v1177_v26 = vpop.permute.xlu0 %1176 }
 0x4ce   : > { %v1148_v10 = vadd.f32 %v1144_v15, %v1121_v29  ;;  %v1120_v40 = vadd.f32 %v1109_v32, %v1081_v23  ;;  %v2472_v27 = vmul.f32 %v2466_v28, %v4027_v13  ;;  %v2471_v15 = vmul.f32 %v2466_v28, %v4035_v24  ;;  %v4629_v28 = vld [vmem:[#allocation21_spill] sm:$0xff] }
 0x4cf   : > { %2376 = vrot.lane.b32.xlu1 %v2367_v4, %s3239_s25  ;;  %2415 = vrot.lane.b32.xlu0 %v2406_v5, %s3240_s29  ;;  %v2511_v29 = vmul.f32 %v2505_v16, %v4027_v13  ;;  %v2544_v4 = vrot.slane %v4628_v45, %v3437_v61  ;;  %v2583_v21 = vrot.slane %v4629_v28, %v3437_v61 }
 0x4d0   : > { %v1147_v0 = vadd.f32 %v1143_v2, %v1120_v40  ;;  %v1187_v5 = vadd.f32 %v1177_v26, %v1148_v10 }
 0x4d1   : > { %v1175_v18 = vpop.permute.xlu1 %1174  ;;  %v1214_v62 = vpop.permute.xlu0 %1213  ;;  %v2549_v26 = vmul.f32 %v2544_v4, %v4035_v24  ;;  %v2589_v10 = vmul.f32 %v2583_v21, %v4027_v13 }
 0x4d2   : > { %v1186_v32 = vadd.f32 %v1175_v18, %v1147_v0 }
 0x4d3   : > { %2413 = vrot.lane.b32.xlu1 %v2405_v1, %s3240_s29  ;;  %2481 = vrot.lane.b32.xlu0 %v2472_v27, %s3235_s10  ;;  %v2510_v1 = vmul.f32 %v2505_v16, %v4035_v24  ;;  %v2550_v27 = vmul.f32 %v2544_v4, %v4027_v13  ;;  %v4630_v16 = vld [vmem:[#allocation24_spill] sm:$0xff] }
 0x4d4   : > { %v1225_v34 = vadd.f32 %v1214_v62, %v1186_v32  ;;  %v2622_v45 = vrot.slane %v4630_v16, %v3437_v61  ;;  %v4631_v4 = vld [vmem:[#allocation12_spill] sm:$0xff] }
 0x4d5   : > { %v1216_v30 = vpop.permute.xlu1 %1215  ;;  %v1255_v23 = vpop.permute.xlu0 %1254 }
 0x4d6   : > { %v1226_v9 = vadd.f32 %v1216_v30, %v1187_v5 }
 0x4d7   : > { %2479 = vrot.lane.b32.xlu1 %v2471_v15, %s3235_s10  ;;  %2520 = vrot.lane.b32.xlu0 %v2511_v29, %s3236_s11 }
 0x4d8   : > { %v1265_v29 = vadd.f32 %v1255_v23, %v1226_v9  ;;  %v4632_v9 = vld [vmem:[#allocation23_spill] sm:$0xff] }
 0x4d9   : > { %v1253_v2 = vpop.permute.xlu1 %1252  ;;  %v1292_v40 = vpop.permute.xlu0 %1291  ;;  %v2661_v23 = vrot.slane %v4632_v9, %v3437_v61  ;;  %v4633_v9 = vld [vmem:[#allocation9_spill] sm:$0xff] }
 0x4da   : > { %v1264_v0 = vadd.f32 %v1253_v2, %v1225_v34  ;;  %v2588_v34 = vmul.f32 %v2583_v21, %v4035_v24  ;;  %v2628_v2 = vmul.f32 %v2622_v45, %v4027_v13  ;;  %v2627_v21 = vmul.f32 %v2622_v45, %v4035_v24 }
 0x4db   : > { %2518 = vrot.lane.b32.xlu1 %v2510_v1, %s3236_s11  ;;  %2559 = vrot.lane.b32.xlu0 %v2550_v27, %s3237_s12  ;;  %v1399_v1 = vrot.slane %v4631_v4, %v3437_v61  ;;  %v4071_v4 = vld [vmem:[#allocation2 + $0x18] sm:$0xff]  ;;  %v2666_v45 = vmul.f32 %v2661_v23, %v4035_v24 }
 0x4dc   : > { %v1303_v62 = vadd.f32 %v1292_v40, %v1264_v0 }
 0x4dd   : > { %v1294_v18 = vpop.permute.xlu1 %1293  ;;  %v1333_v15 = vpop.permute.xlu0 %1332  ;;  %v1404_v40 = vmul.f32 %v1399_v1, %v3859_v8 }
 0x4de   : > { %v1304_v30 = vadd.f32 %v1294_v18, %v1265_v29  ;;  %v2667_v29 = vmul.f32 %v2661_v23, %v4027_v13  ;;  %v982_v23 = vrot.slane %v3538_v20, %v4633_v9 }
 0x4df   : > { %2557 = vrot.lane.b32.xlu1 %v2549_v26, %s3237_s12  ;;  %2598 = vrot.lane.b32.xlu0 %v2589_v10, %s3238_s23 }
 0x4e0   : > { %v1343_v26 = vadd.f32 %v1333_v15, %v1304_v30 }
 0x4e1   : > { %v1331_v32 = vpop.permute.xlu1 %1330  ;;  %v1370_v5 = vpop.permute.xlu0 %1369 }
 0x4e2   : > { %v1342_v27 = vadd.f32 %v1331_v32, %v1303_v62  ;;  %v1405_v62 = vmul.f32 %v1399_v1, %v3867_v6  ;;  %v943_v6 = vrot.slane %v3536_v14, %v4633_v9 }
 0x4e3   : > { %2596 = vrot.lane.b32.xlu1 %v2588_v34, %s3238_s23  ;;  %2637 = vrot.lane.b32.xlu0 %v2628_v2, %s3239_s25  ;;  %v904_v34 = vrot.slane %v3534_v31, %v4633_v9  ;;  %v4079_v2 = vld [vmem:[#allocation2 + $0x20] sm:$0xff] }
 0x4e4   : > { %v1381_v0 = vadd.f32 %v1370_v5, %v1342_v27 }
 0x4e5   : > { %v1372_v18 = vpop.permute.xlu1 %1371  ;;  %v1436_v10 = vpop.permute.xlu0 %1435  ;;  %v907_v5 = vmul.f32 %v904_v34, %v4071_v4  ;;  %v908_v27 = vmul.f32 %v904_v34, %v4079_v2  ;;  %v1021_v34 = vrot.slane %v3540_v33, %v4633_v9 }
 0x4e6   : > { %v1408_v16 = vadd.f32 %v1404_v40, %v1381_v0  ;;  %v1382_v32 = vadd.f32 %v1372_v18, %v1343_v26  ;;  %v947_v26 = vmul.f32 %v943_v6, %v4079_v2 }
 0x4e7   : > { %2635 = vrot.lane.b32.xlu1 %v2627_v21, %s3239_s25  ;;  %2676 = vrot.lane.b32.xlu0 %v2667_v29, %s3240_s29  ;;  %v946_v21 = vmul.f32 %v943_v6, %v4071_v4  ;;  %v985_v29 = vmul.f32 %v982_v23, %v4071_v4 }
 0x4e8   : > { %v1409_v8 = vadd.f32 %v1405_v62, %v1382_v32  ;;  %v1447_v0 = vadd.f32 %v1436_v10, %v1408_v16  ;;  %v986_v16 = vmul.f32 %v982_v23, %v4079_v2  ;;  %v1025_v10 = vmul.f32 %v1021_v34, %v4079_v2 }
 0x4e9   : > { %v1438_v15 = vpop.permute.xlu1 %1437  ;;  %v1477_v30 = vpop.permute.xlu0 %1476 }
 0x4ea   : > { %v1448_v40 = vadd.f32 %v1438_v15, %v1409_v8 }
 0x4eb   : > { %2674 = vrot.lane.b32.xlu1 %v2666_v45, %s3240_s29  ;;  %917 = vrot.lane.b32.xlu0 %v907_v5, %s3235_s10  ;;  %v1060_v5 = vrot.slane %v3542_v7, %v4633_v9 }
 0x4ec   : > { %v1487_v62 = vadd.f32 %v1477_v30, %v1448_v40  ;;  %v4634_v40 = vld [vmem:[#allocation14_spill] sm:$0xff] }
 0x4ed   : > { %v1475_v31 = vpop.permute.xlu1 %1474  ;;  %v1514_v1 = vpop.permute.xlu0 %1513  ;;  %v1660_v23 = vrot.slane %v4634_v40, %v3437_v61 }
 0x4ee   : > { %v1486_v32 = vadd.f32 %v1475_v31, %v1447_v0 }
 0x4ef   : > { %919 = vrot.lane.b32.xlu1 %v908_v27, %s3235_s10  ;;  %958 = vrot.lane.b32.xlu0 %v947_v26, %s3236_s11  ;;  %v1024_v27 = vmul.f32 %v1021_v34, %v4071_v4  ;;  %v1063_v26 = vmul.f32 %v1060_v5, %v4071_v4 }
 0x4f0   : > { %v1525_v45 = vadd.f32 %v1514_v1, %v1486_v32  ;;  %v1099_v1 = vrot.slane %v3544_v35, %v4633_v9  ;;  %v1165_v35 = vrot.slane %v3548_v37, %v4633_v9 }
 0x4f1   : > { %v1516_v14 = vpop.permute.xlu1 %1515  ;;  %v1555_v18 = vpop.permute.xlu0 %1554 }
 0x4f2   : > { %v1526_v20 = vadd.f32 %v1516_v14, %v1487_v62  ;;  %v1064_v62 = vmul.f32 %v1060_v5, %v4079_v2  ;;  %v1103_v32 = vmul.f32 %v1099_v1, %v4079_v2 }
 0x4f3   : > { %956 = vrot.lane.b32.xlu1 %v946_v21, %s3236_s11  ;;  %995 = vrot.lane.b32.xlu0 %v985_v29, %s3237_s12 }
 0x4f4   : > { %v1565_v33 = vadd.f32 %v1555_v18, %v1526_v20  ;;  %v1666_v18 = vmul.f32 %v1660_v23, %v3907_v25  ;;  %v1665_v20 = vmul.f32 %v1660_v23, %v3899_v22  ;;  %v1204_v22 = vrot.slane %v3550_v38, %v4633_v9 }
 0x4f5   : > { %v1553_v8 = vpop.permute.xlu1 %1552  ;;  %v1592_v15 = vpop.permute.xlu0 %1591 }
 0x4f6   : > { %v1564_v30 = vadd.f32 %v1553_v8, %v1525_v45  ;;  %v1102_v45 = vmul.f32 %v1099_v1, %v4071_v4 }
 0x4f7   : > { %997 = vrot.lane.b32.xlu1 %v986_v16, %s3237_s12  ;;  %1036 = vrot.lane.b32.xlu0 %v1025_v10, %s3238_s23  ;;  %v4115_v16 = vld [vmem:[#allocation2 + $0x21] sm:$0xff] }
 0x4f8   : > { %v1603_v7 = vadd.f32 %v1592_v15, %v1564_v30  ;;  %v1169_v5 = vmul.f32 %v1165_v35, %v4115_v16 }
 0x4f9   : > { %v1594_v6 = vpop.permute.xlu1 %1593  ;;  %v1633_v31 = vpop.permute.xlu0 %1632 }
 0x4fa   : > { %v1604_v0 = vadd.f32 %v1594_v6, %v1565_v33  ;;  %v4123_v33 = vld [vmem:[#allocation2 + $0x19] sm:$0xff] }
 0x4fb   : > { %1034 = vrot.lane.b32.xlu1 %v1024_v27, %s3238_s23  ;;  %1073 = vrot.lane.b32.xlu0 %v1063_v26, %s3239_s25  ;;  %v1168_v6 = vmul.f32 %v1165_v35, %v4123_v33  ;;  %v1243_v27 = vrot.slane %v3553_v41, %v4633_v9 }
 0x4fc   : > { %v1643_v14 = vadd.f32 %v1633_v31, %v1604_v0  ;;  %v1207_v31 = vmul.f32 %v1204_v22, %v4123_v33  ;;  %v1208_v0 = vmul.f32 %v1204_v22, %v4115_v16 }
 0x4fd   : > { %v1631_v21 = vpop.permute.xlu1 %1630  ;;  %v1697_v29 = vpop.permute.xlu0 %1696  ;;  %v1247_v1 = vmul.f32 %v1243_v27, %v4115_v16 }
 0x4fe   : > { %v1642_v34 = vadd.f32 %v1631_v21, %v1603_v7  ;;  %v1670_v8 = vadd.f32 %v1666_v18, %v1643_v14  ;;  %v1282_v14 = vrot.slane %v3555_v42, %v4633_v9 }
 0x4ff   : > { %1075 = vrot.lane.b32.xlu1 %v1064_v62, %s3239_s25  ;;  %1114 = vrot.lane.b32.xlu0 %v1103_v32, %s3240_s29 }
 0x500   : > { %v1669_v25 = vadd.f32 %v1665_v20, %v1642_v34  ;;  %v1285_v32 = vmul.f32 %v1282_v14, %v4123_v33  ;;  %v1321_v20 = vrot.slane %v3557_v43, %v4633_v9  ;;  %v1360_v43 = vrot.slane %v3559_v44, %v4633_v9 }
 0x501   : > { %v1699_v15 = vpop.permute.xlu1 %1698  ;;  %v1736_v10 = vpop.permute.xlu0 %1735  ;;  %v1426_v44 = vrot.slane %v3563_v46, %v4633_v9 }
 0x502   : > { %v1708_v26 = vadd.f32 %v1697_v29, %v1669_v25  ;;  %v1709_v7 = vadd.f32 %v1699_v15, %v1670_v8  ;;  %v1246_v29 = vmul.f32 %v1243_v27, %v4123_v33  ;;  %v1286_v15 = vmul.f32 %v1282_v14, %v4115_v16  ;;  %v4159_v14 = vld [vmem:[#allocation2 + $0x1a] sm:$0xff] }
 0x503   : > { %1112 = vrot.lane.b32.xlu1 %v1102_v45, %s3240_s29  ;;  %1180 = vrot.lane.b32.xlu0 %v1169_v5, %s3235_s10  ;;  %v4635_v45 = vld [vmem:[#allocation25_spill] sm:$0xff] }
 0x504   : > { %v1747_v41 = vadd.f32 %v1736_v10, %v1708_v26  ;;  %v1325_v10 = vmul.f32 %v1321_v20, %v4115_v16  ;;  %v1921_v5 = vrot.slane %v4635_v45, %v3437_v61 }
 0x505   : > { %v1738_v37 = vpop.permute.xlu1 %1737  ;;  %v1775_v30 = vpop.permute.xlu0 %1774 }
 0x506   : > { %v1748_v18 = vadd.f32 %v1738_v37, %v1709_v7  ;;  %v1786_v42 = vadd.f32 %v1775_v30, %v1747_v41  ;;  %v1926_v7 = vmul.f32 %v1921_v5, %v3947_v36  ;;  %v1465_v36 = vrot.slane %v3565_v47, %v4633_v9 }
 0x507   : > { %1178 = vrot.lane.b32.xlu1 %v1168_v6, %s3235_s10  ;;  %1217 = vrot.lane.b32.xlu0 %v1207_v31, %s3236_s11  ;;  %v1927_v31 = vmul.f32 %v1921_v5, %v3939_v39  ;;  %v1543_v5 = vrot.slane %v3569_v49, %v4633_v9 }
 0x508   : > { %v1468_v47 = vmul.f32 %v1465_v36, %v4159_v14 }
 0x509   : > { %v1777_v23 = vpop.permute.xlu1 %1776  ;;  %v1814_v38 = vpop.permute.xlu0 %1813 }
 0x50a   : > { %v1787_v34 = vadd.f32 %v1777_v23, %v1748_v18  ;;  %v1825_v22 = vadd.f32 %v1814_v38, %v1786_v42  ;;  %v1324_v23 = vmul.f32 %v1321_v20, %v4123_v33  ;;  %v1504_v42 = vrot.slane %v3567_v48, %v4633_v9 }
 0x50b   : > { %1219 = vrot.lane.b32.xlu1 %v1208_v0, %s3236_s11  ;;  %1258 = vrot.lane.b32.xlu0 %v1247_v1, %s3237_s12  ;;  %v1363_v0 = vmul.f32 %v1360_v43, %v4123_v33 }
 0x50d   : > { %v1816_v21 = vpop.permute.xlu1 %1815  ;;  %v1853_v62 = vpop.permute.xlu0 %1852 }
 0x50e   : > { %v1826_v8 = vadd.f32 %v1816_v21, %v1787_v34  ;;  %v1864_v30 = vadd.f32 %v1853_v62, %v1825_v22  ;;  %v1364_v21 = vmul.f32 %v1360_v43, %v4115_v16  ;;  %v1429_v62 = vmul.f32 %v1426_v44, %v4159_v14 }
 0x50f   : > { %1256 = vrot.lane.b32.xlu1 %v1246_v29, %s3237_s12  ;;  %1295 = vrot.lane.b32.xlu0 %v1285_v32, %s3238_s23  ;;  %v4167_v29 = vld [vmem:[#allocation2 + $0x22] sm:$0xff] }
 0x510   : > { %v1430_v34 = vmul.f32 %v1426_v44, %v4167_v29  ;;  %v1469_v20 = vmul.f32 %v1465_v36, %v4167_v29  ;;  %v1508_v43 = vmul.f32 %v1504_v42, %v4167_v29 }
 0x511   : > { %v1855_v35 = vpop.permute.xlu1 %1854  ;;  %v1894_v25 = vpop.permute.xlu0 %1893 }
 0x512   : > { %v1865_v37 = vadd.f32 %v1855_v35, %v1826_v8 }
 0x513   : > { %1297 = vrot.lane.b32.xlu1 %v1286_v15, %s3238_s23  ;;  %1336 = vrot.lane.b32.xlu0 %v1325_v10, %s3239_s25 }
 0x514   : > { %v1904_v6 = vadd.f32 %v1894_v25, %v1865_v37  ;;  %v1507_v25 = vmul.f32 %v1504_v42, %v4159_v14 }
 0x515   : > { %v1892_v27 = vpop.permute.xlu1 %1891  ;;  %v1960_v26 = vpop.permute.xlu0 %1959 }
 0x516   : > { %v1903_v1 = vadd.f32 %v1892_v27, %v1864_v30  ;;  %v1931_v38 = vadd.f32 %v1927_v31, %v1904_v6  ;;  %v1547_v30 = vmul.f32 %v1543_v5, %v4167_v29  ;;  %v1582_v27 = vrot.slane %v3571_v50, %v4633_v9 }
 0x517   : > { %1334 = vrot.lane.b32.xlu1 %v1324_v23, %s3239_s25  ;;  %1373 = vrot.lane.b32.xlu0 %v1363_v0, %s3240_s29  ;;  %v1621_v50 = vrot.slane %v3573_v51, %v4633_v9  ;;  %v1687_v51 = vrot.slane %v3577_v53, %v4633_v9 }
 0x518   : > { %v1930_v39 = vadd.f32 %v1926_v7, %v1903_v1  ;;  %v1970_v15 = vadd.f32 %v1960_v26, %v1931_v38  ;;  %v1546_v1 = vmul.f32 %v1543_v5, %v4159_v14  ;;  %v1585_v38 = vmul.f32 %v1582_v27, %v4159_v14  ;;  %v4636_v7 = vld [vmem:[#allocation26_spill] sm:$0xff]  ;;  %v4211_v5 = vld [vmem:[#allocation2 + $0x23] sm:$0xff] }
 0x519   : > { %v1958_v41 = vpop.permute.xlu1 %1957  ;;  %v1999_v18 = vpop.permute.xlu0 %1998  ;;  %v2182_v44 = vrot.slane %v4636_v7, %v3437_v61 }
 0x51a   : > { %v1969_v10 = vadd.f32 %v1958_v41, %v1930_v39  ;;  %v2009_v6 = vadd.f32 %v1999_v18, %v1970_v15  ;;  %v1624_v15 = vmul.f32 %v1621_v50, %v4159_v14 }
 0x51b   : > { %1375 = vrot.lane.b32.xlu1 %v1364_v21, %s3240_s29  ;;  %1439 = vrot.lane.b32.xlu0 %v1429_v62, %s3235_s10  ;;  %v2187_v62 = vmul.f32 %v2182_v44, %v3979_v12 }
 0x51d   : > { %v1997_v46 = vpop.permute.xlu1 %1996  ;;  %v2038_v32 = vpop.permute.xlu0 %2037 }
 0x51e   : > { %v2008_v48 = vadd.f32 %v1997_v46, %v1969_v10  ;;  %v2048_v49 = vadd.f32 %v2038_v32, %v2009_v6  ;;  %v1586_v32 = vmul.f32 %v1582_v27, %v4167_v29 }
 0x51f   : > { %1441 = vrot.lane.b32.xlu1 %v1430_v34, %s3235_s10  ;;  %1480 = vrot.lane.b32.xlu0 %v1469_v20, %s3236_s11  ;;  %v1625_v34 = vmul.f32 %v1621_v50, %v4167_v29 }
 0x521   : > { %v2036_v8 = vpop.permute.xlu1 %2035  ;;  %v2077_v35 = vpop.permute.xlu0 %2076 }
 0x522   : > { %v2047_v31 = vadd.f32 %v2036_v8, %v2008_v48  ;;  %v2087_v39 = vadd.f32 %v2077_v35, %v2048_v49  ;;  %v2188_v8 = vmul.f32 %v2182_v44, %v3989_v11  ;;  %v4203_v35 = vld [vmem:[#allocation2 + $0x1b] sm:$0xff]  ;;  %v1726_v11 = vrot.slane %v3575_v52, %v4633_v9 }
 0x523   : > { %1478 = vrot.lane.b32.xlu1 %v1468_v47, %s3236_s11  ;;  %1517 = vrot.lane.b32.xlu0 %v1507_v25, %s3237_s12  ;;  %v1690_v10 = vmul.f32 %v1687_v51, %v4203_v35 }
 0x524   : > { %v1730_v52 = vmul.f32 %v1726_v11, %v4211_v5 }
 0x525   : > { %v2075_v22 = vpop.permute.xlu1 %2074  ;;  %v2116_v37 = vpop.permute.xlu0 %2115 }
 0x526   : > { %v2086_v26 = vadd.f32 %v2075_v22, %v2047_v31  ;;  %v2126_v18 = vadd.f32 %v2116_v37, %v2087_v39  ;;  %v1691_v22 = vmul.f32 %v1687_v51, %v4211_v5  ;;  %v1729_v37 = vmul.f32 %v1726_v11, %v4203_v35 }
 0x527   : > { %1519 = vrot.lane.b32.xlu1 %v1508_v43, %s3237_s12  ;;  %1558 = vrot.lane.b32.xlu0 %v1547_v30, %s3238_s23  ;;  %v1765_v43 = vrot.slane %v3581_v55, %v4633_v9 }
 0x529   : > { %v2114_v23 = vpop.permute.xlu1 %2113  ;;  %v2153_v0 = vpop.permute.xlu0 %2152  ;;  %v1768_v31 = vmul.f32 %v1765_v43, %v4203_v35 }
 0x52a   : > { %v2125_v41 = vadd.f32 %v2114_v23, %v2086_v26  ;;  %v1804_v26 = vrot.slane %v3579_v54, %v4633_v9 }
 0x52b   : > { %1556 = vrot.lane.b32.xlu1 %v1546_v1, %s3238_s23  ;;  %1595 = vrot.lane.b32.xlu0 %v1585_v38, %s3239_s25  ;;  %v1769_v1 = vmul.f32 %v1765_v43, %v4211_v5 }
 0x52c   : > { %v2164_v21 = vadd.f32 %v2153_v0, %v2125_v41  ;;  %v1807_v38 = vmul.f32 %v1804_v26, %v4203_v35  ;;  %v1843_v41 = vrot.slane %v3585_v57, %v4633_v9  ;;  %v1882_v57 = vrot.slane %v3583_v56, %v4633_v9 }
 0x52d   : > { %v2155_v36 = vpop.permute.xlu1 %2154  ;;  %v2219_v46 = vpop.permute.xlu0 %2218 }
 0x52e   : > { %v2165_v20 = vadd.f32 %v2155_v36, %v2126_v18  ;;  %v2191_v42 = vadd.f32 %v2187_v62, %v2164_v21  ;;  %v1808_v62 = vmul.f32 %v1804_v26, %v4211_v5  ;;  %v1846_v36 = vmul.f32 %v1843_v41, %v4203_v35 }
 0x52f   : > { %1597 = vrot.lane.b32.xlu1 %v1586_v32, %s3239_s25  ;;  %1636 = vrot.lane.b32.xlu0 %v1625_v34, %s3240_s29  ;;  %v1885_v43 = vmul.f32 %v1882_v57, %v4203_v35 }
 0x530   : > { %v2192_v12 = vadd.f32 %v2188_v8, %v2165_v20  ;;  %v2230_v27 = vadd.f32 %v2219_v46, %v2191_v42  ;;  %v4637_v46 = vld [vmem:[#allocation27_spill] sm:$0xff] }
 0x531   : > { %v2221_v47 = vpop.permute.xlu1 %2220  ;;  %v2258_v25 = vpop.permute.xlu0 %2257  ;;  %v2443_v32 = vrot.slane %v4637_v46, %v3437_v61 }
 0x532   : > { %v2231_v49 = vadd.f32 %v2221_v47, %v2192_v12  ;;  %v2269_v44 = vadd.f32 %v2258_v25, %v2230_v27  ;;  %v1847_v25 = vmul.f32 %v1843_v41, %v4211_v5 }
 0x533   : > { %1634 = vrot.lane.b32.xlu1 %v1624_v15, %s3240_s29  ;;  %1700 = vrot.lane.b32.xlu0 %v1690_v10, %s3235_s10  ;;  %v2449_v51 = vmul.f32 %v2443_v32, %v4027_v13  ;;  %v1886_v15 = vmul.f32 %v1882_v57, %v4211_v5  ;;  %v2448_v56 = vmul.f32 %v2443_v32, %v4035_v24  ;;  %v4265_v24 = vld [vmem:[#allocation2 + $0x1c] sm:$0xff] }
 0x535   : > { %v2260_v53 = vpop.permute.xlu1 %2259  ;;  %v2297_v48 = vpop.permute.xlu0 %2296 }
 0x536   : > { %v2270_v55 = vadd.f32 %v2260_v53, %v2231_v49  ;;  %v2308_v54 = vadd.f32 %v2297_v48, %v2269_v44  ;;  %v4251_v53 = vld [vmem:[#allocation2 + $0x24] sm:$0xff]  ;;  %v1948_v48 = vrot.slane %v3587_v58, %v4633_v9  ;;  %v2026_v49 = vrot.slane %v3591_v60, %v4633_v9 }
 0x537   : > { %1702 = vrot.lane.b32.xlu1 %v1691_v22, %s3235_s10  ;;  %1739 = vrot.lane.b32.xlu0 %v1729_v37, %s3236_s11 }
 0x539   : > { %v2299_v30 = vpop.permute.xlu1 %2298  ;;  %v2336_v6 = vpop.permute.xlu0 %2335 }
 0x53a   : > { %v2309_v39 = vadd.f32 %v2299_v30, %v2270_v55  ;;  %v2347_v34 = vadd.f32 %v2336_v6, %v2308_v54  ;;  %v1952_v30 = vmul.f32 %v1948_v48, %v4251_v53  ;;  %v1987_v6 = vrot.slane %v3589_v59, %v4633_v9 }
 0x53b   : > { %1741 = vrot.lane.b32.xlu1 %v1730_v52, %s3236_s11  ;;  %1778 = vrot.lane.b32.xlu0 %v1768_v31, %s3237_s12  ;;  %v1951_v31 = vmul.f32 %v1948_v48, %v4265_v24 }
 0x53c   : > { %v1991_v27 = vmul.f32 %v1987_v6, %v4251_v53  ;;  %v1990_v55 = vmul.f32 %v1987_v6, %v4265_v24 }
 0x53d   : > { %v2338_v23 = vpop.permute.xlu1 %2337  ;;  %v2375_v0 = vpop.permute.xlu0 %2374 }
 0x53e   : > { %v2348_v50 = vadd.f32 %v2338_v23, %v2309_v39  ;;  %v2386_v42 = vadd.f32 %v2375_v0, %v2347_v34  ;;  %v2030_v23 = vmul.f32 %v2026_v49, %v4251_v53  ;;  %v2065_v0 = vrot.slane %v3593_v63, %v4633_v9 }
 0x53f   : > { %1780 = vrot.lane.b32.xlu1 %v1769_v1, %s3237_s12  ;;  %1817 = vrot.lane.b32.xlu0 %v1807_v38, %s3238_s23  ;;  %v2029_v38 = vmul.f32 %v2026_v49, %v4265_v24  ;;  %v2104_v39 = vrot.slane %v3595_v3, %v4633_v9 }
 0x540   : > { %v2069_v44 = vmul.f32 %v2065_v0, %v4251_v53  ;;  %v2068_v54 = vmul.f32 %v2065_v0, %v4265_v24  ;;  %v2287_v0 = vrot.slane %v3605_v17, %v4633_v9 }
 0x541   : > { %v2377_v18 = vpop.permute.xlu1 %2376  ;;  %v2416_v21 = vpop.permute.xlu0 %2415 }
 0x542   : > { %v2387_v20 = vadd.f32 %v2377_v18, %v2348_v50  ;;  %v2108_v50 = vmul.f32 %v2104_v39, %v4251_v53  ;;  %v4638_v18 = vld [vmem:[#allocation10_spill] sm:$0xff] }
 0x543   : > { %1819 = vrot.lane.b32.xlu1 %v1808_v62, %s3238_s23  ;;  %1856 = vrot.lane.b32.xlu0 %v1846_v36, %s3239_s25  ;;  %v4639_v62 = vld [vmem:[#allocation13_spill] sm:$0xff] }
 0x544   : > { %v2426_v8 = vadd.f32 %v2416_v21, %v2387_v20  ;;  %v881_v21 = vrot.slane %v4638_v18, %v4633_v9  ;;  %v2143_v36 = vrot.slane %v4639_v62, %v4633_v9  ;;  %v2107_v20 = vmul.f32 %v2104_v39, %v4265_v24 }
 0x545   : > { %v2414_v12 = vpop.permute.xlu1 %2413  ;;  %v4244_v47 = vpop.permute.xlu0 %2481 }
 0x546   : > { %v2425_v10 = vadd.f32 %v2414_v12, %v2386_v42  ;;  %v4248_v11 = vadd.f32 %v2449_v51, %v2426_v8  ;;  %v884_v3 = vmul.f32 %v881_v21, %v4071_v4  ;;  %v2146_v57 = vmul.f32 %v2143_v36, %v4265_v24  ;;  %v4318_v8 = vld [vmem:[#allocation2 + $0x1d] sm:$0xff] }
 0x547   : > { %1858 = vrot.lane.b32.xlu1 %v1847_v25, %s3239_s25  ;;  %1897 = vrot.lane.b32.xlu0 %v1886_v15, %s3240_s29  ;;  %v4640_v51 = vld [vmem:[#allocation15_spill] sm:$0xff]  ;;  %v885_v25 = vmul.f32 %v881_v21, %v4079_v2  ;;  %v2326_v21 = vrot.slane %v3607_v19, %v4633_v9 }
 0x548   : > { %v4257_v13 = vadd.f32 %v2448_v56, %v2425_v10  ;;  %v2209_v12 = vrot.slane %v4640_v51, %v4633_v9  ;;  %v2147_v10 = vmul.f32 %v2143_v36, %v4251_v53 }
 0x549   : > { %v4259_v22 = vpop.permute.xlu1 %2479  ;;  %v4261_v37 = vpop.permute.xlu0 %2520 }
 0x54a   : > { %v2212_v56 = vmul.f32 %v2209_v12, %v4318_v8 }
 0x54b   : > { %1895 = vrot.lane.b32.xlu1 %v1885_v43, %s3240_s29  ;;  %1963 = vrot.lane.b32.xlu0 %v1952_v30, %s3235_s10  ;;  %v4327_v43 = vld [vmem:[#allocation2 + $0x25] sm:$0xff] }
 0x54c   : > { %v4641_v30 = vld [vmem:[#allocation16_spill] sm:$0xff]  ;;  %v2213_v2 = vmul.f32 %v2209_v12, %v4327_v43 }
 0x54d   : > { %v4271_v58 = vpop.permute.xlu1 %2518  ;;  %v4273_v52 = vpop.permute.xlu0 %2559  ;;  %v2248_v6 = vrot.slane %v4641_v30, %v4633_v9 }
 0x54f   : > { %1961 = vrot.lane.b32.xlu1 %v1951_v31, %s3235_s10  ;;  %2002 = vrot.lane.b32.xlu0 %v1991_v27, %s3236_s11 }
 0x551   : > { %v4281_v59 = vpop.permute.xlu1 %2557  ;;  %v4283_v26 = vpop.permute.xlu0 %2598 }
 0x553   : > { %2000 = vrot.lane.b32.xlu1 %v1990_v55, %s3236_s11  ;;  %2041 = vrot.lane.b32.xlu0 %v2030_v23, %s3237_s12  ;;  %v2251_v55 = vmul.f32 %v2248_v6, %v4318_v8 }
 0x555   : > { %v4291_v60 = vpop.permute.xlu1 %2596  ;;  %v4293_v1 = vpop.permute.xlu0 %2637 }
 0x557   : > { %2039 = vrot.lane.b32.xlu1 %v2029_v38, %s3237_s12  ;;  %2080 = vrot.lane.b32.xlu0 %v2069_v44, %s3238_s23 }
 0x559   : > { %v4301_v63 = vpop.permute.xlu1 %2635  ;;  %v4303_v41 = vpop.permute.xlu0 %2676 }
 0x55b   : > { %2078 = vrot.lane.b32.xlu1 %v2068_v54, %s3238_s23  ;;  %2119 = vrot.lane.b32.xlu0 %v2108_v50, %s3239_s25  ;;  %v2252_v54 = vmul.f32 %v2248_v6, %v4327_v43  ;;  %v2290_v50 = vmul.f32 %v2287_v0, %v4318_v8 }
 0x55d   : > { %v4314_v32 = vpop.permute.xlu1 %2674  ;;  %v918_v34 = vpop.permute.xlu0 %917 }
 0x55e   : > { %v927_v42 = vadd.f32 %v918_v34, %v884_v3  ;;  %v2291_v3 = vmul.f32 %v2287_v0, %v4327_v43  ;;  %v2329_v34 = vmul.f32 %v2326_v21, %v4318_v8 }
 0x55f   : > { %2117 = vrot.lane.b32.xlu1 %v2107_v20, %s3239_s25  ;;  %2156 = vrot.lane.b32.xlu0 %v2146_v57, %s3240_s29  ;;  %v4642_v57 = vld [vmem:[#allocation17_spill] sm:$0xff] }
 0x561   : > { %v920_v4 = vpop.permute.xlu1 %919  ;;  %v959_v15 = vpop.permute.xlu0 %958 }
 0x562   : > { %v928_v48 = vadd.f32 %v920_v4, %v885_v25  ;;  %v2330_v25 = vmul.f32 %v2326_v21, %v4327_v43 }
 0x563   : > { %2158 = vrot.lane.b32.xlu1 %v2147_v10, %s3240_s29  ;;  %2222 = vrot.lane.b32.xlu0 %v2212_v56, %s3235_s10 }
 0x564   : > { %v967_v31 = vadd.f32 %v959_v15, %v928_v48  ;;  %v4643_v15 = vld [vmem:[#allocation11_spill] sm:$0xff]  ;;  %v4644_v48 = vld [vmem:[#allocation18_spill] sm:$0xff] }
 0x565   : > { %v957_v27 = vpop.permute.xlu1 %956  ;;  %v996_v49 = vpop.permute.xlu0 %995  ;;  %v1142_v10 = vrot.slane %v4643_v15, %v4633_v9  ;;  %v2404_v30 = vrot.slane %v4644_v48, %v4633_v9 }
 0x566   : > { %v966_v23 = vadd.f32 %v957_v27, %v927_v42  ;;  %v2365_v42 = vrot.slane %v4642_v57, %v4633_v9 }
 0x567   : > { %2224 = vrot.lane.b32.xlu1 %v2213_v2, %s3235_s10  ;;  %2261 = vrot.lane.b32.xlu0 %v2251_v55, %s3236_s11  ;;  %v1146_v6 = vmul.f32 %v1142_v10, %v4115_v16  ;;  %v2408_v55 = vmul.f32 %v2404_v30, %v4327_v43  ;;  %v1145_v0 = vmul.f32 %v1142_v10, %v4123_v33  ;;  %v4646_v33 = vld [vmem:[#allocation19_spill] sm:$0xff] }
 0x568   : > { %v1005_v38 = vadd.f32 %v996_v49, %v966_v23  ;;  %v2368_v4 = vmul.f32 %v2365_v42, %v4318_v8  ;;  %v2369_v2 = vmul.f32 %v2365_v42, %v4327_v43  ;;  %v2407_v21 = vmul.f32 %v2404_v30, %v4318_v8 }
 0x569   : > { %v998_v44 = vpop.permute.xlu1 %997  ;;  %v1037_v39 = vpop.permute.xlu0 %1036  ;;  %v2587_v30 = vrot.slane %v4629_v28, %v4633_v9 }
 0x56a   : > { %v1006_v18 = vadd.f32 %v998_v44, %v967_v31  ;;  %v4363_v44 = vld [vmem:[#allocation2 + $0x26] sm:$0xff] }
 0x56b   : > { %2263 = vrot.lane.b32.xlu1 %v2252_v54, %s3236_s11  ;;  %2300 = vrot.lane.b32.xlu0 %v2290_v50, %s3237_s12 }
 0x56c   : > { %v1045_v17 = vadd.f32 %v1037_v39, %v1006_v18  ;;  %v4645_v39 = vld [vmem:[#allocation20_spill] sm:$0xff] }
 0x56d   : > { %v1035_v62 = vpop.permute.xlu1 %1034  ;;  %v1074_v36 = vpop.permute.xlu0 %1073  ;;  %v2470_v54 = vrot.slane %v4645_v39, %v4633_v9 }
 0x56e   : > { %v1044_v20 = vadd.f32 %v1035_v62, %v1005_v38  ;;  %v4371_v62 = vld [vmem:[#allocation2 + $0x1e] sm:$0xff] }
 0x56f   : > { %2302 = vrot.lane.b32.xlu1 %v2291_v3, %s3237_s12  ;;  %2339 = vrot.lane.b32.xlu0 %v2329_v34, %s3238_s23 }
 0x570   : > { %v1083_v19 = vadd.f32 %v1074_v36, %v1044_v20  ;;  %v2509_v36 = vrot.slane %v4646_v33, %v4633_v9  ;;  %v2473_v20 = vmul.f32 %v2470_v54, %v4371_v62  ;;  %v4650_v33 = vld [vmem:[#allocation23_spill] sm:$0xff] }
 0x571   : > { %v1076_v51 = vpop.permute.xlu1 %1075  ;;  %v1115_v12 = vpop.permute.xlu0 %1114 }
 0x572   : > { %v1084_v56 = vadd.f32 %v1076_v51, %v1045_v17  ;;  %v2474_v17 = vmul.f32 %v2470_v54, %v4363_v44  ;;  %v2513_v57 = vmul.f32 %v2509_v36, %v4363_v44  ;;  %v2512_v15 = vmul.f32 %v2509_v36, %v4371_v62 }
 0x573   : > { %2341 = vrot.lane.b32.xlu1 %v2330_v25, %s3238_s23  ;;  %2378 = vrot.lane.b32.xlu0 %v2368_v4, %s3239_s25  ;;  %v2665_v36 = vrot.slane %v4650_v33, %v4633_v9 }
 0x574   : > { %v1123_v31 = vadd.f32 %v1115_v12, %v1084_v56 }
 0x575   : > { %v1113_v27 = vpop.permute.xlu1 %1112  ;;  %v1181_v49 = vpop.permute.xlu0 %1180 }
 0x576   : > { %v1150_v23 = vadd.f32 %v1146_v6, %v1123_v31  ;;  %v1122_v38 = vadd.f32 %v1113_v27, %v1083_v19  ;;  %v4647_v19 = vld [vmem:[#allocation22_spill] sm:$0xff] }
 0x577   : > { %2380 = vrot.lane.b32.xlu1 %v2369_v2, %s3239_s25  ;;  %2419 = vrot.lane.b32.xlu0 %v2408_v55, %s3240_s29  ;;  %v2548_v51 = vrot.slane %v4647_v19, %v4633_v9  ;;  %v2591_v2 = vmul.f32 %v2587_v30, %v4363_v44 }
 0x578   : > { %v1149_v16 = vadd.f32 %v1145_v0, %v1122_v38  ;;  %v1189_v12 = vadd.f32 %v1181_v49, %v1150_v23  ;;  %v4648_v23 = vld [vmem:[#allocation24_spill] sm:$0xff] }
 0x579   : > { %v1179_v50 = vpop.permute.xlu1 %1178  ;;  %v1218_v18 = vpop.permute.xlu0 %1217  ;;  %v2552_v10 = vmul.f32 %v2548_v51, %v4363_v44  ;;  %v2551_v49 = vmul.f32 %v2548_v51, %v4371_v62  ;;  %v2626_v0 = vrot.slane %v4648_v23, %v4633_v9  ;;  %v2669_v51 = vmul.f32 %v2665_v36, %v4363_v44 }
 0x57a   : > { %v1188_v42 = vadd.f32 %v1179_v50, %v1149_v16  ;;  %v2590_v16 = vmul.f32 %v2587_v30, %v4371_v62 }
 0x57b   : > { %2417 = vrot.lane.b32.xlu1 %v2407_v21, %s3240_s29  ;;  %2485 = vrot.lane.b32.xlu0 %v2474_v17, %s3235_s10  ;;  %v2630_v50 = vmul.f32 %v2626_v0, %v4363_v44  ;;  %v2629_v19 = vmul.f32 %v2626_v0, %v4371_v62 }
 0x57c   : > { %v1227_v56 = vadd.f32 %v1218_v18, %v1188_v42  ;;  %v4649_v18 = vld [vmem:[#allocation12_spill] sm:$0xff] }
 0x57d   : > { %v1220_v3 = vpop.permute.xlu1 %1219  ;;  %v1259_v34 = vpop.permute.xlu0 %1258  ;;  %v1403_v21 = vrot.slane %v4649_v18, %v4633_v9 }
 0x57e   : > { %v1228_v48 = vadd.f32 %v1220_v3, %v1189_v12 }
 0x57f   : > { %2483 = vrot.lane.b32.xlu1 %v2473_v20, %s3235_s10  ;;  %2524 = vrot.lane.b32.xlu0 %v2513_v57, %s3236_s11 }
 0x580   : > { %v1267_v55 = vadd.f32 %v1259_v34, %v1228_v48  ;;  %v1406_v34 = vmul.f32 %v1403_v21, %v4159_v14  ;;  %v2668_v14 = vmul.f32 %v2665_v36, %v4371_v62 }
 0x581   : > { %v1257_v25 = vpop.permute.xlu1 %1256  ;;  %v1296_v4 = vpop.permute.xlu0 %1295 }
 0x582   : > { %v1266_v6 = vadd.f32 %v1257_v25, %v1227_v56  ;;  %v1407_v25 = vmul.f32 %v1403_v21, %v4167_v29 }
 0x583   : > { %2522 = vrot.lane.b32.xlu1 %v2512_v15, %s3236_s11  ;;  %2563 = vrot.lane.b32.xlu0 %v2552_v10, %s3237_s12 }
 0x584   : > { %v1305_v28 = vadd.f32 %v1296_v4, %v1266_v6 }
 0x585   : > { %v1298_v31 = vpop.permute.xlu1 %1297  ;;  %v1337_v27 = vpop.permute.xlu0 %1336 }
 0x586   : > { %v1306_v38 = vadd.f32 %v1298_v31, %v1267_v55 }
 0x587   : > { %2561 = vrot.lane.b32.xlu1 %v2551_v49, %s3237_s12  ;;  %2602 = vrot.lane.b32.xlu0 %v2591_v2, %s3238_s23 }
 0x588   : > { %v1345_v3 = vadd.f32 %v1337_v27, %v1306_v38 }
 0x589   : > { %v1335_v39 = vpop.permute.xlu1 %1334  ;;  %v1374_v54 = vpop.permute.xlu0 %1373 }
 0x58a   : > { %v1344_v17 = vadd.f32 %v1335_v39, %v1305_v28 }
 0x58b   : > { %2600 = vrot.lane.b32.xlu1 %v2590_v16, %s3238_s23  ;;  %2641 = vrot.lane.b32.xlu0 %v2630_v50, %s3239_s25  ;;  %v1664_v50 = vrot.slane %v4634_v40, %v4633_v9 }
 0x58c   : > { %v1383_v20 = vadd.f32 %v1374_v54, %v1344_v17 }
 0x58d   : > { %v1376_v57 = vpop.permute.xlu1 %1375  ;;  %v1440_v42 = vpop.permute.xlu0 %1439  ;;  %v1668_v33 = vmul.f32 %v1664_v50, %v4211_v5 }
 0x58e   : > { %v1410_v12 = vadd.f32 %v1406_v34, %v1383_v20  ;;  %v1384_v4 = vadd.f32 %v1376_v57, %v1345_v3  ;;  %v1667_v20 = vmul.f32 %v1664_v50, %v4203_v35  ;;  %v1925_v35 = vrot.slane %v4635_v45, %v4633_v9 }
 0x58f   : > { %2639 = vrot.lane.b32.xlu1 %v2629_v19, %s3239_s25  ;;  %2680 = vrot.lane.b32.xlu0 %v2669_v51, %s3240_s29 }
 0x590   : > { %v1411_v15 = vadd.f32 %v1407_v25, %v1384_v4  ;;  %v1449_v31 = vadd.f32 %v1440_v42, %v1410_v12 }
 0x591   : > { %v1442_v10 = vpop.permute.xlu1 %1441  ;;  %v1481_v56 = vpop.permute.xlu0 %1480 }
 0x592   : > { %v1450_v6 = vadd.f32 %v1442_v10, %v1411_v15 }
 0x593   : > { %2678 = vrot.lane.b32.xlu1 %v2668_v14, %s3240_s29 }
 0x594   : > { %v1489_v2 = vadd.f32 %v1481_v56, %v1450_v6 }
 0x595   : > { %v1479_v48 = vpop.permute.xlu1 %1478  ;;  %v1518_v30 = vpop.permute.xlu0 %1517 }
 0x596   : > { %v1488_v29 = vadd.f32 %v1479_v48, %v1449_v31 }
 0x598   : > { %v1527_v28 = vadd.f32 %v1518_v30, %v1488_v29 }
 0x599   : > { %v1520_v27 = vpop.permute.xlu1 %1519  ;;  %v1559_v49 = vpop.permute.xlu0 %1558 }
 0x59a   : > { %v1528_v55 = vadd.f32 %v1520_v27, %v1489_v2 }
 0x59c   : > { %v1567_v38 = vadd.f32 %v1559_v49, %v1528_v55 }
 0x59d   : > { %v1557_v23 = vpop.permute.xlu1 %1556  ;;  %v1596_v0 = vpop.permute.xlu0 %1595 }
 0x59e   : > { %v1566_v39 = vadd.f32 %v1557_v23, %v1527_v28 }
 0x5a0   : > { %v1605_v21 = vadd.f32 %v1596_v0, %v1566_v39  ;;  %v1929_v0 = vmul.f32 %v1925_v35, %v4251_v53 }
 0x5a1   : > { %v1598_v54 = vpop.permute.xlu1 %1597  ;;  %v1637_v16 = vpop.permute.xlu0 %1636 }
 0x5a2   : > { %v1606_v18 = vadd.f32 %v1598_v54, %v1567_v38 }
 0x5a4   : > { %v1645_v17 = vadd.f32 %v1637_v16, %v1606_v18  ;;  %v1928_v16 = vmul.f32 %v1925_v35, %v4265_v24  ;;  %v2186_v24 = vrot.slane %v4636_v7, %v4633_v9 }
 0x5a5   : > { %v1635_v36 = vpop.permute.xlu1 %1634  ;;  %v1701_v3 = vpop.permute.xlu0 %1700 }
 0x5a6   : > { %v1644_v34 = vadd.f32 %v1635_v36, %v1605_v21  ;;  %v1672_v57 = vadd.f32 %v1668_v33, %v1645_v17 }
 0x5a8   : > { %v1671_v42 = vadd.f32 %v1667_v20, %v1644_v34 }
 0x5a9   : > { %v1703_v19 = vpop.permute.xlu1 %1702  ;;  %v1740_v51 = vpop.permute.xlu0 %1739 }
 0x5aa   : > { %v1710_v4 = vadd.f32 %v1701_v3, %v1671_v42  ;;  %v1711_v40 = vadd.f32 %v1703_v19, %v1672_v57 }
 0x5ac   : > { %v1749_v56 = vadd.f32 %v1740_v51, %v1710_v4 }
 0x5ad   : > { %v1742_v12 = vpop.permute.xlu1 %1741  ;;  %v1779_v25 = vpop.permute.xlu0 %1778 }
 0x5ae   : > { %v1750_v14 = vadd.f32 %v1742_v12, %v1711_v40  ;;  %v1788_v6 = vadd.f32 %v1779_v25, %v1749_v56 }
 0x5b1   : > { %v1781_v15 = vpop.permute.xlu1 %1780  ;;  %v1818_v10 = vpop.permute.xlu0 %1817 }
 0x5b2   : > { %v1789_v5 = vadd.f32 %v1781_v15, %v1750_v14  ;;  %v1827_v2 = vadd.f32 %v1818_v10, %v1788_v6  ;;  %v2189_v14 = vmul.f32 %v2186_v24, %v4318_v8 }
 0x5b5   : > { %v1820_v48 = vpop.permute.xlu1 %1819  ;;  %v1857_v30 = vpop.permute.xlu0 %1856 }
 0x5b6   : > { %v1828_v31 = vadd.f32 %v1820_v48, %v1789_v5  ;;  %v1866_v55 = vadd.f32 %v1857_v30, %v1827_v2 }
 0x5b9   : > { %v1859_v27 = vpop.permute.xlu1 %1858  ;;  %v1898_v49 = vpop.permute.xlu0 %1897 }
 0x5ba   : > { %v1867_v29 = vadd.f32 %v1859_v27, %v1828_v31  ;;  %v2190_v31 = vmul.f32 %v2186_v24, %v4327_v43  ;;  %v2447_v43 = vrot.slane %v4637_v46, %v4633_v9  ;;  %v2492_v9 = vadd.f32 %v4244_v47, %v4248_v11 }
 0x5bc   : > { %v1906_v23 = vadd.f32 %v1898_v49, %v1867_v29 }
 0x5bd   : > { %v1896_v28 = vpop.permute.xlu1 %1895  ;;  %v1964_v38 = vpop.permute.xlu0 %1963 }
 0x5be   : > { %v1905_v39 = vadd.f32 %v1896_v28, %v1866_v55  ;;  %v1933_v54 = vadd.f32 %v1929_v0, %v1906_v23 }
 0x5c0   : > { %v1932_v50 = vadd.f32 %v1928_v16, %v1905_v39  ;;  %v1972_v45 = vadd.f32 %v1964_v38, %v1933_v54 }
 0x5c1   : > { %v1962_v18 = vpop.permute.xlu1 %1961  ;;  %v2003_v21 = vpop.permute.xlu0 %2002 }
 0x5c2   : > { %v1971_v34 = vadd.f32 %v1962_v18, %v1932_v50  ;;  %v2011_v19 = vadd.f32 %v2003_v21, %v1972_v45  ;;  %v2451_v45 = vmul.f32 %v2447_v43, %v4363_v44 }
 0x5c5   : > { %v2001_v17 = vpop.permute.xlu1 %2000  ;;  %v2042_v33 = vpop.permute.xlu0 %2041 }
 0x5c6   : > { %v2010_v20 = vadd.f32 %v2001_v17, %v1971_v34  ;;  %v2050_v51 = vadd.f32 %v2042_v33, %v2011_v19  ;;  %v2450_v19 = vmul.f32 %v2447_v43, %v4371_v62 }
 0x5c9   : > { %v2040_v36 = vpop.permute.xlu1 %2039  ;;  %v2081_v3 = vpop.permute.xlu0 %2080 }
 0x5ca   : > { %v2049_v53 = vadd.f32 %v2040_v36, %v2010_v20  ;;  %v2089_v15 = vadd.f32 %v2081_v3, %v2050_v51 }
 0x5cd   : > { %v2079_v57 = vpop.permute.xlu1 %2078  ;;  %v2120_v42 = vpop.permute.xlu0 %2119 }
 0x5ce   : > { %v2088_v12 = vadd.f32 %v2079_v57, %v2049_v53  ;;  %v2128_v40 = vadd.f32 %v2120_v42, %v2089_v15 }
 0x5d1   : > { %v2118_v25 = vpop.permute.xlu1 %2117  ;;  %v2157_v4 = vpop.permute.xlu0 %2156 }
 0x5d2   : > { %v2127_v10 = vadd.f32 %v2118_v25, %v2088_v12 }
 0x5d4   : > { %v2166_v56 = vadd.f32 %v2157_v4, %v2127_v10  ;;  %v2531_v10 = vadd.f32 %v4261_v37, %v2492_v9 }
 0x5d5   : > { %v2159_v48 = vpop.permute.xlu1 %2158  ;;  %v2223_v30 = vpop.permute.xlu0 %2222 }
 0x5d6   : > { %v2167_v5 = vadd.f32 %v2159_v48, %v2128_v40  ;;  %v2193_v6 = vadd.f32 %v2189_v14, %v2166_v56  ;;  %v2491_v40 = vadd.f32 %v4259_v22, %v4257_v13  ;;  %v2570_v56 = vadd.f32 %v4273_v52, %v2531_v10 }
 0x5d8   : > { %v2194_v27 = vadd.f32 %v2190_v31, %v2167_v5  ;;  %v2232_v7 = vadd.f32 %v2223_v30, %v2193_v6  ;;  %v2530_v5 = vadd.f32 %v4271_v58, %v2491_v40  ;;  %v2609_v6 = vadd.f32 %v4283_v26, %v2570_v56 }
 0x5d9   : > { %v2225_v49 = vpop.permute.xlu1 %2224  ;;  %v2262_v35 = vpop.permute.xlu0 %2261 }
 0x5da   : > { %v2233_v0 = vadd.f32 %v2225_v49, %v2194_v27  ;;  %v2271_v54 = vadd.f32 %v2262_v35, %v2232_v7  ;;  %v2569_v31 = vadd.f32 %v4281_v59, %v2530_v5  ;;  %v2648_v37 = vadd.f32 %v4293_v1, %v2609_v6 }
 0x5dc   : > { %v2608_v22 = vadd.f32 %v4291_v60, %v2569_v31  ;;  %v2687_v52 = vadd.f32 %v4303_v41, %v2648_v37 }
 0x5dd   : > { %v2264_v2 = vpop.permute.xlu1 %2263  ;;  %v2301_v29 = vpop.permute.xlu0 %2300 }
 0x5de   : > { %v2272_v28 = vadd.f32 %v2264_v2, %v2233_v0  ;;  %v2310_v16 = vadd.f32 %v2301_v29, %v2271_v54  ;;  %v2647_v58 = vadd.f32 %v4301_v63, %v2608_v22 }
 0x5e0   : > { %v2686_v7 = vadd.f32 %v4314_v32, %v2647_v58 }
 0x5e1   : > { %v2303_v55 = vpop.permute.xlu1 %2302  ;;  %v2340_v23 = vpop.permute.xlu0 %2339 }
 0x5e2   : > { %v2311_v8 = vadd.f32 %v2303_v55, %v2272_v28  ;;  %v2349_v17 = vadd.f32 %v2340_v23, %v2310_v16  ;;  %v4652_v16 = vld [vmem:[#allocation37_spill] sm:$0xff] }
 0x5e5   : > { %v2342_v38 = vpop.permute.xlu1 %2341  ;;  %v2379_v39 = vpop.permute.xlu0 %2378 }
 0x5e6   : > { %v2350_v50 = vadd.f32 %v2342_v38, %v2311_v8  ;;  %v2388_v36 = vadd.f32 %v2379_v39, %v2349_v17  ;;  %v4651_v8 = vld [vmem:[#allocation36_spill] sm:$0xff] }
 0x5e9   : > { %v2381_v18 = vpop.permute.xlu1 %2380  ;;  %v2420_v21 = vpop.permute.xlu0 %2419 }
 0x5ea   : > { %v2389_v33 = vadd.f32 %v2381_v18, %v2350_v50 }
 0x5ec   : > { %v2428_v3 = vadd.f32 %v2420_v21, %v2389_v33  ;;  %v4653_v21 = vmov 0.0  }
 0x5ed   : > { %v2418_v34 = vpop.permute.xlu1 %2417  ;;  %v2486_v20 = vpop.permute.xlu0 %2485 }
 0x5ee   : > { %v2427_v57 = vadd.f32 %v2418_v34, %v2388_v36  ;;  %v2455_v42 = vadd.f32 %v2451_v45, %v2428_v3 }
 0x5f0   : > { %v2454_v53 = vadd.f32 %v2450_v19, %v2427_v57  ;;  %v2494_v46 = vadd.f32 %v2486_v20, %v2455_v42 }
 0x5f1   : > { %v2484_v51 = vpop.permute.xlu1 %2483  ;;  %v2525_v12 = vpop.permute.xlu0 %2524 }
 0x5f2   : > { %v2533_v44 = vadd.f32 %v2525_v12, %v2494_v46  ;;  %v2493_v62 = vadd.f32 %v2484_v51, %v2454_v53 }
 0x5f5   : > { %v2523_v25 = vpop.permute.xlu1 %2522  ;;  %v2564_v4 = vpop.permute.xlu0 %2563 }
 0x5f6   : > { %v2572_v14 = vadd.f32 %v2564_v4, %v2533_v44  ;;  %v2532_v47 = vadd.f32 %v2523_v25, %v2493_v62 }
 0x5f9   : > { %v2562_v24 = vpop.permute.xlu1 %2561  ;;  %v2603_v15 = vpop.permute.xlu0 %2602 }
 0x5fa   : > { %v2611_v11 = vadd.f32 %v2603_v15, %v2572_v14  ;;  %v2571_v27 = vadd.f32 %v2562_v24, %v2532_v47 }
 0x5fd   : > { %v2601_v48 = vpop.permute.xlu1 %2600  ;;  %v2642_v30 = vpop.permute.xlu0 %2641 }
 0x5fe   : > { %v2650_v49 = vadd.f32 %v2642_v30, %v2611_v11  ;;  %v2610_v2 = vadd.f32 %v2601_v48, %v2571_v27 }
 0x601   : > { %v2640_v35 = vpop.permute.xlu1 %2639  ;;  %v2681_v13 = vpop.permute.xlu0 %2680 }
 0x602   : > { %v2689_v29 = vadd.f32 %v2681_v13, %v2650_v49  ;;  %v2649_v55 = vadd.f32 %v2640_v35, %v2610_v2 }
 0x604   : > { %v2691_v26 = vadd.f32 %v2689_v29, %v2687_v52 }
 0x605   : > { %v2679_v23 = vpop.permute.xlu1 %2678 }
 0x606   : > { %v3004_v59 = vmul.f32 -1.442695, %v2691_v26  ;;  %v2688_v0 = vadd.f32 %v2679_v23, %v2649_v55 }
 0x608   : > { %3113 = vpow2.f32 %v3004_v59  ;;  %v2690_v1 = vadd.f32 %v2688_v0, %v2686_v7 }
 0x60a   : > { %v3003_v28 = vmul.f32 -1.442695, %v2690_v1 }
 0x60c   : > { %3115 = vpow2.f32 %v3003_v28  ;;  %v4654_v28 = vld [vmem:[#allocation31_spill] sm:$0xff] }
 0x612   : > { %v3114_v38 = vpop.eup %3113 }
 0x613   : > { %v2699_v39 = vadd.f32 1.0, %v3114_v38 }
 0x615   : > { %3117 = vrcp.f32 %v2699_v39  ;;  %v4655_v39 = vld [vmem:[#allocation33_spill] sm:$0xff] }
 0x616   : > { %v3116_v60 = vpop.eup %3115 }
 0x617   : > { %v2698_v41 = vadd.f32 1.0, %v3116_v60 }
 0x619   : > { %3119 = vrcp.f32 %v2698_v41  ;;  %v4656_v41 = vld [vmem:[#allocation29_spill] sm:$0xff] }
 0x61f   : > { %v3118_v54 = vpop.eup %3117 }
 0x620   : > { %v2760_v63 = vrot.slane %v3118_v54, %v4651_v8  ;;  %v2753_v32 = vcombine.high %v3118_v54, %v4653_v21 }
 0x622   : > { %v2775_v50 = vrot.slane %v2760_v63, %v4652_v16  ;;  %v2768_v33 = vcombine.high %v2760_v63, %v4653_v21  ;;  %v2767_v3 = vrot.slane %v2753_v32, %v4651_v8 }
 0x623   : > { %v3120_v18 = vpop.eup %3119 }
 0x624   : > { %v2798_v43 = vcombine.high %v2775_v50, %v4653_v21  ;;  %v2711_v17 = vrot.slane %v3120_v18, %v4651_v8  ;;  %v2782_v34 = vrot.slane %v2768_v33, %v4652_v16  ;;  %v2704_v57 = vcombine.high %v3120_v18, %v4653_v21  ;;  %v4660_v33 = vld [vmem:[#allocation28_spill] sm:$0xff] }
 0x625   : > { %v2790_v19 = vrot.slane %v2767_v3, %v4652_v16  ;;  %v2783_v9 = vcombine.high %v2767_v3, %v4653_v21  ;;  %v4661_v3 = vld [vmem:[#allocation34_spill] sm:$0xff] }
 0x626   : > { %2831 = vrot.lane.b32.xlu0 %v2798_v43, %s3231_s26  ;;  %v2726_v36 = vrot.slane %v2711_v17, %v4652_v16  ;;  %v2719_v20 = vcombine.high %v2711_v17, %v4653_v21  ;;  %v2718_v53 = vrot.slane %v2704_v57, %v4651_v8  ;;  %v2799_v12 = vcombine.high %v2782_v34, %v4653_v21  ;;  %v4657_v8 = vld [vmem:[#allocation35_spill] sm:$0xff]  ;;  %v4659_v43 = vld [vmem:[#allocation32_spill] sm:$0xff] }
 0x627   : > { %v2800_v4 = vcombine.high %v2790_v19, %v4653_v21  ;;  %v2797_v24 = vrot.slane %v2783_v9, %v4652_v16 }
 0x628   : > { %v2749_v45 = vcombine.high %v2726_v36, %v4653_v21  ;;  %v2733_v42 = vrot.slane %v2719_v20, %v4652_v16  ;;  %v2741_v51 = vrot.slane %v2718_v53, %v4652_v16  ;;  %v2734_v15 = vcombine.high %v2718_v53, %v4653_v21 }
 0x629   : > { %v2801_v44 = vcombine.high %v2797_v24, %v4653_v21 }
 0x62a   : > { %2803 = vrot.lane.b32.xlu1 %v2749_v45, %s3231_s26  ;;  %2835 = vrot.lane.b32.xlu0 %v2782_v34, %s3229_s20  ;;  %v2750_v25 = vcombine.high %v2733_v42, %v4653_v21  ;;  %v2751_v46 = vcombine.high %v2741_v51, %v4653_v21  ;;  %v2748_v10 = vrot.slane %v2734_v15, %v4652_v16 }
 0x62c   : > { %v2752_v40 = vcombine.high %v2748_v10, %v4653_v21  ;;  %v4658_v21 = vld [vmem:[#allocation30_spill] sm:$0xff] }
 0x62e   : > { %2807 = vrot.lane.b32.xlu1 %v2733_v42, %s3229_s20  ;;  %2843 = vrot.lane.b32.xlu0 %v2790_v19, %s3227_s7  ;;  %s4497_s20 = scalar_lea.hbm %s4552_s4, %s3011_s30 }
 0x632   : > { %2815 = vrot.lane.b32.xlu1 %v2741_v51, %s3227_s7  ;;  %2839 = vrot.lane.b32.xlu0 %v2799_v12, %s3230_s22 }
 0x636   : > { %2811 = vrot.lane.b32.xlu1 %v2750_v25, %s3230_s22  ;;  %2847 = vrot.lane.b32.xlu0 %v2800_v4, %s3228_s9  ;;  %s3241_s22 = smov [#allocation6]  }
 0x637   : > { %s3155_s8 = sshll.u32 %s3241_s22, 4  ;;  %s3156_s8 = int_to_ptr.vmem [resolvable:$false] %s3155_s8 }
 0x638   : > { %s3157_s10 = scalar_lea.vmem %s3156_s8, 2048 }
 0x63a   : > { %2819 = vrot.lane.b32.xlu1 %v2751_v46, %s3228_s9  ;;  %2851 = vrot.lane.b32.xlu0 %v2797_v24, %s3225_s5 }
 0x63e   : > { %2823 = vrot.lane.b32.xlu1 %v2748_v10, %s3225_s5  ;;  %2855 = vrot.lane.b32.xlu0 %v2801_v44, %s3226_s6  ;;  %s215_s5 = scalar_lea.vmem [#allocation6], %s2996_s14 }
 0x642   : > { %2827 = vrot.lane.b32.xlu1 %v2752_v40, %s3226_s6  ;;  %s2916_s6 = sshll.u32 %s215_s5, 4  ;;  %s4503_s6 = int_to_ptr.vmem [resolvable:$true] %s2916_s6 }
 0x643   : > { %s3151_s14 = scalar_lea.vmem %s4503_s6, 1024  ;;  %p3158_p8 = scmp.lt.s32.totalorder %s4503_s6, %s3156_s8 }
 0x644   : > { %p3152_p6 = scmp.ne.s32.totalorder %s4503_s6, %s3151_s14  ;;  %p3159_p10 = scmp.lt.s32.totalorder %s3157_s10, %s3151_s14 }
 0x646   : > { %p3153_p12 = pnand %p3152_p6, %p4662_p11  ;;  %p3160_p0 = por %p3159_p10, %p3158_p8 }
 0x648   : > { %p3154_p13 = pneg %p3153_p12 }
 0x64a   : > { %p3161_p2 = pnand %p3160_p0, %p3154_p13 }
 0x698   : > { %v2832_v56 = vpop.permute.xlu0 %2831 }
 0x699   : > { %v2871_v31 = vsel %vm2858_vm11, %v2775_v50, %v2832_v56 }
 0x69c   : > { %v2804_v62 = vpop.permute.xlu1 %2803  ;;  %v2836_v14 = vpop.permute.xlu0 %2835 }
 0x69d   : > { %v2872_v37 = vsel %vm314_vm5, %v2871_v31, %v2836_v14  ;;  %v2859_v49 = vsel %vm2858_vm11, %v2726_v36, %v2804_v62 }
 0x6a0   : > { %v2808_v48 = vpop.permute.xlu1 %2807  ;;  %v2844_v30 = vpop.permute.xlu0 %2843 }
 0x6a1   : > { %v2860_v22 = vsel %vm314_vm5, %v2859_v49, %v2808_v48 }
 0x6a4   : > { %v2816_v5 = vpop.permute.xlu1 %2815  ;;  %v2840_v6 = vpop.permute.xlu0 %2839 }
 0x6a5   : > { %v2873_v27 = vsel %vm2861_vm12, %v2872_v37, %v2840_v6 }
 0x6a6   : > { %v2874_v2 = vsel %vm2863_vm13, %v2873_v27, %v2844_v30 }
 0x6a8   : > { %v2812_v47 = vpop.permute.xlu1 %2811  ;;  %v2848_v11 = vpop.permute.xlu0 %2847 }
 0x6a9   : > { %v2862_v52 = vsel %vm2861_vm12, %v2860_v22, %v2812_v47  ;;  %v2875_v29 = vsel %vm2865_vm14, %v2874_v2, %v2848_v11 }
 0x6aa   : > { %v2864_v23 = vsel %vm2863_vm13, %v2862_v52, %v2816_v5 }
 0x6ac   : > { %v2820_v35 = vpop.permute.xlu1 %2819  ;;  %v2852_v13 = vpop.permute.xlu0 %2851 }
 0x6ad   : > { %v2876_v58 = vsel %vm2867_vm15, %v2875_v29, %v2852_v13  ;;  %v2866_v59 = vsel %vm2865_vm14, %v2864_v23, %v2820_v35 }
 0x6b0   : > { %v2824_v55 = vpop.permute.xlu1 %2823  ;;  %v2856_v26 = vpop.permute.xlu0 %2855 }
 0x6b1   : > { %v2877_v7 = vsel %vm2869_vm0, %v2876_v58, %v2856_v26  ;;  %v2868_v1 = vsel %vm2867_vm15, %v2866_v59, %v2824_v55 }
 0x6b2   : > { %v2885_v0 = vrot.slane %v2877_v7, %v3437_v61 }
 0x6b4   : > { %v2887_v38 = vmul.f32 %v2885_v0, %v4654_v28  ;;  %v2889_v60 = vmul.f32 %v2885_v0, %v4655_v39  ;;  %v2891_v54 = vmul.f32 %v2885_v0, %v4656_v41  ;;  %v2893_v63 = vmul.f32 %v2885_v0, %v4657_v8  ;;  %v2828_v16 = vpop.permute.xlu1 %2827 }
 0x6b5   : > { %v2870_v50 = vsel %vm2869_vm0, %v2868_v1, %v2828_v16 }
 0x6b6   : > { %2895 = vst [vmem:[%s215_s5 + $0x8] sm:$0xff] %v2887_v38  ;;  %2897 = vst [vmem:[%s215_s5 + $0x18] sm:$0xff] %v2889_v60  ;;  %v2881_v18 = vrot.slane %v2870_v50, %v3437_v61 }
 0x6b7   : > { %2899 = vst [vmem:[%s215_s5 + $0x28] sm:$0xff] %v2891_v54  ;;  %2901 = vst [vmem:[%s215_s5 + $0x38] sm:$0xff] %v2893_v63 }
 0x6b8   : > { %v2886_v32 = vmul.f32 %v2881_v18, %v4658_v21  ;;  %v2888_v17 = vmul.f32 %v2881_v18, %v4659_v43  ;;  %v2890_v36 = vmul.f32 %v2881_v18, %v4660_v33  ;;  %v2892_v45 = vmul.f32 %v2881_v18, %v4661_v3 }
 0x6ba   : > { %2894 = vst [vmem:[%s215_s5] sm:$0xff] %v2886_v32  ;;  %2896 = vst [vmem:[%s215_s5 + $0x10] sm:$0xff] %v2888_v17 }
 0x6bb   : > { %2898 = vst [vmem:[%s215_s5 + $0x20] sm:$0xff] %v2890_v36  ;;  %2900 = vst [vmem:[%s215_s5 + $0x30] sm:$0xff] %v2892_v45 }
 0x6bc   : > { %3164 = shalt.err (!%p3161_p2)
}
 0x6bd   : > { %s3165_s11 = scalar_lea.hbm %s4497_s20, 1024  ;;  %s3169_s25 = scalar_lea.hbm %s4552_s4, 2048 }
 0x6be   : > { %p3166_p4 = scmp.ne.s32.totalorder %s4497_s20, %s3165_s11  ;;  %p3170_p9 = scmp.lt.u32.totalorder %s4497_s20, %s4552_s4 }
 0x6bf   : > { %p3171_p1 = scmp.lt.u32.totalorder %s3169_s25, %s3165_s11  ;;  %p3173_p6 = scmp.lt.u32.totalorder %s3165_s11, %s4497_s20 }
 0x6c0   : > { %p3167_p5 = pnand %p3166_p4, %p4662_p11 }
 0x6c1   : > { %p3172_p3 = por %p3171_p1, %p3170_p9 }
 0x6c2   : > { %p3168_p7 = pneg %p3167_p5 }
 0x6c3   : > { %p3174_p12 = por %p3173_p6, %p3172_p3 }
 0x6c5   : > { %p3175_p13 = pnand %p3174_p12, %p3168_p7 }
 0x6c7   : > { %3178 = shalt.err (!%p3175_p13)
}
 0x6c8   : > { %s3242_s5 = smov 256  }
 0x6c9   : > { %3043 = dma.vmem_to_hbm [thread:$0]  (%p4662_p11), %s4503_s6, 1024, %s4497_s20, %s2903_s19, %s3242_s5, %s3242_s5, %s3231_s26  }
 0x6ca PF: > { %s2931_s7 = sand.u32 1, %s3205_s15   ;;  %p4663_p8 = scmp.ne.s32.totalorder %s4592_s28, 0 }
 0x6cb   : > { %p4664_p10 = scmp.ge.s32.totalorder %s3217_s18, 2  ;;  %s2932_s9 = scalar_lea.sflag [#allocation5], %s2931_s7 }
 0x6cd   : > { %p3050_p0 = pnand %p4664_p10, %p4663_p8 }
 0x6cf   : > { %3200 = dma.done.wait (!%p3050_p0), %s2932_s9, 1024  }
 0x6d0   : > { %3202 = vsyncadd (!%p3050_p0), %s2932_s9, 4294966272  ;;  %p17_p2 = scmp.ge.s32.totalorder %s3293_s21, 4   ;;  %s4665_s15 = smov %s3209_s16 }
 0x6d1   : > { %s4666_s16 = smov %s3213_s17  ;;  %s4667_s17 = smov %s3305_s24 }
 0x6d2   : > { %s4668_s18 = smov %s3293_s21  ;;  %19 = sbr.rel (!%p17_p2) target bundleno = 5 (0x5), region = 81 }
 0x6d9   :  { %2937 = vsyncpa [#allocation4], 1 }
 0x6da   :  { %2939 = vsyncpa [#allocation4 + $0x1], 1 }
 0x6db   :  { %2940 = vsyncpa [#allocation5], 1 }
 0x6dc   :  { %2942 = vsyncpa [#allocation5 + $0x1], 1 }

</bundles_post_ra>
